<compile_context>
chip_gen: v6e
topology: v6e:2x2x1
jax: 0.10.0
libtpu: 0.0.40
codegen_flags: <defaults>
</compile_context>

<pallas_src>
import numpy as np
import jax
import jax.numpy as jnp
from jax import lax
from jax.experimental import pallas as pl
from jax.experimental.pallas import tpu as pltpu


def mish(x):
    # PyTorch nn.Mish: x * tanh(softplus(x)), softplus threshold = 20
    sp = jnp.where(x > 20.0, x, jnp.log(1.0 + jnp.exp(jnp.minimum(x, 20.0))))
    return x * jnp.tanh(sp)


def _round_up(v, m):
    return ((v + m - 1) // m) * m


# ------------------------------ geometry ------------------------------------

def make_geometry(batch, in_ch, filt_list, input_size):
    """Static per-block shapes for the channel-major padded-flat-grid layout."""
    blocks = []
    H = input_size
    cin = in_ch
    for cout in filt_list:
        Hp = H + 2                       # pad=1 each side (kernel 3)
        Wp = Hp
        HpWp = Hp * Wp
        # last lane holding a valid conv output / pool anchor
        o_max = (batch - 1) * HpWp + (H - 1) * Wp + (H - 1)
        Mc = _round_up(o_max + 1, 128)   # conv-output lane width
        Mv = Mc - Wp                     # vertical-max width
        Mh = Mv - 1                      # pooled-max width
        Lin = _round_up(Mc + 2 * Wp + 2, 128)   # input-slab lane width
        Ho = H // 2
        blocks.append(dict(cin=cin, cout=cout, H=H, Hp=Hp, Wp=Wp, HpWp=HpWp,
                           Mc=Mc, Mv=Mv, Mh=Mh, Lin=Lin, Ho=Ho))
        H = Ho
        cin = cout
    return blocks


# --------------------------- fused Pallas kernel ----------------------------

def make_fused_kernel(blocks, batch):
    nb = len(blocks)
    S = blocks[-1]["Ho"] * blocks[-1]["Ho"]
    c_last = blocks[-1]["cout"]

    def kernel(*refs):
        idx = 0
        xp_ref = refs[idx]; idx += 1
        blk = [refs[idx + 3 * b: idx + 3 * b + 3] for b in range(nb)]
        idx += 3 * nb
        w1_ref, b1_ref, w2_ref, b2_ref = refs[idx:idx + 4]; idx += 4
        o_ref = refs[idx]; idx += 1
        x9_scr = refs[idx:idx + nb]; idx += nb
        feats_scr = refs[idx]

        cur = None          # channel-major activation value (Cin, Lin)
        feat_cm = None      # (C_last, batch*S) gathered features
        for b, g in enumerate(blocks):
            w9_ref, sh_ref, sel_ref = blk[b]
            Wp, Mc, Mv, Mh, cin = g["Wp"], g["Mc"], g["Mv"], g["Mh"], g["cin"]
            x9 = x9_scr[b]

            # ---- im2col: nine lane-shifted taps stacked along sublanes -----
            for t in range(9):
                dy, dx = divmod(t, 3)
                off = dy * Wp + dx
                if b == 0:
                    tap = xp_ref[:, off:off + Mc]        # ref lane slice
                else:
                    tap = cur[:, off:off + Mc]           # value lane slice
                x9[t * cin:(t + 1) * cin, :] = tap

            # ---- conv = ONE MXU matmul; BN shift folded; Mish --------------
            z = jnp.dot(w9_ref[...], x9[...],
                        preferred_element_type=jnp.float32) + sh_ref[...]
            z = mish(z)

            # ---- 2x2/2 max pool: two lane-shifted maxima --------------------
            vm = jnp.maximum(z[:, :Mv], z[:, Wp:Wp + Mv])
            hm = jnp.maximum(vm[:, :Mh], vm[:, 1:1 + Mh])

            # ---- gather anchors (+ scatter into next padded grid) ----------
            nxt = jnp.dot(hm, sel_ref[...], preferred_element_type=jnp.float32)
            if b + 1 < nb:
                cur = nxt                 # (Cout, Lin_{b+1}), padding == 0
            else:
                feat_cm = nxt             # (C_last, batch*S), NCHW order in c,s

        # ---- NCHW flatten: 32 tiny lane-slice stores into (batch, C*S) -----
        for n in range(batch):
            for c in range(c_last):
                feats_scr[n:n + 1, c * S:(c + 1) * S] = \
                    feat_cm[c:c + 1, n * S:(n + 1) * S]
        feats = feats_scr[...]                              # (batch, C_last*S)

        # ---- classifier: Linear(256,256) -> Mish -> Linear(256,classes) ----
        h = mish(jnp.dot(feats, w1_ref[...],
                         preferred_element_type=jnp.float32) + b1_ref[...])
        o_ref[...] = jnp.dot(h, w2_ref[...],
                             preferred_element_type=jnp.float32) + b2_ref[...]

    return kernel


def build_forward(blocks, batch, num_classes):
    nb = len(blocks)
    g0 = blocks[0]
    S = blocks[-1]["Ho"] * blocks[-1]["Ho"]
    c_last = blocks[-1]["cout"]
    kernel = make_fused_kernel(blocks, batch)
    n_inputs = 1 + 3 * nb + 4

    scratch = [pltpu.VMEM((9 * blocks[b]["cin"], blocks[b]["Mc"]), jnp.float32)
               for b in range(nb)]
    scratch.append(pltpu.VMEM((batch, c_last * S), jnp.float32))

    call = pl.pallas_call(
        kernel,
        out_shape=jax.ShapeDtypeStruct((batch, num_classes), jnp.float32),
        in_specs=[pl.BlockSpec(memory_space=pltpu.MemorySpace.VMEM)] * n_inputs,
        out_specs=pl.BlockSpec(memory_space=pltpu.MemorySpace.VMEM),
        scratch_shapes=scratch,
    )

    def forward(params, x_nchw):
        # Tiny XLA-side prep: NCHW -> channel-major zero-padded flat slab.
        x = jnp.pad(x_nchw, ((0, 0), (0, 0), (1, 1), (1, 1)))
        x = jnp.transpose(x, (1, 0, 2, 3)).reshape(g0["cin"],
                                                   batch * g0["HpWp"])
        x = jnp.pad(x, ((0, 0), (0, g0["Lin"] - batch * g0["HpWp"])))
        flat = [x]
        for (w9, sh, sel) in params["blocks"]:
            flat += [w9, sh, sel]
        flat += [params["w1t"], params["b1"], params["w2t"], params["b2"]]
        return call(*flat)

    return forward


# -------------------------- parameter construction --------------------------

def init_params(key, in_ch, filt_list, ksize, num_classes, input_size,
                batch, hidden=256, eps=1e-5):
    geom = make_geometry(batch, in_ch, filt_list, input_size)
    raw = {"conv": []}
    folded_blocks = []
    c_prev = in_ch
    nb = len(filt_list)
    for bi, f in enumerate(filt_list):
        key, kw, kb, kg, kbe, km, kv = jax.random.split(key, 7)
        bound = 1.0 / np.sqrt(c_prev * ksize * ksize)
        w_oihw = jax.random.uniform(kw, (f, c_prev, ksize, ksize), jnp.float32,
                                    -bound, bound)
        b = jax.random.uniform(kb, (f,), jnp.float32, -bound, bound)
        gamma = jax.random.uniform(kg, (f,), jnp.float32, 0.8, 1.2)
        beta = jax.random.uniform(kbe, (f,), jnp.float32, -0.1, 0.1)
        rmean = jax.random.uniform(km, (f,), jnp.float32, -0.1, 0.1)
        rvar = jax.random.uniform(kv, (f,), jnp.float32, 0.5, 1.5)
        raw["conv"].append(dict(w=w_oihw, b=b, gamma=gamma, beta=beta,
                                rmean=rmean, rvar=rvar))

        scale = gamma / jnp.sqrt(rvar + eps)
        shift = (beta + (b - rmean) * scale).reshape(f, 1)
        # im2col weight: (Cout, 9*Cin), row order t*Cin + ci, BN scale folded.
        w9 = jnp.transpose(w_oihw * scale[:, None, None, None],
                           (0, 2, 3, 1)).reshape(f, ksize * ksize * c_prev)

        # 0/1 selection matmul (right operand): gathers 2x2-max anchors for
        # the whole batch and scatters them into the next block's zero-padded
        # flat grid (or compacts them into NCHW feature columns).
        g = geom[bi]
        Ho, Wp, HpWp, Mh = g["Ho"], g["Wp"], g["HpWp"], g["Mh"]
        if bi + 1 < nb:
            g2 = geom[bi + 1]
            sel = np.zeros((Mh, g2["Lin"]), np.float32)
            for n in range(batch):
                for i in range(Ho):
                    for j in range(Ho):
                        src = n * HpWp + 2 * i * Wp + 2 * j
                        dst = n * g2["HpWp"] + (i + 1) * g2["Wp"] + (j + 1)
                        sel[src, dst] = 1.0
        else:
            S = Ho * Ho
            sel = np.zeros((Mh, batch * S), np.float32)
            for n in range(batch):
                for i in range(Ho):
                    for j in range(Ho):
                        src = n * HpWp + 2 * i * Wp + 2 * j
                        sel[src, n * S + i * Ho + j] = 1.0
        folded_blocks.append((w9, shift, jnp.asarray(sel)))
        c_prev = f

    final_spatial = input_size // (2 ** nb)
    feat_dim = filt_list[-1] * final_spatial * final_spatial
    key, k1, k2, k3, k4 = jax.random.split(key, 5)
    bound1 = 1.0 / np.sqrt(feat_dim)
    w1 = jax.random.uniform(k1, (hidden, feat_dim), jnp.float32, -bound1, bound1)
    b1 = jax.random.uniform(k2, (hidden,), jnp.float32, -bound1, bound1)
    bound2 = 1.0 / np.sqrt(hidden)
    w2 = jax.random.uniform(k3, (num_classes, hidden), jnp.float32, -bound2, bound2)
    b2 = jax.random.uniform(k4, (num_classes,), jnp.float32, -bound2, bound2)
    raw.update(w1=w1, b1=b1, w2=w2, b2=b2)

    # Kernel consumes features already in PyTorch NCHW-flatten order, so the
    # classifier weights are used untouched (just transposed for x @ W^T).
    folded = dict(blocks=folded_blocks, w1t=w1.T, b1=b1.reshape(1, hidden),
                  w2t=w2.T, b2=b2.reshape(1, num_classes))
    return folded, raw, geom


# ---------------------------- pure-JAX reference ----------------------------

def reference_forward(raw, x, ksize=3, eps=1e-5):
    p = ksize // 2
    y = x
    for blk in raw["conv"]:
        y = lax.conv_general_dilated(
            y, blk["w"], window_strides=(1, 1), padding=[(p, p), (p, p)],
            dimension_numbers=("NCHW", "OIHW", "NCHW"),
            precision=lax.Precision.HIGHEST)
        y = y + blk["b"][None, :, None, None]
        scale = (blk["gamma"] / jnp.sqrt(blk["rvar"] + eps))[None, :, None, None]
        y = (y - blk["rmean"][None, :, None, None]) * scale \
            + blk["beta"][None, :, None, None]
        y = mish(y)
        y = lax.reduce_window(y, jnp.array(-jnp.inf, y.dtype), lax.max,
                              (1, 1, 2, 2), (1, 1, 2, 2), "VALID")
    y = y.reshape(y.shape[0], -1)
    y = mish(jnp.dot(y, raw["w1"].T, precision=lax.Precision.HIGHEST) + raw["b1"])
    return jnp.dot(y, raw["w2"].T, precision=lax.Precision.HIGHEST) + raw["b2"]


# ----------------------------------- main ------------------------------------

if __name__ == "__main__":
    in_ch, filt_list, ksize = 4, [8, 16], 3
    num_classes, input_size, batch = 10, 16, 2

    key = jax.random.PRNGKey(0)
    key, kx = jax.random.split(key)
    x = jax.random.normal(kx, (batch, in_ch, input_size, input_size), jnp.float32)

    params, raw, geom = init_params(key, in_ch, filt_list, ksize,
                                    num_classes, input_size, batch)

    forward = jax.jit(build_forward(geom, batch, num_classes))
    out = jax.block_until_ready(forward(params, x))

    assert out.shape == (batch, num_classes)
    assert bool(jnp.all(jnp.isfinite(out)))

    ref = reference_forward(raw, x, ksize=ksize)
    np.testing.assert_allclose(np.asarray(out), np.asarray(ref),
                               rtol=2e-2, atol=2e-2)

    print("KERNEL_OK")
</pallas_src>

<mosaic_0001>
module attributes {stable_mosaic.version = 11 : i64} {
  func.func @kernel(%arg0: memref<4x768xf32, #tpu.memory_space<vmem>>, %arg1: memref<8x36xf32, #tpu.memory_space<vmem>>, %arg2: memref<8x1xf32, #tpu.memory_space<vmem>>, %arg3: memref<621x384xf32, #tpu.memory_space<vmem>>, %arg4: memref<16x72xf32, #tpu.memory_space<vmem>>, %arg5: memref<16x1xf32, #tpu.memory_space<vmem>>, %arg6: memref<245x32xf32, #tpu.memory_space<vmem>>, %arg7: memref<256x256xf32, #tpu.memory_space<vmem>>, %arg8: memref<1x256xf32, #tpu.memory_space<vmem>>, %arg9: memref<256x10xf32, #tpu.memory_space<vmem>>, %arg10: memref<1x10xf32, #tpu.memory_space<vmem>>, %arg11: memref<2x10xf32, #tpu.memory_space<vmem>>, %arg12: memref<36x640xf32, #tpu.memory_space<vmem>>, %arg13: memref<72x256xf32, #tpu.memory_space<vmem>>, %arg14: memref<2x256xf32, #tpu.memory_space<vmem>>) attributes {dimension_semantics = [], scalar_prefetch = 0 : i64, scratch_operands = 3 : i64, tpu.core_type = #tpu.core_type<tc>} {
    %c0 = arith.constant 0 : index
    %c0_0 = arith.constant 0 : index
    %0 = vector.load %arg0[%c0, %c0_0] : memref<4x768xf32, #tpu.memory_space<vmem>>, vector<4x640xf32>
    %c0_1 = arith.constant 0 : index
    %c0_2 = arith.constant 0 : index
    %1 = vector.load %arg12[%c0_1, %c0_2] : memref<36x640xf32, #tpu.memory_space<vmem>>, vector<4x640xf32>
    tpu.vector_store %arg12[%c0_1, %c0_2], %0 {strides = array<i32>} : memref<36x640xf32, #tpu.memory_space<vmem>>, vector<4x640xf32>,
    %c0_3 = arith.constant 0 : index
    %c1 = arith.constant 1 : index
    %2 = vector.load %arg0[%c0_3, %c1] : memref<4x768xf32, #tpu.memory_space<vmem>>, vector<4x640xf32>
    %c4 = arith.constant 4 : index
    %c0_4 = arith.constant 0 : index
    %3 = vector.load %arg12[%c4, %c0_4] : memref<36x640xf32, #tpu.memory_space<vmem>>, vector<4x640xf32>
    tpu.vector_store %arg12[%c4, %c0_4], %2 {strides = array<i32>} : memref<36x640xf32, #tpu.memory_space<vmem>>, vector<4x640xf32>,
    %c0_5 = arith.constant 0 : index
    %c2 = arith.constant 2 : index
    %4 = vector.load %arg0[%c0_5, %c2] : memref<4x768xf32, #tpu.memory_space<vmem>>, vector<4x640xf32>
    %c8 = arith.constant 8 : index
    %c0_6 = arith.constant 0 : index
    %5 = vector.load %arg12[%c8, %c0_6] : memref<36x640xf32, #tpu.memory_space<vmem>>, vector<4x640xf32>
    tpu.vector_store %arg12[%c8, %c0_6], %4 {strides = array<i32>} : memref<36x640xf32, #tpu.memory_space<vmem>>, vector<4x640xf32>,
    %c0_7 = arith.constant 0 : index
    %c18 = arith.constant 18 : index
    %6 = vector.load %arg0[%c0_7, %c18] : memref<4x768xf32, #tpu.memory_space<vmem>>, vector<4x640xf32>
    %c12 = arith.constant 12 : index
    %c0_8 = arith.constant 0 : index
    %7 = vector.load %arg12[%c12, %c0_8] : memref<36x640xf32, #tpu.memory_space<vmem>>, vector<4x640xf32>
    tpu.vector_store %arg12[%c12, %c0_8], %6 {strides = array<i32>} : memref<36x640xf32, #tpu.memory_space<vmem>>, vector<4x640xf32>,
    %c0_9 = arith.constant 0 : index
    %c19 = arith.constant 19 : index
    %8 = vector.load %arg0[%c0_9, %c19] : memref<4x768xf32, #tpu.memory_space<vmem>>, vector<4x640xf32>
    %c16 = arith.constant 16 : index
    %c0_10 = arith.constant 0 : index
    %9 = vector.load %arg12[%c16, %c0_10] : memref<36x640xf32, #tpu.memory_space<vmem>>, vector<4x640xf32>
    tpu.vector_store %arg12[%c16, %c0_10], %8 {strides = array<i32>} : memref<36x640xf32, #tpu.memory_space<vmem>>, vector<4x640xf32>,
    %c0_11 = arith.constant 0 : index
    %c20 = arith.constant 20 : index
    %10 = vector.load %arg0[%c0_11, %c20] : memref<4x768xf32, #tpu.memory_space<vmem>>, vector<4x640xf32>
    %c20_12 = arith.constant 20 : index
    %c0_13 = arith.constant 0 : index
    %11 = vector.load %arg12[%c20_12, %c0_13] : memref<36x640xf32, #tpu.memory_space<vmem>>, vector<4x640xf32>
    tpu.vector_store %arg12[%c20_12, %c0_13], %10 {strides = array<i32>} : memref<36x640xf32, #tpu.memory_space<vmem>>, vector<4x640xf32>,
    %c0_14 = arith.constant 0 : index
    %c36 = arith.constant 36 : index
    %12 = vector.load %arg0[%c0_14, %c36] : memref<4x768xf32, #tpu.memory_space<vmem>>, vector<4x640xf32>
    %c24 = arith.constant 24 : index
    %c0_15 = arith.constant 0 : index
    %13 = vector.load %arg12[%c24, %c0_15] : memref<36x640xf32, #tpu.memory_space<vmem>>, vector<4x640xf32>
    tpu.vector_store %arg12[%c24, %c0_15], %12 {strides = array<i32>} : memref<36x640xf32, #tpu.memory_space<vmem>>, vector<4x640xf32>,
    %c0_16 = arith.constant 0 : index
    %c37 = arith.constant 37 : index
    %14 = vector.load %arg0[%c0_16, %c37] : memref<4x768xf32, #tpu.memory_space<vmem>>, vector<4x640xf32>
    %c28 = arith.constant 28 : index
    %c0_17 = arith.constant 0 : index
    %15 = vector.load %arg12[%c28, %c0_17] : memref<36x640xf32, #tpu.memory_space<vmem>>, vector<4x640xf32>
    tpu.vector_store %arg12[%c28, %c0_17], %14 {strides = array<i32>} : memref<36x640xf32, #tpu.memory_space<vmem>>, vector<4x640xf32>,
    %c0_18 = arith.constant 0 : index
    %c38 = arith.constant 38 : index
    %16 = vector.load %arg0[%c0_18, %c38] : memref<4x768xf32, #tpu.memory_space<vmem>>, vector<4x640xf32>
    %c32 = arith.constant 32 : index
    %c0_19 = arith.constant 0 : index
    %17 = vector.load %arg12[%c32, %c0_19] : memref<36x640xf32, #tpu.memory_space<vmem>>, vector<4x640xf32>
    tpu.vector_store %arg12[%c32, %c0_19], %16 {strides = array<i32>} : memref<36x640xf32, #tpu.memory_space<vmem>>, vector<4x640xf32>,
    %c0_20 = arith.constant 0 : index
    %c0_21 = arith.constant 0 : index
    %18 = vector.load %arg1[%c0_20, %c0_21] : memref<8x36xf32, #tpu.memory_space<vmem>>, vector<8x36xf32>
    %c0_22 = arith.constant 0 : index
    %c0_23 = arith.constant 0 : index
    %19 = vector.load %arg12[%c0_22, %c0_23] : memref<36x640xf32, #tpu.memory_space<vmem>>, vector<36x640xf32>
    %cst = arith.constant dense<0.000000e+00> : vector<8x640xf32>
    %20 = tpu.matmul %18, %19, %cst {dimension_numbers = #tpu.dot_dimension_numbers<[1], [0], [0], [1], [0, 0, 1, 1], [], []>} : vector<8x36xf32>, vector<36x640xf32>, vector<8x640xf32> -> vector<8x640xf32>
    %c0_24 = arith.constant 0 : index
    %c0_25 = arith.constant 0 : index
    %21 = vector.load %arg2[%c0_24, %c0_25] : memref<8x1xf32, #tpu.memory_space<vmem>>, vector<8x1xf32>
    %22 = vector.broadcast %21 : vector<8x1xf32> to vector<8x640xf32>
    %23 = arith.addf %20, %22 : vector<8x640xf32>
    %cst_26 = arith.constant 2.000000e+01 : f32
    %24 = vector.broadcast %cst_26 : f32 to vector<8x640xf32>
    %25 = arith.cmpf ogt, %23, %24 : vector<8x640xf32>
    %cst_27 = arith.constant 2.000000e+01 : f32
    %26 = vector.broadcast %cst_27 : f32 to vector<8x640xf32>
    %27 = arith.minimumf %23, %26 : vector<8x640xf32>
    %28 = math.exp %27 : vector<8x640xf32>
    %cst_28 = arith.constant 1.000000e+00 : f32
    %29 = vector.broadcast %cst_28 : f32 to vector<8x640xf32>
    %30 = arith.addf %29, %28 : vector<8x640xf32>
    %31 = math.log %30 : vector<8x640xf32>
    %32 = arith.select %25, %23, %31 : vector<8x640xi1>, vector<8x640xf32>
    %33 = math.tanh %32 : vector<8x640xf32>
    %34 = arith.mulf %23, %33 : vector<8x640xf32>
    %35 = vector.extract_strided_slice %34 {offsets = [0, 0], sizes = [8, 622], strides = [1, 1]} : vector<8x640xf32> to vector<8x622xf32>
    %36 = vector.extract_strided_slice %34 {offsets = [0, 18], sizes = [8, 622], strides = [1, 1]} : vector<8x640xf32> to vector<8x622xf32>
    %37 = arith.maximumf %35, %36 : vector<8x622xf32>
    %38 = vector.extract_strided_slice %37 {offsets = [0, 0], sizes = [8, 621], strides = [1, 1]} : vector<8x622xf32> to vector<8x621xf32>
    %39 = vector.extract_strided_slice %37 {offsets = [0, 1], sizes = [8, 621], strides = [1, 1]} : vector<8x622xf32> to vector<8x621xf32>
    %40 = arith.maximumf %38, %39 : vector<8x621xf32>
    %c0_29 = arith.constant 0 : index
    %c0_30 = arith.constant 0 : index
    %41 = vector.load %arg3[%c0_29, %c0_30] : memref<621x384xf32, #tpu.memory_space<vmem>>, vector<621x384xf32>
    %cst_31 = arith.constant dense<0.000000e+00> : vector<8x384xf32>
    %42 = tpu.matmul %40, %41, %cst_31 {dimension_numbers = #tpu.dot_dimension_numbers<[1], [0], [0], [1], [0, 0, 1, 1], [], []>} : vector<8x621xf32>, vector<621x384xf32>, vector<8x384xf32> -> vector<8x384xf32>
    %43 = vector.extract_strided_slice %42 {offsets = [0, 0], sizes = [8, 256], strides = [1, 1]} : vector<8x384xf32> to vector<8x256xf32>
    %c0_32 = arith.constant 0 : index
    %c0_33 = arith.constant 0 : index
    %44 = vector.load %arg13[%c0_32, %c0_33] : memref<72x256xf32, #tpu.memory_space<vmem>>, vector<8x256xf32>
    tpu.vector_store %arg13[%c0_32, %c0_33], %43 {strides = array<i32>} : memref<72x256xf32, #tpu.memory_space<vmem>>, vector<8x256xf32>,
    %45 = vector.extract_strided_slice %42 {offsets = [0, 1], sizes = [8, 256], strides = [1, 1]} : vector<8x384xf32> to vector<8x256xf32>
    %c8_34 = arith.constant 8 : index
    %c0_35 = arith.constant 0 : index
    %46 = vector.load %arg13[%c8_34, %c0_35] : memref<72x256xf32, #tpu.memory_space<vmem>>, vector<8x256xf32>
    tpu.vector_store %arg13[%c8_34, %c0_35], %45 {strides = array<i32>} : memref<72x256xf32, #tpu.memory_space<vmem>>, vector<8x256xf32>,
    %47 = vector.extract_strided_slice %42 {offsets = [0, 2], sizes = [8, 256], strides = [1, 1]} : vector<8x384xf32> to vector<8x256xf32>
    %c16_36 = arith.constant 16 : index
    %c0_37 = arith.constant 0 : index
    %48 = vector.load %arg13[%c16_36, %c0_37] : memref<72x256xf32, #tpu.memory_space<vmem>>, vector<8x256xf32>
    tpu.vector_store %arg13[%c16_36, %c0_37], %47 {strides = array<i32>} : memref<72x256xf32, #tpu.memory_space<vmem>>, vector<8x256xf32>,
    %49 = vector.extract_strided_slice %42 {offsets = [0, 10], sizes = [8, 256], strides = [1, 1]} : vector<8x384xf32> to vector<8x256xf32>
    %c24_38 = arith.constant 24 : index
    %c0_39 = arith.constant 0 : index
    %50 = vector.load %arg13[%c24_38, %c0_39] : memref<72x256xf32, #tpu.memory_space<vmem>>, vector<8x256xf32>
    tpu.vector_store %arg13[%c24_38, %c0_39], %49 {strides = array<i32>} : memref<72x256xf32, #tpu.memory_space<vmem>>, vector<8x256xf32>,
    %51 = vector.extract_strided_slice %42 {offsets = [0, 11], sizes = [8, 256], strides = [1, 1]} : vector<8x384xf32> to vector<8x256xf32>
    %c32_40 = arith.constant 32 : index
    %c0_41 = arith.constant 0 : index
    %52 = vector.load %arg13[%c32_40, %c0_41] : memref<72x256xf32, #tpu.memory_space<vmem>>, vector<8x256xf32>
    tpu.vector_store %arg13[%c32_40, %c0_41], %51 {strides = array<i32>} : memref<72x256xf32, #tpu.memory_space<vmem>>, vector<8x256xf32>,
    %53 = vector.extract_strided_slice %42 {offsets = [0, 12], sizes = [8, 256], strides = [1, 1]} : vector<8x384xf32> to vector<8x256xf32>
    %c40 = arith.constant 40 : index
    %c0_42 = arith.constant 0 : index
    %54 = vector.load %arg13[%c40, %c0_42] : memref<72x256xf32, #tpu.memory_space<vmem>>, vector<8x256xf32>
    tpu.vector_store %arg13[%c40, %c0_42], %53 {strides = array<i32>} : memref<72x256xf32, #tpu.memory_space<vmem>>, vector<8x256xf32>,
    %55 = vector.extract_strided_slice %42 {offsets = [0, 20], sizes = [8, 256], strides = [1, 1]} : vector<8x384xf32> to vector<8x256xf32>
    %c48 = arith.constant 48 : index
    %c0_43 = arith.constant 0 : index
    %56 = vector.load %arg13[%c48, %c0_43] : memref<72x256xf32, #tpu.memory_space<vmem>>, vector<8x256xf32>
    tpu.vector_store %arg13[%c48, %c0_43], %55 {strides = array<i32>} : memref<72x256xf32, #tpu.memory_space<vmem>>, vector<8x256xf32>,
    %57 = vector.extract_strided_slice %42 {offsets = [0, 21], sizes = [8, 256], strides = [1, 1]} : vector<8x384xf32> to vector<8x256xf32>
    %c56 = arith.constant 56 : index
    %c0_44 = arith.constant 0 : index
    %58 = vector.load %arg13[%c56, %c0_44] : memref<72x256xf32, #tpu.memory_space<vmem>>, vector<8x256xf32>
    tpu.vector_store %arg13[%c56, %c0_44], %57 {strides = array<i32>} : memref<72x256xf32, #tpu.memory_space<vmem>>, vector<8x256xf32>,
    %59 = vector.extract_strided_slice %42 {offsets = [0, 22], sizes = [8, 256], strides = [1, 1]} : vector<8x384xf32> to vector<8x256xf32>
    %c64 = arith.constant 64 : index
    %c0_45 = arith.constant 0 : index
    %60 = vector.load %arg13[%c64, %c0_45] : memref<72x256xf32, #tpu.memory_space<vmem>>, vector<8x256xf32>
    tpu.vector_store %arg13[%c64, %c0_45], %59 {strides = array<i32>} : memref<72x256xf32, #tpu.memory_space<vmem>>, vector<8x256xf32>,
    %c0_46 = arith.constant 0 : index
    %c0_47 = arith.constant 0 : index
    %61 = vector.load %arg4[%c0_46, %c0_47] : memref<16x72xf32, #tpu.memory_space<vmem>>, vector<16x72xf32>
    %c0_48 = arith.constant 0 : index
    %c0_49 = arith.constant 0 : index
    %62 = vector.load %arg13[%c0_48, %c0_49] : memref<72x256xf32, #tpu.memory_space<vmem>>, vector<72x256xf32>
    %cst_50 = arith.constant dense<0.000000e+00> : vector<16x256xf32>
    %63 = tpu.matmul %61, %62, %cst_50 {dimension_numbers = #tpu.dot_dimension_numbers<[1], [0], [0], [1], [0, 0, 1, 1], [], []>} : vector<16x72xf32>, vector<72x256xf32>, vector<16x256xf32> -> vector<16x256xf32>
    %c0_51 = arith.constant 0 : index
    %c0_52 = arith.constant 0 : index
    %64 = vector.load %arg5[%c0_51, %c0_52] : memref<16x1xf32, #tpu.memory_space<vmem>>, vector<16x1xf32>
    %65 = vector.broadcast %64 : vector<16x1xf32> to vector<16x256xf32>
    %66 = arith.addf %63, %65 : vector<16x256xf32>
    %cst_53 = arith.constant 2.000000e+01 : f32
    %67 = vector.broadcast %cst_53 : f32 to vector<16x256xf32>
    %68 = arith.cmpf ogt, %66, %67 : vector<16x256xf32>
    %cst_54 = arith.constant 2.000000e+01 : f32
    %69 = vector.broadcast %cst_54 : f32 to vector<16x256xf32>
    %70 = arith.minimumf %66, %69 : vector<16x256xf32>
    %71 = math.exp %70 : vector<16x256xf32>
    %cst_55 = arith.constant 1.000000e+00 : f32
    %72 = vector.broadcast %cst_55 : f32 to vector<16x256xf32>
    %73 = arith.addf %72, %71 : vector<16x256xf32>
    %74 = math.log %73 : vector<16x256xf32>
    %75 = arith.select %68, %66, %74 : vector<16x256xi1>, vector<16x256xf32>
    %76 = math.tanh %75 : vector<16x256xf32>
    %77 = arith.mulf %66, %76 : vector<16x256xf32>
    %78 = vector.extract_strided_slice %77 {offsets = [0, 0], sizes = [16, 246], strides = [1, 1]} : vector<16x256xf32> to vector<16x246xf32>
    %79 = vector.extract_strided_slice %77 {offsets = [0, 10], sizes = [16, 246], strides = [1, 1]} : vector<16x256xf32> to vector<16x246xf32>
    %80 = arith.maximumf %78, %79 : vector<16x246xf32>
    %81 = vector.extract_strided_slice %80 {offsets = [0, 0], sizes = [16, 245], strides = [1, 1]} : vector<16x246xf32> to vector<16x245xf32>
    %82 = vector.extract_strided_slice %80 {offsets = [0, 1], sizes = [16, 245], strides = [1, 1]} : vector<16x246xf32> to vector<16x245xf32>
    %83 = arith.maximumf %81, %82 : vector<16x245xf32>
    %c0_56 = arith.constant 0 : index
    %c0_57 = arith.constant 0 : index
    %84 = vector.load %arg6[%c0_56, %c0_57] : memref<245x32xf32, #tpu.memory_space<vmem>>, vector<245x32xf32>
    %cst_58 = arith.constant dense<0.000000e+00> : vector<16x32xf32>
    %85 = tpu.matmul %83, %84, %cst_58 {dimension_numbers = #tpu.dot_dimension_numbers<[1], [0], [0], [1], [0, 0, 1, 1], [], []>} : vector<16x245xf32>, vector<245x32xf32>, vector<16x32xf32> -> vector<16x32xf32>
    %86 = vector.extract_strided_slice %85 {offsets = [0, 0], sizes = [1, 16], strides = [1, 1]} : vector<16x32xf32> to vector<1x16xf32>
    %c0_59 = arith.constant 0 : index
    %c0_60 = arith.constant 0 : index
    %87 = vector.load %arg14[%c0_59, %c0_60] : memref<2x256xf32, #tpu.memory_space<vmem>>, vector<1x16xf32>
    tpu.vector_store %arg14[%c0_59, %c0_60], %86 {strides = array<i32>} : memref<2x256xf32, #tpu.memory_space<vmem>>, vector<1x16xf32>,
    %88 = vector.extract_strided_slice %85 {offsets = [1, 0], sizes = [1, 16], strides = [1, 1]} : vector<16x32xf32> to vector<1x16xf32>
    %c0_61 = arith.constant 0 : index
    %c16_62 = arith.constant 16 : index
    %89 = vector.load %arg14[%c0_61, %c16_62] : memref<2x256xf32, #tpu.memory_space<vmem>>, vector<1x16xf32>
    tpu.vector_store %arg14[%c0_61, %c16_62], %88 {strides = array<i32>} : memref<2x256xf32, #tpu.memory_space<vmem>>, vector<1x16xf32>,
    %90 = vector.extract_strided_slice %85 {offsets = [2, 0], sizes = [1, 16], strides = [1, 1]} : vector<16x32xf32> to vector<1x16xf32>
    %c0_63 = arith.constant 0 : index
    %c32_64 = arith.constant 32 : index
    %91 = vector.load %arg14[%c0_63, %c32_64] : memref<2x256xf32, #tpu.memory_space<vmem>>, vector<1x16xf32>
    tpu.vector_store %arg14[%c0_63, %c32_64], %90 {strides = array<i32>} : memref<2x256xf32, #tpu.memory_space<vmem>>, vector<1x16xf32>,
    %92 = vector.extract_strided_slice %85 {offsets = [3, 0], sizes = [1, 16], strides = [1, 1]} : vector<16x32xf32> to vector<1x16xf32>
    %c0_65 = arith.constant 0 : index
    %c48_66 = arith.constant 48 : index
    %93 = vector.load %arg14[%c0_65, %c48_66] : memref<2x256xf32, #tpu.memory_space<vmem>>, vector<1x16xf32>
    tpu.vector_store %arg14[%c0_65, %c48_66], %92 {strides = array<i32>} : memref<2x256xf32, #tpu.memory_space<vmem>>, vector<1x16xf32>,
    %94 = vector.extract_strided_slice %85 {offsets = [4, 0], sizes = [1, 16], strides = [1, 1]} : vector<16x32xf32> to vector<1x16xf32>
    %c0_67 = arith.constant 0 : index
    %c64_68 = arith.constant 64 : index
    %95 = vector.load %arg14[%c0_67, %c64_68] : memref<2x256xf32, #tpu.memory_space<vmem>>, vector<1x16xf32>
    tpu.vector_store %arg14[%c0_67, %c64_68], %94 {strides = array<i32>} : memref<2x256xf32, #tpu.memory_space<vmem>>, vector<1x16xf32>,
    %96 = vector.extract_strided_slice %85 {offsets = [5, 0], sizes = [1, 16], strides = [1, 1]} : vector<16x32xf32> to vector<1x16xf32>
    %c0_69 = arith.constant 0 : index
    %c80 = arith.constant 80 : index
    %97 = vector.load %arg14[%c0_69, %c80] : memref<2x256xf32, #tpu.memory_space<vmem>>, vector<1x16xf32>
    tpu.vector_store %arg14[%c0_69, %c80], %96 {strides = array<i32>} : memref<2x256xf32, #tpu.memory_space<vmem>>, vector<1x16xf32>,
    %98 = vector.extract_strided_slice %85 {offsets = [6, 0], sizes = [1, 16], strides = [1, 1]} : vector<16x32xf32> to vector<1x16xf32>
    %c0_70 = arith.constant 0 : index
    %c96 = arith.constant 96 : index
    %99 = vector.load %arg14[%c0_70, %c96] : memref<2x256xf32, #tpu.memory_space<vmem>>, vector<1x16xf32>
    tpu.vector_store %arg14[%c0_70, %c96], %98 {strides = array<i32>} : memref<2x256xf32, #tpu.memory_space<vmem>>, vector<1x16xf32>,
    %100 = vector.extract_strided_slice %85 {offsets = [7, 0], sizes = [1, 16], strides = [1, 1]} : vector<16x32xf32> to vector<1x16xf32>
    %c0_71 = arith.constant 0 : index
    %c112 = arith.constant 112 : index
    %101 = vector.load %arg14[%c0_71, %c112] : memref<2x256xf32, #tpu.memory_space<vmem>>, vector<1x16xf32>
    tpu.vector_store %arg14[%c0_71, %c112], %100 {strides = array<i32>} : memref<2x256xf32, #tpu.memory_space<vmem>>, vector<1x16xf32>,
    %102 = vector.extract_strided_slice %85 {offsets = [8, 0], sizes = [1, 16], strides = [1, 1]} : vector<16x32xf32> to vector<1x16xf32>
    %c0_72 = arith.constant 0 : index
    %c128 = arith.constant 128 : index
    %103 = vector.load %arg14[%c0_72, %c128] : memref<2x256xf32, #tpu.memory_space<vmem>>, vector<1x16xf32>
    tpu.vector_store %arg14[%c0_72, %c128], %102 {strides = array<i32>} : memref<2x256xf32, #tpu.memory_space<vmem>>, vector<1x16xf32>,
    %104 = vector.extract_strided_slice %85 {offsets = [9, 0], sizes = [1, 16], strides = [1, 1]} : vector<16x32xf32> to vector<1x16xf32>
    %c0_73 = arith.constant 0 : index
    %c144 = arith.constant 144 : index
    %105 = vector.load %arg14[%c0_73, %c144] : memref<2x256xf32, #tpu.memory_space<vmem>>, vector<1x16xf32>
    tpu.vector_store %arg14[%c0_73, %c144], %104 {strides = array<i32>} : memref<2x256xf32, #tpu.memory_space<vmem>>, vector<1x16xf32>,
    %106 = vector.extract_strided_slice %85 {offsets = [10, 0], sizes = [1, 16], strides = [1, 1]} : vector<16x32xf32> to vector<1x16xf32>
    %c0_74 = arith.constant 0 : index
    %c160 = arith.constant 160 : index
    %107 = vector.load %arg14[%c0_74, %c160] : memref<2x256xf32, #tpu.memory_space<vmem>>, vector<1x16xf32>
    tpu.vector_store %arg14[%c0_74, %c160], %106 {strides = array<i32>} : memref<2x256xf32, #tpu.memory_space<vmem>>, vector<1x16xf32>,
    %108 = vector.extract_strided_slice %85 {offsets = [11, 0], sizes = [1, 16], strides = [1, 1]} : vector<16x32xf32> to vector<1x16xf32>
    %c0_75 = arith.constant 0 : index
    %c176 = arith.constant 176 : index
    %109 = vector.load %arg14[%c0_75, %c176] : memref<2x256xf32, #tpu.memory_space<vmem>>, vector<1x16xf32>
    tpu.vector_store %arg14[%c0_75, %c176], %108 {strides = array<i32>} : memref<2x256xf32, #tpu.memory_space<vmem>>, vector<1x16xf32>,
    %110 = vector.extract_strided_slice %85 {offsets = [12, 0], sizes = [1, 16], strides = [1, 1]} : vector<16x32xf32> to vector<1x16xf32>
    %c0_76 = arith.constant 0 : index
    %c192 = arith.constant 192 : index
    %111 = vector.load %arg14[%c0_76, %c192] : memref<2x256xf32, #tpu.memory_space<vmem>>, vector<1x16xf32>
    tpu.vector_store %arg14[%c0_76, %c192], %110 {strides = array<i32>} : memref<2x256xf32, #tpu.memory_space<vmem>>, vector<1x16xf32>,
    %112 = vector.extract_strided_slice %85 {offsets = [13, 0], sizes = [1, 16], strides = [1, 1]} : vector<16x32xf32> to vector<1x16xf32>
    %c0_77 = arith.constant 0 : index
    %c208 = arith.constant 208 : index
    %113 = vector.load %arg14[%c0_77, %c208] : memref<2x256xf32, #tpu.memory_space<vmem>>, vector<1x16xf32>
    tpu.vector_store %arg14[%c0_77, %c208], %112 {strides = array<i32>} : memref<2x256xf32, #tpu.memory_space<vmem>>, vector<1x16xf32>,
    %114 = vector.extract_strided_slice %85 {offsets = [14, 0], sizes = [1, 16], strides = [1, 1]} : vector<16x32xf32> to vector<1x16xf32>
    %c0_78 = arith.constant 0 : index
    %c224 = arith.constant 224 : index
    %115 = vector.load %arg14[%c0_78, %c224] : memref<2x256xf32, #tpu.memory_space<vmem>>, vector<1x16xf32>
    tpu.vector_store %arg14[%c0_78, %c224], %114 {strides = array<i32>} : memref<2x256xf32, #tpu.memory_space<vmem>>, vector<1x16xf32>,
    %116 = vector.extract_strided_slice %85 {offsets = [15, 0], sizes = [1, 16], strides = [1, 1]} : vector<16x32xf32> to vector<1x16xf32>
    %c0_79 = arith.constant 0 : index
    %c240 = arith.constant 240 : index
    %117 = vector.load %arg14[%c0_79, %c240] : memref<2x256xf32, #tpu.memory_space<vmem>>, vector<1x16xf32>
    tpu.vector_store %arg14[%c0_79, %c240], %116 {strides = array<i32>} : memref<2x256xf32, #tpu.memory_space<vmem>>, vector<1x16xf32>,
    %118 = vector.extract_strided_slice %85 {offsets = [0, 16], sizes = [1, 16], strides = [1, 1]} : vector<16x32xf32> to vector<1x16xf32>
    %c1_80 = arith.constant 1 : index
    %c0_81 = arith.constant 0 : index
    %119 = vector.load %arg14[%c1_80, %c0_81] : memref<2x256xf32, #tpu.memory_space<vmem>>, vector<1x16xf32>
    tpu.vector_store %arg14[%c1_80, %c0_81], %118 {strides = array<i32>} : memref<2x256xf32, #tpu.memory_space<vmem>>, vector<1x16xf32>,
    %120 = vector.extract_strided_slice %85 {offsets = [1, 16], sizes = [1, 16], strides = [1, 1]} : vector<16x32xf32> to vector<1x16xf32>
    %c1_82 = arith.constant 1 : index
    %c16_83 = arith.constant 16 : index
    %121 = vector.load %arg14[%c1_82, %c16_83] : memref<2x256xf32, #tpu.memory_space<vmem>>, vector<1x16xf32>
    tpu.vector_store %arg14[%c1_82, %c16_83], %120 {strides = array<i32>} : memref<2x256xf32, #tpu.memory_space<vmem>>, vector<1x16xf32>,
    %122 = vector.extract_strided_slice %85 {offsets = [2, 16], sizes = [1, 16], strides = [1, 1]} : vector<16x32xf32> to vector<1x16xf32>
    %c1_84 = arith.constant 1 : index
    %c32_85 = arith.constant 32 : index
    %123 = vector.load %arg14[%c1_84, %c32_85] : memref<2x256xf32, #tpu.memory_space<vmem>>, vector<1x16xf32>
    tpu.vector_store %arg14[%c1_84, %c32_85], %122 {strides = array<i32>} : memref<2x256xf32, #tpu.memory_space<vmem>>, vector<1x16xf32>,
    %124 = vector.extract_strided_slice %85 {offsets = [3, 16], sizes = [1, 16], strides = [1, 1]} : vector<16x32xf32> to vector<1x16xf32>
    %c1_86 = arith.constant 1 : index
    %c48_87 = arith.constant 48 : index
    %125 = vector.load %arg14[%c1_86, %c48_87] : memref<2x256xf32, #tpu.memory_space<vmem>>, vector<1x16xf32>
    tpu.vector_store %arg14[%c1_86, %c48_87], %124 {strides = array<i32>} : memref<2x256xf32, #tpu.memory_space<vmem>>, vector<1x16xf32>,
    %126 = vector.extract_strided_slice %85 {offsets = [4, 16], sizes = [1, 16], strides = [1, 1]} : vector<16x32xf32> to vector<1x16xf32>
    %c1_88 = arith.constant 1 : index
    %c64_89 = arith.constant 64 : index
    %127 = vector.load %arg14[%c1_88, %c64_89] : memref<2x256xf32, #tpu.memory_space<vmem>>, vector<1x16xf32>
    tpu.vector_store %arg14[%c1_88, %c64_89], %126 {strides = array<i32>} : memref<2x256xf32, #tpu.memory_space<vmem>>, vector<1x16xf32>,
    %128 = vector.extract_strided_slice %85 {offsets = [5, 16], sizes = [1, 16], strides = [1, 1]} : vector<16x32xf32> to vector<1x16xf32>
    %c1_90 = arith.constant 1 : index
    %c80_91 = arith.constant 80 : index
    %129 = vector.load %arg14[%c1_90, %c80_91] : memref<2x256xf32, #tpu.memory_space<vmem>>, vector<1x16xf32>
    tpu.vector_store %arg14[%c1_90, %c80_91], %128 {strides = array<i32>} : memref<2x256xf32, #tpu.memory_space<vmem>>, vector<1x16xf32>,
    %130 = vector.extract_strided_slice %85 {offsets = [6, 16], sizes = [1, 16], strides = [1, 1]} : vector<16x32xf32> to vector<1x16xf32>
    %c1_92 = arith.constant 1 : index
    %c96_93 = arith.constant 96 : index
    %131 = vector.load %arg14[%c1_92, %c96_93] : memref<2x256xf32, #tpu.memory_space<vmem>>, vector<1x16xf32>
    tpu.vector_store %arg14[%c1_92, %c96_93], %130 {strides = array<i32>} : memref<2x256xf32, #tpu.memory_space<vmem>>, vector<1x16xf32>,
    %132 = vector.extract_strided_slice %85 {offsets = [7, 16], sizes = [1, 16], strides = [1, 1]} : vector<16x32xf32> to vector<1x16xf32>
    %c1_94 = arith.constant 1 : index
    %c112_95 = arith.constant 112 : index
    %133 = vector.load %arg14[%c1_94, %c112_95] : memref<2x256xf32, #tpu.memory_space<vmem>>, vector<1x16xf32>
    tpu.vector_store %arg14[%c1_94, %c112_95], %132 {strides = array<i32>} : memref<2x256xf32, #tpu.memory_space<vmem>>, vector<1x16xf32>,
    %134 = vector.extract_strided_slice %85 {offsets = [8, 16], sizes = [1, 16], strides = [1, 1]} : vector<16x32xf32> to vector<1x16xf32>
    %c1_96 = arith.constant 1 : index
    %c128_97 = arith.constant 128 : index
    %135 = vector.load %arg14[%c1_96, %c128_97] : memref<2x256xf32, #tpu.memory_space<vmem>>, vector<1x16xf32>
    tpu.vector_store %arg14[%c1_96, %c128_97], %134 {strides = array<i32>} : memref<2x256xf32, #tpu.memory_space<vmem>>, vector<1x16xf32>,
    %136 = vector.extract_strided_slice %85 {offsets = [9, 16], sizes = [1, 16], strides = [1, 1]} : vector<16x32xf32> to vector<1x16xf32>
    %c1_98 = arith.constant 1 : index
    %c144_99 = arith.constant 144 : index
    %137 = vector.load %arg14[%c1_98, %c144_99] : memref<2x256xf32, #tpu.memory_space<vmem>>, vector<1x16xf32>
    tpu.vector_store %arg14[%c1_98, %c144_99], %136 {strides = array<i32>} : memref<2x256xf32, #tpu.memory_space<vmem>>, vector<1x16xf32>,
    %138 = vector.extract_strided_slice %85 {offsets = [10, 16], sizes = [1, 16], strides = [1, 1]} : vector<16x32xf32> to vector<1x16xf32>
    %c1_100 = arith.constant 1 : index
    %c160_101 = arith.constant 160 : index
    %139 = vector.load %arg14[%c1_100, %c160_101] : memref<2x256xf32, #tpu.memory_space<vmem>>, vector<1x16xf32>
    tpu.vector_store %arg14[%c1_100, %c160_101], %138 {strides = array<i32>} : memref<2x256xf32, #tpu.memory_space<vmem>>, vector<1x16xf32>,
    %140 = vector.extract_strided_slice %85 {offsets = [11, 16], sizes = [1, 16], strides = [1, 1]} : vector<16x32xf32> to vector<1x16xf32>
    %c1_102 = arith.constant 1 : index
    %c176_103 = arith.constant 176 : index
    %141 = vector.load %arg14[%c1_102, %c176_103] : memref<2x256xf32, #tpu.memory_space<vmem>>, vector<1x16xf32>
    tpu.vector_store %arg14[%c1_102, %c176_103], %140 {strides = array<i32>} : memref<2x256xf32, #tpu.memory_space<vmem>>, vector<1x16xf32>,
    %142 = vector.extract_strided_slice %85 {offsets = [12, 16], sizes = [1, 16], strides = [1, 1]} : vector<16x32xf32> to vector<1x16xf32>
    %c1_104 = arith.constant 1 : index
    %c192_105 = arith.constant 192 : index
    %143 = vector.load %arg14[%c1_104, %c192_105] : memref<2x256xf32, #tpu.memory_space<vmem>>, vector<1x16xf32>
    tpu.vector_store %arg14[%c1_104, %c192_105], %142 {strides = array<i32>} : memref<2x256xf32, #tpu.memory_space<vmem>>, vector<1x16xf32>,
    %144 = vector.extract_strided_slice %85 {offsets = [13, 16], sizes = [1, 16], strides = [1, 1]} : vector<16x32xf32> to vector<1x16xf32>
    %c1_106 = arith.constant 1 : index
    %c208_107 = arith.constant 208 : index
    %145 = vector.load %arg14[%c1_106, %c208_107] : memref<2x256xf32, #tpu.memory_space<vmem>>, vector<1x16xf32>
    tpu.vector_store %arg14[%c1_106, %c208_107], %144 {strides = array<i32>} : memref<2x256xf32, #tpu.memory_space<vmem>>, vector<1x16xf32>,
    %146 = vector.extract_strided_slice %85 {offsets = [14, 16], sizes = [1, 16], strides = [1, 1]} : vector<16x32xf32> to vector<1x16xf32>
    %c1_108 = arith.constant 1 : index
    %c224_109 = arith.constant 224 : index
    %147 = vector.load %arg14[%c1_108, %c224_109] : memref<2x256xf32, #tpu.memory_space<vmem>>, vector<1x16xf32>
    tpu.vector_store %arg14[%c1_108, %c224_109], %146 {strides = array<i32>} : memref<2x256xf32, #tpu.memory_space<vmem>>, vector<1x16xf32>,
    %148 = vector.extract_strided_slice %85 {offsets = [15, 16], sizes = [1, 16], strides = [1, 1]} : vector<16x32xf32> to vector<1x16xf32>
    %c1_110 = arith.constant 1 : index
    %c240_111 = arith.constant 240 : index
    %149 = vector.load %arg14[%c1_110, %c240_111] : memref<2x256xf32, #tpu.memory_space<vmem>>, vector<1x16xf32>
    tpu.vector_store %arg14[%c1_110, %c240_111], %148 {strides = array<i32>} : memref<2x256xf32, #tpu.memory_space<vmem>>, vector<1x16xf32>,
    %c0_112 = arith.constant 0 : index
    %c0_113 = arith.constant 0 : index
    %150 = vector.load %arg14[%c0_112, %c0_113] : memref<2x256xf32, #tpu.memory_space<vmem>>, vector<2x256xf32>
    %c0_114 = arith.constant 0 : index
    %c0_115 = arith.constant 0 : index
    %151 = vector.load %arg7[%c0_114, %c0_115] : memref<256x256xf32, #tpu.memory_space<vmem>>, vector<256x256xf32>
    %cst_116 = arith.constant dense<0.000000e+00> : vector<2x256xf32>
    %152 = tpu.matmul %150, %151, %cst_116 {dimension_numbers = #tpu.dot_dimension_numbers<[1], [0], [0], [1], [0, 0, 1, 1], [], []>} : vector<2x256xf32>, vector<256x256xf32>, vector<2x256xf32> -> vector<2x256xf32>
    %c0_117 = arith.constant 0 : index
    %c0_118 = arith.constant 0 : index
    %153 = vector.load %arg8[%c0_117, %c0_118] : memref<1x256xf32, #tpu.memory_space<vmem>>, vector<1x256xf32>
    %154 = vector.broadcast %153 : vector<1x256xf32> to vector<2x256xf32>
    %155 = arith.addf %152, %154 : vector<2x256xf32>
    %cst_119 = arith.constant 2.000000e+01 : f32
    %156 = vector.broadcast %cst_119 : f32 to vector<2x256xf32>
    %157 = arith.cmpf ogt, %155, %156 : vector<2x256xf32>
    %cst_120 = arith.constant 2.000000e+01 : f32
    %158 = vector.broadcast %cst_120 : f32 to vector<2x256xf32>
    %159 = arith.minimumf %155, %158 : vector<2x256xf32>
    %160 = math.exp %159 : vector<2x256xf32>
    %cst_121 = arith.constant 1.000000e+00 : f32
    %161 = vector.broadcast %cst_121 : f32 to vector<2x256xf32>
    %162 = arith.addf %161, %160 : vector<2x256xf32>
    %163 = math.log %162 : vector<2x256xf32>
    %164 = arith.select %157, %155, %163 : vector<2x256xi1>, vector<2x256xf32>
    %165 = math.tanh %164 : vector<2x256xf32>
    %166 = arith.mulf %155, %165 : vector<2x256xf32>
    %c0_122 = arith.constant 0 : index
    %c0_123 = arith.constant 0 : index
    %167 = vector.load %arg9[%c0_122, %c0_123] : memref<256x10xf32, #tpu.memory_space<vmem>>, vector<256x10xf32>
    %cst_124 = arith.constant dense<0.000000e+00> : vector<2x10xf32>
    %168 = tpu.matmul %166, %167, %cst_124 {dimension_numbers = #tpu.dot_dimension_numbers<[1], [0], [0], [1], [0, 0, 1, 1], [], []>} : vector<2x256xf32>, vector<256x10xf32>, vector<2x10xf32> -> vector<2x10xf32>
    %c0_125 = arith.constant 0 : index
    %c0_126 = arith.constant 0 : index
    %169 = vector.load %arg10[%c0_125, %c0_126] : memref<1x10xf32, #tpu.memory_space<vmem>>, vector<1x10xf32>
    %170 = vector.broadcast %169 : vector<1x10xf32> to vector<2x10xf32>
    %171 = arith.addf %168, %170 : vector<2x10xf32>
    %c0_127 = arith.constant 0 : index
    %c0_128 = arith.constant 0 : index
    %172 = vector.load %arg11[%c0_127, %c0_128] : memref<2x10xf32, #tpu.memory_space<vmem>>, vector<2x10xf32>
    tpu.vector_store %arg11[%c0_127, %c0_128], %171 {strides = array<i32>} : memref<2x10xf32, #tpu.memory_space<vmem>>, vector<2x10xf32>,
    return
  }
}

</mosaic_0001>

<bundles_post_ra>
// kernel: forward.1
= control target key start
LH: loop header
LB: loop body
LE: loop exit
PB: predicated region body
PF: predicated region fallthrough
CT: control target
= control target key end

     0   :  { %16 = vsyncpa [#allocation6], 0  ;;  %s3658_s0 = inlined_call_operand.vmem [shape: f32[4,768], index: 0, kind: input, shape index: {}]   ;;  %s3659_s1 = inlined_call_operand.vmem [shape: f32[8,36], index: 1, kind: input, shape index: {}]   ;;  %s3660_s2 = inlined_call_operand.vmem [shape: f32[8,1], index: 2, kind: input, shape index: {}]   ;;  %s3661_s3 = inlined_call_operand.hbm [shape: f32[621,384], index: 3, kind: input, shape index: {}]   ;;  %s3662_s4 = inlined_call_operand.vmem [shape: f32[16,72], index: 4, kind: input, shape index: {}]   ;;  %s3663_s5 = inlined_call_operand.vmem [shape: f32[16,1], index: 5, kind: input, shape index: {}]   ;;  %s3664_s6 = inlined_call_operand.vmem [shape: f32[245,32], index: 6, kind: input, shape index: {}]   ;;  %s3665_s7 = inlined_call_operand.vmem [shape: f32[256,256], index: 7, kind: input, shape index: {}]   ;;  %s3666_s8 = inlined_call_operand.vmem [shape: f32[1,256], index: 8, kind: input, shape index: {}]   ;;  %s3667_s9 = inlined_call_operand.vmem [shape: f32[256,10], index: 9, kind: input, shape index: {}]   ;;  %s3668_s10 = inlined_call_operand.vmem [shape: f32[1,10], index: 10, kind: input, shape index: {}]   ;;  %s3669_s11 = inlined_call_operand.hbm [shape: f32[2,10], index: 11, kind: output, shape index: {}]  }
   0x1   :  { %17 = vsyncpa [#allocation7], 0  ;;  %s2660_s17 = smov [#allocation5]  }
   0x2   :  { %s29_s18 = sshll.u32 %s2660_s17, 4  ;;  %s30_s18 = int_to_ptr.vmem [resolvable:$true] %s29_s18 }
   0x3   :  { %s2624_s19 = scalar_lea.vmem %s30_s18, 29952  ;;  %p2629_p1 = scmp.lt.s32.totalorder %s30_s18, %s30_s18 }
   0x4   :  { %p2625_p0 = scmp.ne.s32.totalorder %s30_s18, %s2624_s19  ;;  %p2630_p2 = scmp.lt.s32.totalorder %s2624_s19, %s2624_s19 }
   0x6   :  { %p2631_p3 = por %p2630_p2, %p2629_p1 }
   0x8   :  { %p2632_p4 = pnand %p2631_p3, %p2625_p0 }
   0xa   :  { %2635 = shalt.err (!%p2632_p4)
}
   0xb   :  { %s2661_s20 = smov 384   ;;  %s2662_s21 = smov 24  }
   0xc   :  { %35 = dma.hbm_to_vmem [thread:$0]  %s3661_s3, 29952, %s30_s18, [#allocation6], %s2661_s20, %s2661_s20, %s2662_s21  }
   0xd   :  { %2656 = dma.done.wait [#allocation6], 29952  }
   0xe   :  { %2657 = vsyncadd [#allocation6], 4294937344  ;;  %v327_v0 = vld [vmem:[%s3658_s0 + $0x8] sm:$0xff]  ;;  %v326_v1 = vld [vmem:[%s3658_s0] sm:$0xff]  ;;  %s2663_s28 = smov 90   ;;  %s2664_s3 = smov 91  }
   0xf   :  { %339 = vrot.lane.b32.xlu0 %v327_v0, %s2663_s28  ;;  %v333_v2 = vcombine.high %v327_v0, %v327_v0  ;;  %335 = vrot.lane.b32.xlu1 %v326_v1, %s2663_s28  ;;  %v332_v3 = vcombine.high %v326_v1, %v326_v1  ;;  %62 = vst [vmem:[#allocation2 + $0xb0] sm:$0xf] %v326_v1  ;;  %64 = vst [vmem:[#allocation2 + $0x10] sm:$0xf] %v327_v0  ;;  %s2665_s29 = smov 92   ;;  %s2666_s30 = smov 109  }
  0x10   :  { %v296_v4 = vcombine.low %v327_v0, %v327_v0  ;;  %v295_v5 = vcombine.low %v326_v1, %v326_v1  ;;  %s2667_s12 = smov 108   ;;  %s2668_s13 = smov 126   ;;  %v2671_v6 = vmov 0.0   ;;  %v328_v7 = vld [vmem:[%s3658_s0 + $0x10] sm:$0xff]  ;;  %vm2672_vm0 = vmmov 0   ;;  %v389_v12 = vld [vmem:[%s3660_s2] sm:$0xff] }
  0x11   :  { %63 = vst [vmem:[#allocation2] sm:$0xf] %v332_v3  ;;  %65 = vst [vmem:[#allocation2 + $0x48] sm:$0xf] %v333_v2  ;;  %s2669_s14 = smov 110   ;;  %s2670_s15 = smov 127   ;;  %479 = vmatprep.mubr.f32.mxu1 %v2671_v6  ;;  %2455 = vmatprep.subr.mxu0 %v2671_v6  ;;  %v297_v8 = vcombine.low %v328_v7, %v328_v7  ;;  %v334_v9 = vcombine.high %v328_v7, %v328_v7 }
  0x12   :  { %v55_v10 = vld [vmem:[%s3658_s0 + $0x10] sm:$0xf]  ;;  %2465 = vmatprep.mubr.msk.f32.mxu0 %vm2672_vm0, %v2671_v6  ;;  %v2673_v11 = vmov 0   ;;  %vm347_vm1 = vcmask 736256   ;;  %vm273_vm2 = vcmask 752640   ;;  %vm310_vm3 = vcmask 744448  }
  0x13   :  { %300 = vrot.lane.b32.xlu1 %v326_v1, %s2664_s3  ;;  %265 = vrot.lane.b32.xlu0 %v327_v0, %s2665_s29  ;;  %66 = vst [vmem:[#allocation2 + $0x60] sm:$0xf] %v55_v10  ;;  %vm399_vm4 = vcmask 1043456   ;;  %vm199_vm5 = vcmask 891904   ;;  %vm236_vm6 = vcmask 883712   ;;  %vm125_vm7 = vcmask 1031168  }
  0x14   :  { %2527 = vset.pattern.permute.xlu0 %v2673_v11  ;;  %2543 = vset.pattern.permute.xlu1 %v2673_v11  ;;  %vm162_vm8 = vcmask 900096   ;;  %vm88_vm9 = vcmask 1039360   ;;  %vm395_vm10 = vcmask 293888   ;;  %s2675_s22 = smov 106   ;;  %s2676_s23 = smov 116  }
  0x15   :  { %s2677_s24 = smov 118   ;;  %s2678_s25 = smov 117  }
  0x16   :  { %s2680_s20 = smov 112   ;;  %s2683_s21 = smov 64  }
  0x17   :  { %337 = vrot.lane.b32.xlu0 %v332_v3, %s2663_s28  ;;  %263 = vrot.lane.b32.xlu1 %v332_v3, %s2665_s29  ;;  %s2687_s27 = smov [#allocation8]  }
  0x1b   :  { %302 = vrot.lane.b32.xlu0 %v296_v4, %s2664_s3  ;;  %261 = vrot.lane.b32.xlu1 %v326_v1, %s2665_s29 }
  0x1f   :  { %298 = vrot.lane.b32.xlu0 %v295_v5, %s2664_s3  ;;  %189 = vrot.lane.b32.xlu1 %v332_v3, %s2666_s30 }
  0x23   :  { %191 = vrot.lane.b32.xlu0 %v327_v0, %s2666_s30  ;;  %226 = vrot.lane.b32.xlu1 %v326_v1, %s2667_s12 }
  0x27   :  { %228 = vrot.lane.b32.xlu0 %v296_v4, %s2667_s12  ;;  %187 = vrot.lane.b32.xlu1 %v326_v1, %s2666_s30 }
  0x2b   :  { %224 = vrot.lane.b32.xlu0 %v295_v5, %s2667_s12  ;;  %115 = vrot.lane.b32.xlu1 %v332_v3, %s2668_s13 }
  0x2f   :  { %117 = vrot.lane.b32.xlu0 %v327_v0, %s2668_s13  ;;  %152 = vrot.lane.b32.xlu1 %v326_v1, %s2669_s14 }
  0x33   :  { %154 = vrot.lane.b32.xlu0 %v296_v4, %s2669_s14  ;;  %113 = vrot.lane.b32.xlu1 %v326_v1, %s2668_s13 }
  0x37   :  { %150 = vrot.lane.b32.xlu0 %v295_v5, %s2669_s14  ;;  %78 = vrot.lane.b32.xlu1 %v326_v1, %s2670_s15 }
  0x3b   :  { %80 = vrot.lane.b32.xlu0 %v296_v4, %s2670_s15  ;;  %76 = vrot.lane.b32.xlu1 %v295_v5, %s2670_s15 }
  0x3f   :  { %341 = vrot.lane.b32.xlu0 %v333_v2, %s2663_s28  ;;  %343 = vrot.lane.b32.xlu1 %v328_v7, %s2663_s28 }
  0x43   :  { %267 = vrot.lane.b32.xlu0 %v333_v2, %s2665_s29  ;;  %269 = vrot.lane.b32.xlu1 %v328_v7, %s2665_s29 }
  0x47   :  { %304 = vrot.lane.b32.xlu0 %v327_v0, %s2664_s3  ;;  %306 = vrot.lane.b32.xlu1 %v297_v8, %s2664_s3 }
  0x4b   :  { %193 = vrot.lane.b32.xlu0 %v333_v2, %s2666_s30  ;;  %195 = vrot.lane.b32.xlu1 %v328_v7, %s2666_s30 }
  0x4f   :  { %230 = vrot.lane.b32.xlu0 %v327_v0, %s2667_s12  ;;  %232 = vrot.lane.b32.xlu1 %v297_v8, %s2667_s12 }
  0x53   :  { %119 = vrot.lane.b32.xlu0 %v333_v2, %s2668_s13  ;;  %121 = vrot.lane.b32.xlu1 %v328_v7, %s2668_s13 }
  0x57   :  { %156 = vrot.lane.b32.xlu0 %v327_v0, %s2669_s14  ;;  %158 = vrot.lane.b32.xlu1 %v297_v8, %s2669_s14 }
  0x5b   :  { %82 = vrot.lane.b32.xlu0 %v327_v0, %s2670_s15  ;;  %84 = vrot.lane.b32.xlu1 %v297_v8, %s2670_s15  ;;  %v2875_v8 = vld [vmem:[%s3659_s1] sm:$0xff]  ;;  %s2674_s1 = smov 107  }
  0x5f   :  { %345 = vrot.lane.b32.xlu0 %v334_v9, %s2663_s28  ;;  %271 = vrot.lane.b32.xlu1 %v334_v9, %s2665_s29  ;;  %s2300_s28 = sshll.u32 %s2687_s27, 4  ;;  %s2301_s28 = int_to_ptr.vmem [resolvable:$true] %s2300_s28 }
  0x60   :  { %p2641_p6 = scmp.lt.s32.totalorder %s2301_s28, %s2301_s28 }
  0x63   :  { %308 = vrot.lane.b32.xlu0 %v328_v7, %s2664_s3  ;;  %197 = vrot.lane.b32.xlu1 %v334_v9, %s2666_s30  ;;  %s2681_s3 = smov 32   ;;  %s2684_s30 = smov 48  }
  0x67   :  { %234 = vrot.lane.b32.xlu0 %v328_v7, %s2667_s12  ;;  %123 = vrot.lane.b32.xlu1 %v334_v9, %s2668_s13 }
  0x6b   :  { %160 = vrot.lane.b32.xlu0 %v328_v7, %s2669_s14  ;;  %86 = vrot.lane.b32.xlu1 %v328_v7, %s2670_s15 }
  0x6f   :  { %392 = vperm.xlu0 %2527, %v389_v12  }
  0x81   :  { %v2818_v13 = vpop.permute.xlu0 %339  ;;  %v336_v14 = vpop.permute.xlu1 %335 }
  0x85   :  { %v301_v15 = vpop.permute.xlu1 %300  ;;  %v2820_v16 = vpop.permute.xlu0 %265 }
  0x89   :  { %v338_v17 = vpop.permute.xlu0 %337  ;;  %v264_v18 = vpop.permute.xlu1 %263 }
  0x8a   :  { %v348_v19 = vsel %vm347_vm1, %v336_v14, %v338_v17  ;;  %v349_v20 = vsel %vm347_vm1, %v338_v17, %v2818_v13  ;;  %v275_v21 = vsel %vm273_vm2, %v264_v18, %v2820_v16 }
  0x8b   :  { %358 = vst [vmem:[#allocation2 + $0x58] sm:$0xf] %v348_v19  ;;  %359 = vst [vmem:[#allocation2 + $0x50] sm:$0xf] %v349_v20 }
  0x8c   :  { %285 = vst [vmem:[#allocation2 + $0x20] sm:$0xf] %v275_v21 }
  0x8d   :  { %v2827_v22 = vpop.permute.xlu0 %302  ;;  %v262_v23 = vpop.permute.xlu1 %261 }
  0x8e   :  { %v312_v24 = vsel %vm310_vm3, %v301_v15, %v2827_v22  ;;  %v274_v25 = vsel %vm273_vm2, %v262_v23, %v264_v18 }
  0x8f   :  { %322 = vst [vmem:[#allocation2 + $0x20] sm:$0xf0] %v312_v24  ;;  %284 = vst [vmem:[#allocation2 + $0xa0] sm:$0xf] %v274_v25 }
  0x91   :  { %v299_v26 = vpop.permute.xlu0 %298  ;;  %v190_v27 = vpop.permute.xlu1 %189 }
  0x92   :  { %v311_v28 = vsel %vm310_vm3, %v299_v26, %v301_v15  ;;  %v385_v29 = vld [vmem:[#allocation2 + $0x50] sm:$0xf]  ;;  %v384_v30 = vld [vmem:[#allocation2 + $0x58] sm:$0xf] }
  0x93   :  { %321 = vst [vmem:[#allocation2 + $0xa0] sm:$0xf0] %v311_v28  ;;  %2309 = vmatprep.subr.msk.mxu1 %vm399_vm4, %v385_v29 }
  0x94   :  { %2310 = vmatpush1.msk.msra.mxu1 %vm399_vm4, %v384_v30 }
  0x95   :  { %v2835_v31 = vpop.permute.xlu0 %191  ;;  %v227_v32 = vpop.permute.xlu1 %226 }
  0x96   :  { %v201_v33 = vsel %vm199_vm5, %v190_v27, %v2835_v31  ;;  %v380_v34 = vld [vmem:[#allocation2 + $0x20] sm:$0xff] }
  0x97   :  { %211 = vst [vmem:[#allocation2 + $0x70] sm:$0xf] %v201_v33  ;;  %439 = vmatprep.subr.mxu1 %v380_v34 }
  0x99   :  { %v2839_v35 = vpop.permute.xlu0 %228  ;;  %v188_v36 = vpop.permute.xlu1 %187 }
  0x9a   :  { %v238_v37 = vsel %vm236_vm6, %v227_v32, %v2839_v35  ;;  %v200_v38 = vsel %vm199_vm5, %v188_v36, %v190_v27  ;;  %v379_v39 = vld [vmem:[#allocation2 + $0xa0] sm:$0xff] }
  0x9b   :  { %248 = vst [vmem:[#allocation2 + $0x70] sm:$0xf0] %v238_v37  ;;  %210 = vst [vmem:[#allocation2 + $0xb8] sm:$0xf] %v200_v38  ;;  %440 = vmatpush1.msra.mxu1 %v379_v39 }
  0x9d   :  { %v225_v40 = vpop.permute.xlu0 %224  ;;  %v116_v41 = vpop.permute.xlu1 %115 }
  0x9e   :  { %v237_v42 = vsel %vm236_vm6, %v225_v40, %v227_v32 }
  0x9f   :  { %247 = vst [vmem:[#allocation2 + $0xb8] sm:$0xf0] %v237_v42 }
  0xa1   :  { %v2845_v43 = vpop.permute.xlu0 %117  ;;  %v153_v44 = vpop.permute.xlu1 %152 }
  0xa2   :  { %v127_v45 = vsel %vm125_vm7, %v116_v41, %v2845_v43  ;;  %v375_v46 = vld [vmem:[#allocation2 + $0x70] sm:$0xff] }
  0xa3   :  { %137 = vst [vmem:[#allocation2 + $0x40] sm:$0xf] %v127_v45  ;;  %441 = vmatprep.subr.mxu1 %v375_v46 }
  0xa5   :  { %v2849_v47 = vpop.permute.xlu0 %154  ;;  %v114_v48 = vpop.permute.xlu1 %113 }
  0xa6   :  { %v164_v49 = vsel %vm162_vm8, %v153_v44, %v2849_v47  ;;  %v126_v50 = vsel %vm125_vm7, %v114_v48, %v116_v41  ;;  %v374_v51 = vld [vmem:[#allocation2 + $0xb8] sm:$0xff] }
  0xa7   :  { %174 = vst [vmem:[#allocation2 + $0x40] sm:$0xf0] %v164_v49  ;;  %136 = vst [vmem:[#allocation2 + $0x28] sm:$0xf] %v126_v50  ;;  %442 = vmatpush1.msra.mxu1 %v374_v51 }
  0xa9   :  { %v151_v52 = vpop.permute.xlu0 %150  ;;  %v79_v53 = vpop.permute.xlu1 %78 }
  0xaa   :  { %v163_v54 = vsel %vm162_vm8, %v151_v52, %v153_v44 }
  0xab   :  { %173 = vst [vmem:[#allocation2 + $0x28] sm:$0xf0] %v163_v54 }
  0xad   :  { %v2855_v55 = vpop.permute.xlu0 %80  ;;  %v77_v56 = vpop.permute.xlu1 %76 }
  0xae   :  { %v90_v57 = vsel %vm88_vm9, %v79_v53, %v2855_v55  ;;  %v89_v58 = vsel %vm88_vm9, %v77_v56, %v79_v53  ;;  %v370_v59 = vld [vmem:[#allocation2 + $0x40] sm:$0xff] }
  0xaf   :  { %100 = vst [vmem:[#allocation2] sm:$0xf0] %v90_v57  ;;  %99 = vst [vmem:[#allocation2 + $0xb0] sm:$0xf0] %v89_v58  ;;  %443 = vmatprep.subr.mxu1 %v370_v59 }
  0xb1   :  { %v342_v60 = vpop.permute.xlu0 %341  ;;  %v2860_v61 = vpop.permute.xlu1 %343 }
  0xb2   :  { %v350_v62 = vsel %vm347_vm1, %v2818_v13, %v342_v60  ;;  %v351_v63 = vsel %vm347_vm1, %v342_v60, %v2860_v61  ;;  %v369_v0 = vld [vmem:[#allocation2 + $0x28] sm:$0xff] }
  0xb3   :  { %360 = vst [vmem:[#allocation2 + $0x8] sm:$0xf] %v350_v62  ;;  %361 = vst [vmem:[#allocation2 + $0xa8] sm:$0xf] %v351_v63  ;;  %444 = vmatpush1.msra.mxu1 %v369_v0 }
  0xb5   :  { %v268_v1 = vpop.permute.xlu0 %267  ;;  %v2866_v2 = vpop.permute.xlu1 %269 }
  0xb6   :  { %v276_v3 = vsel %vm273_vm2, %v2820_v16, %v268_v1  ;;  %v277_v4 = vsel %vm273_vm2, %v268_v1, %v2866_v2  ;;  %v365_v5 = vld [vmem:[#allocation2] sm:$0xff]  ;;  %v364_v7 = vld [vmem:[#allocation2 + $0xb0] sm:$0xff] }
  0xb7   :  { %286 = vst [vmem:[#allocation2 + $0x30] sm:$0xf] %v276_v3  ;;  %287 = vst [vmem:[#allocation2 + $0x90] sm:$0xf] %v277_v4  ;;  %445 = vmatprep.subr.mxu1 %v365_v5 }
  0xb8   :  { %446 = vmatpush1.msra.mxu1 %v364_v7 }
  0xb9   :  { %v305_v9 = vpop.permute.xlu0 %304  ;;  %v307_v10 = vpop.permute.xlu1 %306  ;;  %2311 = vmatmul.mubr.msk.f32.vlgmr.msra.gmra.mxu1 %vm395_vm10, %v2875_v8 }
  0xba   :  { %v313_v11 = vsel %vm310_vm3, %v2827_v22, %v305_v9  ;;  %v314_v12 = vsel %vm310_vm3, %v305_v9, %v307_v10  ;;  %v387_v13 = vld [vmem:[#allocation2 + $0xa8] sm:$0xf]  ;;  %550 = vmatprep.mubr.f32.mxu1 %v2671_v6 }
  0xbb   :  { %v386_v14 = vld [vmem:[#allocation2 + $0x8] sm:$0xf]  ;;  %323 = vst [vmem:[#allocation2 + $0x30] sm:$0xf0] %v313_v11  ;;  %324 = vst [vmem:[#allocation2 + $0x90] sm:$0xf0] %v314_v12  ;;  %2312 = vmatprep.subr.msk.mxu1 %vm399_vm4, %v387_v13 }
  0xbc   :  { %2313 = vmatpush1.msk.msra.mxu1 %vm399_vm4, %v386_v14 }
  0xbd   :  { %v194_v15 = vpop.permute.xlu0 %193  ;;  %v196_v16 = vpop.permute.xlu1 %195 }
  0xbe   :  { %v202_v17 = vsel %vm199_vm5, %v2835_v31, %v194_v15  ;;  %v203_v18 = vsel %vm199_vm5, %v194_v15, %v196_v16 }
  0xbf   :  { %212 = vst [vmem:[#allocation2 + $0x18] sm:$0xf] %v202_v17  ;;  %213 = vst [vmem:[#allocation2 + $0x68] sm:$0xf] %v203_v18 }
  0xc1   :  { %v231_v19 = vpop.permute.xlu0 %230  ;;  %v233_v20 = vpop.permute.xlu1 %232 }
  0xc2   :  { %v239_v21 = vsel %vm236_vm6, %v2839_v35, %v231_v19  ;;  %v240_v22 = vsel %vm236_vm6, %v231_v19, %v233_v20  ;;  %v382_v23 = vld [vmem:[#allocation2 + $0x90] sm:$0xff] }
  0xc3   :  { %v381_v24 = vld [vmem:[#allocation2 + $0x30] sm:$0xff]  ;;  %249 = vst [vmem:[#allocation2 + $0x18] sm:$0xf0] %v239_v21  ;;  %250 = vst [vmem:[#allocation2 + $0x68] sm:$0xf0] %v240_v22  ;;  %510 = vmatprep.subr.mxu1 %v382_v23 }
  0xc4   :  { %511 = vmatpush1.msra.mxu1 %v381_v24 }
  0xc5   :  { %v120_v25 = vpop.permute.xlu0 %119  ;;  %v122_v26 = vpop.permute.xlu1 %121 }
  0xc6   :  { %v128_v27 = vsel %vm125_vm7, %v2845_v43, %v120_v25  ;;  %v129_v28 = vsel %vm125_vm7, %v120_v25, %v122_v26 }
  0xc7   :  { %138 = vst [vmem:[#allocation2 + $0x78] sm:$0xf] %v128_v27  ;;  %139 = vst [vmem:[#allocation2 + $0x80] sm:$0xf] %v129_v28 }
  0xc9   :  { %v157_v29 = vpop.permute.xlu0 %156  ;;  %v159_v30 = vpop.permute.xlu1 %158 }
  0xca   :  { %v165_v31 = vsel %vm162_vm8, %v2849_v47, %v157_v29  ;;  %v166_v32 = vsel %vm162_vm8, %v157_v29, %v159_v30  ;;  %v377_v33 = vld [vmem:[#allocation2 + $0x68] sm:$0xff]  ;;  %v376_v34 = vld [vmem:[#allocation2 + $0x18] sm:$0xff] }
  0xcb   :  { %175 = vst [vmem:[#allocation2 + $0x78] sm:$0xf0] %v165_v31  ;;  %176 = vst [vmem:[#allocation2 + $0x80] sm:$0xf0] %v166_v32  ;;  %512 = vmatprep.subr.mxu1 %v377_v33 }
  0xcc   :  { %513 = vmatpush1.msra.mxu1 %v376_v34 }
  0xcd   :  { %v83_v35 = vpop.permute.xlu0 %82  ;;  %v85_v36 = vpop.permute.xlu1 %84 }
  0xce   :  { %v91_v37 = vsel %vm88_vm9, %v2855_v55, %v83_v35  ;;  %v92_v38 = vsel %vm88_vm9, %v83_v35, %v85_v36 }
  0xcf   :  { %101 = vst [vmem:[#allocation2 + $0x10] sm:$0xf0] %v91_v37  ;;  %102 = vst [vmem:[#allocation2 + $0x48] sm:$0xf0] %v92_v38 }
  0xd1   :  { %v346_v39 = vpop.permute.xlu0 %345  ;;  %v272_v40 = vpop.permute.xlu1 %271 }
  0xd2   :  { %v352_v41 = vsel %vm347_vm1, %v2860_v61, %v346_v39  ;;  %v278_v42 = vsel %vm273_vm2, %v2866_v2, %v272_v40  ;;  %v372_v43 = vld [vmem:[#allocation2 + $0x80] sm:$0xff]  ;;  %v371_v44 = vld [vmem:[#allocation2 + $0x78] sm:$0xff]  ;;  %vm972_vm1 = vcmask 1044480   ;;  %vm1491_vm2 = vcmask 875520  }
  0xd3   :  { %362 = vst [vmem:[#allocation2 + $0xc0] sm:$0xf] %v352_v41  ;;  %288 = vst [vmem:[#allocation2 + $0x38] sm:$0xf] %v278_v42  ;;  %514 = vmatprep.subr.mxu1 %v372_v43 }
  0xd4   :  { %515 = vmatpush1.msra.mxu1 %v371_v44 }
  0xd5   :  { %v309_v45 = vpop.permute.xlu0 %308  ;;  %v198_v46 = vpop.permute.xlu1 %197 }
  0xd6   :  { %v315_v47 = vsel %vm310_vm3, %v307_v10, %v309_v45  ;;  %v204_v48 = vsel %vm199_vm5, %v196_v16, %v198_v46  ;;  %v367_v49 = vld [vmem:[#allocation2 + $0x48] sm:$0xff]  ;;  %v366_v50 = vld [vmem:[#allocation2 + $0x10] sm:$0xff]  ;;  %vm1466_vm3 = vcmask 949248  }
  0xd7   :  { %325 = vst [vmem:[#allocation2 + $0x38] sm:$0xf0] %v315_v47  ;;  %214 = vst [vmem:[#allocation2 + $0x98] sm:$0xf] %v204_v48  ;;  %516 = vmatprep.subr.mxu1 %v367_v49 }
  0xd8   :  { %517 = vmatpush1.msra.mxu1 %v366_v50 }
  0xd9   :  { %v235_v51 = vpop.permute.xlu0 %234  ;;  %v124_v52 = vpop.permute.xlu1 %123  ;;  %2314 = vmatmul.mubr.msk.f32.vlgmr.msra.gmra.mxu1 %vm395_vm10, %v2875_v8 }
  0xda   :  { %v241_v53 = vsel %vm236_vm6, %v233_v20, %v235_v51  ;;  %v130_v54 = vsel %vm125_vm7, %v122_v26, %v124_v52  ;;  %v388_v55 = vld [vmem:[#allocation2 + $0xc0] sm:$0xf] }
  0xdb   :  { %251 = vst [vmem:[#allocation2 + $0x98] sm:$0xf0] %v241_v53  ;;  %140 = vst [vmem:[#allocation2 + $0x88] sm:$0xf] %v130_v54  ;;  %2456 = vmatpush3.msk.msra.mxu0 %vm399_vm4, %v388_v55  ;;  %vm1453_vm4 = vcmask 957440  }
  0xdc   :  { %2457 = vmatprep.subr.mxu0 %v2671_v6 }
  0xdd   :  { %v161_v56 = vpop.permute.xlu0 %160  ;;  %v87_v57 = vpop.permute.xlu1 %86 }
  0xde   :  { %v167_v58 = vsel %vm162_vm8, %v159_v30, %v161_v56  ;;  %v93_v59 = vsel %vm88_vm9, %v85_v36, %v87_v57  ;;  %v383_v60 = vld [vmem:[#allocation2 + $0x38] sm:$0xff] }
  0xdf   :  { %177 = vst [vmem:[#allocation2 + $0x88] sm:$0xf0] %v167_v58  ;;  %103 = vst [vmem:[#allocation2 + $0x60] sm:$0xf0] %v93_v59  ;;  %2458 = vmatpush3.msra.mxu0 %v383_v60  ;;  %v781_v58 = vld [vmem:[#allocation5 + $0x170] sm:$0xff]  ;;  %v780_v59 = vld [vmem:[#allocation5 + $0x168] sm:$0xff] }
  0xe0   :  { %2459 = vmatprep.subr.mxu0 %v2671_v6  ;;  %v778_v60 = vld [vmem:[#allocation5 + $0x158] sm:$0xff]  ;;  %982 = vmatprep.subr.mxu1 %v781_v58  ;;  %v736_v58 = vld [vmem:[#allocation5 + $0x8] sm:$0xff] }
  0xe1   :  { %983 = vmatpush1.msra.mxu1 %v780_v59  ;;  %v837_v59 = vld [vmem:[#allocation5 + $0x330] sm:$0xff] }
  0xe2   :  { %v378_v61 = vld [vmem:[#allocation2 + $0x98] sm:$0xff]  ;;  %984 = vmatprep.subr.mxu1 %v778_v60  ;;  %v735_v60 = vld [vmem:[#allocation5] sm:$0xff] }
  0xe3   :  { %2460 = vmatpush3.msra.mxu0 %v378_v61  ;;  %v777_v61 = vld [vmem:[#allocation5 + $0x150] sm:$0xff] }
  0xe4   :  { %2461 = vmatprep.subr.mxu0 %v2671_v6  ;;  %985 = vmatpush1.msra.mxu1 %v777_v61  ;;  %v835_v61 = vld [vmem:[#allocation5 + $0x320] sm:$0xff] }
  0xe6   :  { %v373_v62 = vld [vmem:[#allocation2 + $0x88] sm:$0xff]  ;;  %v368_v63 = vld [vmem:[#allocation2 + $0x60] sm:$0xff] }
  0xe7   :  { %2462 = vmatpush3.msra.mxu0 %v373_v62  ;;  %v775_v62 = vld [vmem:[#allocation5 + $0x140] sm:$0xff] }
  0xe8   :  { %2463 = vmatprep.subr.mxu0 %v2671_v6  ;;  %986 = vmatprep.subr.mxu1 %v775_v62  ;;  %v829_v62 = vld [vmem:[#allocation5 + $0x2f0] sm:$0xff] }
  0xe9   :  { %2464 = vmatpush3.msra.mxu0 %v368_v63  ;;  %v877_v63 = vld [vmem:[#allocation5 + $0x470] sm:$0xff] }
  0xea   :  { %2466 = vmatmul.mubr.msk.f32.vlgmr.msra.gmra.mxu0 %vm395_vm10, %v2875_v8  ;;  %v393_v2 = vpop.permute.xlu0 %392  ;;  %1053 = vmatprep.subr.mxu0 %v877_v63  ;;  %v834_v63 = vld [vmem:[#allocation5 + $0x318] sm:$0xff] }
 0x179   :  { %v481_v0 = vpop.f32.mrf.mxu1 }
 0x17a   :  { %v2921_v4 = vadd.f32 %v481_v0, %v393_v2  ;;  %v876_v0 = vld [vmem:[#allocation5 + $0x468] sm:$0xff] }
 0x17b   :  { %v483_v1 = vpop.f32.mrf.mxu1  ;;  %1054 = vmatpush1.msra.mxu0 %v876_v0  ;;  %v828_v0 = vld [vmem:[#allocation5 + $0x2e8] sm:$0xff] }
 0x17c   :  { %v2919_v3 = vadd.f32 %v483_v1, %v393_v2  ;;  %v632_v7 = vmin.f32 %v2921_v4, 20.0  ;;  %vm627_vm12 = vcmp.gt.f32.partialorder %v2921_v4, 20.0  ;;  %v774_v1 = vld [vmem:[#allocation5 + $0x138] sm:$0xff] }
 0x17d   :  { %987 = vmatpush1.msra.mxu1 %v774_v1  ;;  %v832_v1 = vld [vmem:[#allocation5 + $0x308] sm:$0xff] }
 0x17e   :  { %v633_v5 = vmin.f32 %v2919_v3, 20.0  ;;  %v637_v10 = vmul.f32 1.442695, %v632_v7  ;;  %vm628_vm11 = vcmp.gt.f32.partialorder %v2919_v3, 20.0  ;;  %v771_v7 = vld [vmem:[#allocation5 + $0x120] sm:$0xff] }
 0x180   :  { %v639_v9 = vmul.f32 1.442695, %v633_v5  ;;  %v871_v5 = vld [vmem:[#allocation5 + $0x440] sm:$0xff] }
 0x182   :  { %2550 = vpow2.f32 %v639_v9  ;;  %v870_v9 = vld [vmem:[#allocation5 + $0x438] sm:$0xff] }
 0x183   :  { %2552 = vpow2.f32 %v637_v10  ;;  %v769_v10 = vld [vmem:[#allocation5 + $0x110] sm:$0xff] }
 0x18f   :  { %v2551_v18 = vpop.eup %2550 }
 0x190   :  { %v2553_v19 = vpop.eup %2552  ;;  %v648_v20 = vadd.f32 1.0, %v2551_v18  ;;  %v763_v18 = vld [vmem:[#allocation5 + $0xe0] sm:$0xff] }
 0x191   :  { %v647_v21 = vadd.f32 1.0, %v2553_v19  ;;  %v864_v19 = vld [vmem:[#allocation5 + $0x408] sm:$0xff] }
 0x199   :  { %v552_v11 = vpop.f32.mrf.mxu1 }
 0x19a   :  { %v553_v12 = vadd.f32 %v552_v11, %v393_v2  ;;  %v868_v11 = vld [vmem:[#allocation5 + $0x428] sm:$0xff] }
 0x19b   :  { %v554_v13 = vpop.f32.mrf.mxu1 }
 0x19c   :  { %v634_v14 = vmin.f32 %v553_v12, 20.0  ;;  %v555_v8 = vadd.f32 %v554_v13, %v393_v2  ;;  %vm629_vm13 = vcmp.gt.f32.partialorder %v553_v12, 20.0  ;;  %v768_v13 = vld [vmem:[#allocation5 + $0x108] sm:$0xff] }
 0x19e   :  { %v641_v15 = vmul.f32 1.442695, %v634_v14  ;;  %v635_v16 = vmin.f32 %v555_v8, 20.0  ;;  %vm630_vm14 = vcmp.gt.f32.partialorder %v555_v8, 20.0 }
 0x1a0   :  { %2554 = vpow2.f32 %v641_v15  ;;  %v643_v17 = vmul.f32 1.442695, %v635_v16  ;;  %v867_v15 = vld [vmem:[#allocation5 + $0x420] sm:$0xff]  ;;  %v765_v16 = vld [vmem:[#allocation5 + $0xf0] sm:$0xff] }
 0x1a2   :  { %2556 = vpow2.f32 %v643_v17  ;;  %v865_v17 = vld [vmem:[#allocation5 + $0x410] sm:$0xff] }
 0x1a3   :  { %2558 = vlog2.f32 %v648_v20  ;;  %v762_v20 = vld [vmem:[#allocation5 + $0xd8] sm:$0xff] }
 0x1a4   :  { %2560 = vlog2.f32 %v647_v21  ;;  %v862_v21 = vld [vmem:[#allocation5 + $0x3f8] sm:$0xff] }
 0x1aa   :  { %v623_v22 = vpop.f32.mrf.mxu0 }
 0x1ab   :  { %v2925_v23 = vadd.f32 %v623_v22, %v393_v2  ;;  %v874_v2 = vld [vmem:[#allocation5 + $0x458] sm:$0xff]  ;;  %v760_v22 = vld [vmem:[#allocation5 + $0xc8] sm:$0xff] }
 0x1ac   :  { %v2467_v24 = vpop.f32.mrf.mxu0  ;;  %1055 = vmatprep.subr.mxu0 %v874_v2  ;;  %v826_v2 = vld [vmem:[#allocation5 + $0x2d8] sm:$0xff] }
 0x1ad   :  { %v2555_v25 = vpop.eup %2554  ;;  %v636_v26 = vmin.f32 %v2925_v23, 20.0  ;;  %vm631_vm15 = vcmp.gt.f32.partialorder %v2925_v23, 20.0  ;;  %v759_v24 = vld [vmem:[#allocation5 + $0xc0] sm:$0xff] }
 0x1ae   :  { %v649_v27 = vadd.f32 1.0, %v2555_v25  ;;  %v859_v25 = vld [vmem:[#allocation5 + $0x3e0] sm:$0xff] }
 0x1af   :  { %v2557_v28 = vpop.eup %2556  ;;  %v645_v29 = vmul.f32 1.442695, %v636_v26  ;;  %v757_v26 = vld [vmem:[#allocation5 + $0xb0] sm:$0xff] }
 0x1b0   :  { %2562 = vlog2.f32 %v649_v27  ;;  %v650_v30 = vadd.f32 1.0, %v2557_v28  ;;  %v2559_v31 = vpop.eup %2558  ;;  %v858_v27 = vld [vmem:[#allocation5 + $0x3d8] sm:$0xff]  ;;  %v756_v28 = vld [vmem:[#allocation5 + $0xa8] sm:$0xff] }
 0x1b1   :  { %2564 = vpow2.f32 %v645_v29  ;;  %v2561_v32 = vpop.eup %2560  ;;  %v655_v33 = vmul.f32 0.6931472, %v2559_v31  ;;  %v856_v29 = vld [vmem:[#allocation5 + $0x3c8] sm:$0xff]  ;;  %v855_v31 = vld [vmem:[#allocation5 + $0x3c0] sm:$0xff] }
 0x1b2   :  { %2566 = vlog2.f32 %v650_v30  ;;  %v653_v34 = vmul.f32 0.6931472, %v2561_v32  ;;  %v754_v30 = vld [vmem:[#allocation5 + $0x98] sm:$0xff]  ;;  %v753_v32 = vld [vmem:[#allocation5 + $0x90] sm:$0xff] }
 0x1b3   :  { %v663_v35 = vsel %vm628_vm11, %v2919_v3, %v655_v33  ;;  %v853_v33 = vld [vmem:[#allocation5 + $0x3b0] sm:$0xff] }
 0x1b4   :  { %v662_v37 = vsel %vm627_vm12, %v2921_v4, %v653_v34  ;;  %2568 = vtanh.f32 %v663_v35  ;;  %v751_v34 = vld [vmem:[#allocation5 + $0x80] sm:$0xff]  ;;  %v852_v35 = vld [vmem:[#allocation5 + $0x3a8] sm:$0xff]  ;;  %vm1841_vm12 = vcmask 254080  }
 0x1b5   :  { %2570 = vtanh.f32 %v662_v37  ;;  %v850_v37 = vld [vmem:[#allocation5 + $0x398] sm:$0xff] }
 0x1bd   :  { %v2563_v36 = vpop.eup %2562 }
 0x1be   :  { %v2565_v38 = vpop.eup %2564  ;;  %v657_v39 = vmul.f32 0.6931472, %v2563_v36  ;;  %v750_v36 = vld [vmem:[#allocation5 + $0x78] sm:$0xff] }
 0x1bf   :  { %v2567_v40 = vpop.eup %2566  ;;  %v651_v41 = vadd.f32 1.0, %v2565_v38  ;;  %v748_v38 = vld [vmem:[#allocation5 + $0x68] sm:$0xff] }
 0x1c0   :  { %v664_v42 = vsel %vm629_vm13, %v553_v12, %v657_v39  ;;  %v659_v43 = vmul.f32 0.6931472, %v2567_v40  ;;  %v849_v39 = vld [vmem:[#allocation5 + $0x390] sm:$0xff]  ;;  %v747_v40 = vld [vmem:[#allocation5 + $0x60] sm:$0xff]  ;;  %vm1847_vm13 = vcmask 385280  }
 0x1c1   :  { %2572 = vtanh.f32 %v664_v42  ;;  %v2569_v45 = vpop.eup %2568  ;;  %v745_v42 = vld [vmem:[#allocation5 + $0x50] sm:$0xff] }
 0x1c2   :  { %v665_v44 = vsel %vm630_vm14, %v555_v8, %v659_v43  ;;  %2574 = vlog2.f32 %v651_v41  ;;  %v2571_v46 = vpop.eup %2570  ;;  %v2933_v49 = vmul.f32 %v2569_v45, %v2919_v3  ;;  %v772_v3 = vld [vmem:[#allocation5 + $0x128] sm:$0xff]  ;;  %v847_v41 = vld [vmem:[#allocation5 + $0x380] sm:$0xff]  ;;  %v846_v43 = vld [vmem:[#allocation5 + $0x378] sm:$0xff]  ;;  %vm1854_vm14 = vcmask 516480  }
 0x1c3   :  { %2576 = vtanh.f32 %v665_v44  ;;  %v2945_v56 = vmul.f32 %v2571_v46, %v2921_v4  ;;  %v873_v4 = vld [vmem:[#allocation5 + $0x450] sm:$0xff]  ;;  %988 = vmatprep.subr.mxu1 %v772_v3  ;;  %v744_v44 = vld [vmem:[#allocation5 + $0x48] sm:$0xff]  ;;  %v742_v46 = vld [vmem:[#allocation5 + $0x38] sm:$0xff] }
 0x1c4   :  { %1056 = vmatpush1.msra.mxu0 %v873_v4  ;;  %989 = vmatpush1.msra.mxu1 %v771_v7  ;;  %v844_v45 = vld [vmem:[#allocation5 + $0x368] sm:$0xff]  ;;  %v831_v3 = vld [vmem:[#allocation5 + $0x300] sm:$0xff]  ;;  %v825_v4 = vld [vmem:[#allocation5 + $0x2d0] sm:$0xff] }
 0x1c5   :  { %1057 = vmatprep.subr.mxu0 %v871_v5  ;;  %990 = vmatprep.subr.mxu1 %v769_v10  ;;  %v925_v5 = vld [vmem:[#allocation5 + $0x5f0] sm:$0xff]  ;;  %v823_v7 = vld [vmem:[#allocation5 + $0x2c0] sm:$0xff]  ;;  %v822_v10 = vld [vmem:[#allocation5 + $0x2b8] sm:$0xff] }
 0x1c6   :  { %1058 = vmatpush1.msra.mxu0 %v870_v9  ;;  %991 = vmatpush1.msra.mxu1 %v768_v13  ;;  %v924_v9 = vld [vmem:[#allocation5 + $0x5e8] sm:$0xff]  ;;  %v921_v13 = vld [vmem:[#allocation5 + $0x5d0] sm:$0xff] }
 0x1c7   :  { %1059 = vmatprep.subr.mxu0 %v868_v11  ;;  %v922_v11 = vld [vmem:[#allocation5 + $0x5d8] sm:$0xff] }
 0x1c8   :  { %1060 = vmatpush1.msra.mxu0 %v867_v15  ;;  %v919_v15 = vld [vmem:[#allocation5 + $0x5c0] sm:$0xff] }
 0x1c9   :  { %1061 = vmatprep.subr.mxu0 %v865_v17  ;;  %v918_v17 = vld [vmem:[#allocation5 + $0x5b8] sm:$0xff] }
 0x1ca   :  { %1062 = vmatpush1.msra.mxu0 %v864_v19  ;;  %v916_v19 = vld [vmem:[#allocation5 + $0x5a8] sm:$0xff] }
 0x1cb   :  { %1063 = vmatprep.subr.mxu0 %v862_v21  ;;  %v915_v21 = vld [vmem:[#allocation5 + $0x5a0] sm:$0xff] }
 0x1ce   :  { %v2573_v47 = vpop.eup %2572 }
 0x1cf   :  { %v2575_v48 = vpop.eup %2574  ;;  %v2935_v50 = vmul.f32 %v2573_v47, %v553_v12  ;;  %v843_v47 = vld [vmem:[#allocation5 + $0x360] sm:$0xff] }
 0x1d0   :  { %v2577_v51 = vpop.eup %2576  ;;  %v661_v52 = vmul.f32 0.6931472, %v2575_v48  ;;  %v741_v48 = vld [vmem:[#allocation5 + $0x30] sm:$0xff] }
 0x1d1   :  { %v2528_v53 = vpack.i.bf16 %v2935_v50, %v2933_v49  ;;  %v2940_v54 = vmul.f32 %v2577_v51, %v555_v8  ;;  %v766_v8 = vld [vmem:[#allocation5 + $0xf8] sm:$0xff]  ;;  %v841_v51 = vld [vmem:[#allocation5 + $0x350] sm:$0xff] }
 0x1d2   :  { %v666_v55 = vsel %vm631_vm15, %v2925_v23, %v661_v52  ;;  %992 = vmatprep.subr.mxu1 %v766_v8  ;;  %v739_v52 = vld [vmem:[#allocation5 + $0x20] sm:$0xff]  ;;  %vm1867_vm15 = vcmask 647680  }
 0x1d3   :  { %2578 = vtanh.f32 %v666_v55  ;;  %2529 = vrot.lane.b32.xlu1 %v2528_v53, %s2669_s14  ;;  %v2533_v57 = vpack.i.bf16 %v2945_v56, %v2940_v54  ;;  %993 = vmatpush1.msra.mxu1 %v765_v16  ;;  %v840_v53 = vld [vmem:[#allocation5 + $0x348] sm:$0xff]  ;;  %v738_v55 = vld [vmem:[#allocation5 + $0x18] sm:$0xff]  ;;  %v819_v8 = vld [vmem:[#allocation5 + $0x2a0] sm:$0xff] }
 0x1d4   :  { %994 = vmatprep.subr.mxu1 %v763_v18  ;;  %v817_v16 = vld [vmem:[#allocation5 + $0x290] sm:$0xff]  ;;  %v816_v18 = vld [vmem:[#allocation5 + $0x288] sm:$0xff] }
 0x1d5   :  { %995 = vmatpush1.msra.mxu1 %v762_v20  ;;  %v814_v20 = vld [vmem:[#allocation5 + $0x278] sm:$0xff] }
 0x1d6   :  { %996 = vmatprep.subr.mxu1 %v760_v22  ;;  %v813_v22 = vld [vmem:[#allocation5 + $0x270] sm:$0xff] }
 0x1d7   :  { %2534 = vrot.lane.b32.xlu1 %v2533_v57, %s2669_s14  ;;  %997 = vmatpush1.msra.mxu1 %v759_v24  ;;  %v838_v57 = vld [vmem:[#allocation5 + $0x338] sm:$0xff]  ;;  %v811_v24 = vld [vmem:[#allocation5 + $0x260] sm:$0xff] }
 0x1d8   :  { %998 = vmatprep.subr.mxu1 %v757_v26  ;;  %v810_v26 = vld [vmem:[#allocation5 + $0x258] sm:$0xff] }
 0x1d9   :  { %999 = vmatpush1.msra.mxu1 %v756_v28  ;;  %v808_v28 = vld [vmem:[#allocation5 + $0x248] sm:$0xff] }
 0x1da   :  { %1000 = vmatprep.subr.mxu1 %v754_v30  ;;  %v807_v30 = vld [vmem:[#allocation5 + $0x240] sm:$0xff] }
 0x1db   :  { %1001 = vmatpush1.msra.mxu1 %v753_v32  ;;  %v805_v32 = vld [vmem:[#allocation5 + $0x230] sm:$0xff] }
 0x1dc   :  { %1002 = vmatprep.subr.mxu1 %v751_v34  ;;  %v804_v34 = vld [vmem:[#allocation5 + $0x228] sm:$0xff] }
 0x1dd   :  { %1003 = vmatpush1.msra.mxu1 %v750_v36  ;;  %v802_v36 = vld [vmem:[#allocation5 + $0x218] sm:$0xff] }
 0x1de   :  { %1004 = vmatprep.subr.mxu1 %v748_v38  ;;  %v801_v38 = vld [vmem:[#allocation5 + $0x210] sm:$0xff] }
 0x1df   :  { %1005 = vmatpush1.msra.mxu1 %v747_v40  ;;  %v799_v40 = vld [vmem:[#allocation5 + $0x200] sm:$0xff] }
 0x1e0   :  { %v2579_v12 = vpop.eup %2578  ;;  %1006 = vmatprep.subr.mxu1 %v745_v42  ;;  %v798_v42 = vld [vmem:[#allocation5 + $0x1f8] sm:$0xff] }
 0x1e1   :  { %v2951_v14 = vmul.f32 %v2579_v12, %v2925_v23  ;;  %v861_v23 = vld [vmem:[#allocation5 + $0x3f0] sm:$0xff]  ;;  %1007 = vmatpush1.msra.mxu1 %v744_v44  ;;  %v820_v12 = vld [vmem:[#allocation5 + $0x2a8] sm:$0xff] }
 0x1e2   :  { %1064 = vmatpush1.msra.mxu0 %v861_v23  ;;  %1008 = vmatprep.subr.mxu1 %v742_v46  ;;  %v913_v23 = vld [vmem:[#allocation5 + $0x590] sm:$0xff]  ;;  %v796_v44 = vld [vmem:[#allocation5 + $0x1e8] sm:$0xff]  ;;  %v795_v46 = vld [vmem:[#allocation5 + $0x1e0] sm:$0xff] }
 0x1e3   :  { %690 = vrot.lane.b32.xlu0 %v2951_v14, %s2669_s14  ;;  %1065 = vmatprep.subr.mxu0 %v859_v25  ;;  %v912_v25 = vld [vmem:[#allocation5 + $0x588] sm:$0xff] }
 0x1e4   :  { %1066 = vmatpush1.msra.mxu0 %v858_v27  ;;  %1009 = vmatpush1.msra.mxu1 %v741_v48  ;;  %v910_v27 = vld [vmem:[#allocation5 + $0x578] sm:$0xff]  ;;  %v792_v48 = vld [vmem:[#allocation5 + $0x1c8] sm:$0xff] }
 0x1e5   :  { %1067 = vmatprep.subr.mxu0 %v856_v29  ;;  %1010 = vmatprep.subr.mxu1 %v739_v52  ;;  %v909_v29 = vld [vmem:[#allocation5 + $0x570] sm:$0xff]  ;;  %v790_v52 = vld [vmem:[#allocation5 + $0x1b8] sm:$0xff] }
 0x1e6   :  { %1068 = vmatpush1.msra.mxu0 %v855_v31  ;;  %1011 = vmatpush1.msra.mxu1 %v738_v55  ;;  %v907_v31 = vld [vmem:[#allocation5 + $0x560] sm:$0xff]  ;;  %v789_v55 = vld [vmem:[#allocation5 + $0x1b0] sm:$0xff] }
 0x1e7   :  { %1069 = vmatprep.subr.mxu0 %v853_v33  ;;  %1012 = vmatprep.subr.mxu1 %v736_v58  ;;  %v906_v33 = vld [vmem:[#allocation5 + $0x558] sm:$0xff] }
 0x1e8   :  { %1070 = vmatpush1.msra.mxu0 %v852_v35  ;;  %1013 = vmatpush1.msra.mxu1 %v735_v60  ;;  %v904_v35 = vld [vmem:[#allocation5 + $0x548] sm:$0xff]  ;;  %v891_v60 = vld [vmem:[#allocation5 + $0x4e0] sm:$0xff] }
 0x1e9   :  { %1071 = vmatprep.subr.mxu0 %v850_v37  ;;  %1014 = vmatprep.subr.mxu1 %v829_v62  ;;  %v903_v37 = vld [vmem:[#allocation5 + $0x540] sm:$0xff] }
 0x1ea   :  { %1072 = vmatpush1.msra.mxu0 %v849_v39  ;;  %1015 = vmatpush2.msra.mxu1 %v828_v0  ;;  %v901_v39 = vld [vmem:[#allocation5 + $0x530] sm:$0xff] }
 0x1eb   :  { %1073 = vmatprep.subr.mxu0 %v847_v41  ;;  %1016 = vmatprep.subr.mxu1 %v826_v2  ;;  %v900_v41 = vld [vmem:[#allocation5 + $0x528] sm:$0xff]  ;;  %v889_v0 = vld [vmem:[#allocation5 + $0x4d0] sm:$0xff] }
 0x1ec   :  { %1074 = vmatpush1.msra.mxu0 %v846_v43  ;;  %1017 = vmatpush2.msra.mxu1 %v825_v4  ;;  %v898_v43 = vld [vmem:[#allocation5 + $0x518] sm:$0xff]  ;;  %v888_v2 = vld [vmem:[#allocation5 + $0x4c8] sm:$0xff] }
 0x1ed   :  { %1075 = vmatprep.subr.mxu0 %v844_v45  ;;  %1018 = vmatprep.subr.mxu1 %v823_v7  ;;  %v897_v45 = vld [vmem:[#allocation5 + $0x510] sm:$0xff]  ;;  %v886_v4 = vld [vmem:[#allocation5 + $0x4b8] sm:$0xff]  ;;  %v967_v7 = vld [vmem:[#allocation5 + $0x740] sm:$0x1f] }
 0x1ee   :  { %1076 = vmatpush1.msra.mxu0 %v843_v47  ;;  %1019 = vmatpush2.msra.mxu1 %v822_v10  ;;  %v793_v47 = vld [vmem:[#allocation5 + $0x1d0] sm:$0xff] }
 0x1ef   :  { %1077 = vmatprep.subr.mxu0 %v841_v51  ;;  %1020 = vmatprep.subr.mxu1 %v820_v12  ;;  %v895_v51 = vld [vmem:[#allocation5 + $0x500] sm:$0xff] }
 0x1f0   :  { %1078 = vmatpush1.msra.mxu0 %v840_v53  ;;  %1021 = vmatpush2.msra.mxu1 %v819_v8  ;;  %v894_v53 = vld [vmem:[#allocation5 + $0x4f8] sm:$0xff] }
 0x1f1   :  { %1079 = vmatprep.subr.mxu0 %v838_v57  ;;  %1022 = vmatprep.subr.mxu1 %v817_v16  ;;  %v892_v57 = vld [vmem:[#allocation5 + $0x4e8] sm:$0xff]  ;;  %v882_v8 = vld [vmem:[#allocation5 + $0x498] sm:$0xff] }
 0x1f2   :  { %1080 = vmatpush1.msra.mxu0 %v837_v59  ;;  %1023 = vmatpush2.msra.mxu1 %v816_v18  ;;  %v787_v59 = vld [vmem:[#allocation5 + $0x1a0] sm:$0xff] }
 0x1f3   :  { %1081 = vmatprep.subr.mxu0 %v835_v61  ;;  %1024 = vmatprep.subr.mxu1 %v814_v20 }
 0x1f4   :  { %1082 = vmatpush1.msra.mxu0 %v834_v63  ;;  %1025 = vmatpush2.msra.mxu1 %v813_v22  ;;  %v786_v63 = vld [vmem:[#allocation5 + $0x198] sm:$0xff] }
 0x1f5   :  { %1083 = vmatprep.subr.mxu0 %v832_v1  ;;  %1026 = vmatprep.subr.mxu1 %v811_v24  ;;  %v784_v1 = vld [vmem:[#allocation5 + $0x188] sm:$0xff]  ;;  %v830_v22 = vld [vmem:[#allocation5 + $0x2f8] sm:$0xff] }
 0x1f6   :  { %1084 = vmatpush1.msra.mxu0 %v831_v3  ;;  %1027 = vmatpush2.msra.mxu1 %v810_v26  ;;  %v783_v3 = vld [vmem:[#allocation5 + $0x180] sm:$0xff] }
 0x1f7   :  { %1085 = vmatprep.subr.mxu0 %v925_v5  ;;  %1028 = vmatprep.subr.mxu1 %v808_v28  ;;  %v885_v5 = vld [vmem:[#allocation5 + $0x4b0] sm:$0xff] }
 0x1f8   :  { %1086 = vmatpush2.msra.mxu0 %v924_v9  ;;  %1029 = vmatpush2.msra.mxu1 %v807_v30 }
 0x1f9   :  { %1087 = vmatprep.subr.mxu0 %v922_v11  ;;  %1030 = vmatprep.subr.mxu1 %v805_v32 }
 0x1fa   :  { %1088 = vmatpush2.msra.mxu0 %v921_v13  ;;  %1031 = vmatpush2.msra.mxu1 %v804_v34  ;;  %v883_v13 = vld [vmem:[#allocation5 + $0x4a0] sm:$0xff] }
 0x1fb   :  { %1089 = vmatprep.subr.mxu0 %v919_v15  ;;  %1032 = vmatprep.subr.mxu1 %v802_v36  ;;  %v963_v34 = vld [vmem:[#allocation5 + $0x720] sm:$0xff]  ;;  %v961_v36 = vld [vmem:[#allocation5 + $0x710] sm:$0xff] }
 0x1fc   :  { %1090 = vmatpush2.msra.mxu0 %v918_v17  ;;  %1033 = vmatpush2.msra.mxu1 %v801_v38  ;;  %v880_v17 = vld [vmem:[#allocation5 + $0x488] sm:$0xff] }
 0x1fd   :  { %1091 = vmatprep.subr.mxu0 %v916_v19  ;;  %1034 = vmatprep.subr.mxu1 %v799_v40 }
 0x1fe   :  { %1092 = vmatpush2.msra.mxu0 %v915_v21  ;;  %1035 = vmatpush2.msra.mxu1 %v798_v42  ;;  %v879_v21 = vld [vmem:[#allocation5 + $0x480] sm:$0xff]  ;;  %v958_v42 = vld [vmem:[#allocation5 + $0x6f8] sm:$0xff] }
 0x1ff   :  { %1093 = vmatprep.subr.mxu0 %v913_v23  ;;  %1036 = vmatprep.subr.mxu1 %v796_v44  ;;  %v957_v44 = vld [vmem:[#allocation5 + $0x6f0] sm:$0xff] }
 0x200   :  { %1094 = vmatpush2.msra.mxu0 %v912_v25  ;;  %1037 = vmatpush2.msra.mxu1 %v795_v46  ;;  %v955_v46 = vld [vmem:[#allocation5 + $0x6e0] sm:$0xff] }
 0x201   :  { %1095 = vmatprep.subr.mxu0 %v910_v27  ;;  %1038 = vmatprep.subr.mxu1 %v793_v47  ;;  %v779_v47 = vld [vmem:[#allocation5 + $0x160] sm:$0xff] }
 0x202   :  { %1096 = vmatpush2.msra.mxu0 %v909_v29  ;;  %1039 = vmatpush2.msra.mxu1 %v792_v48  ;;  %v954_v48 = vld [vmem:[#allocation5 + $0x6d8] sm:$0xff] }
 0x203   :  { %1097 = vmatprep.subr.mxu0 %v907_v31  ;;  %1040 = vmatprep.subr.mxu1 %v790_v52  ;;  %v952_v52 = vld [vmem:[#allocation5 + $0x6c8] sm:$0xff] }
 0x204   :  { %1098 = vmatpush2.msra.mxu0 %v906_v33  ;;  %1041 = vmatpush2.msra.mxu1 %v789_v55  ;;  %v964_v33 = vld [vmem:[#allocation5 + $0x728] sm:$0xff]  ;;  %v951_v55 = vld [vmem:[#allocation5 + $0x6c0] sm:$0xff] }
 0x205   :  { %1099 = vmatprep.subr.mxu0 %v904_v35  ;;  %1042 = vmatprep.subr.mxu1 %v787_v59  ;;  %v773_v59 = vld [vmem:[#allocation5 + $0x130] sm:$0xff] }
 0x206   :  { %1100 = vmatpush2.msra.mxu0 %v903_v37  ;;  %1043 = vmatpush2.msra.mxu1 %v786_v63  ;;  %v770_v63 = vld [vmem:[#allocation5 + $0x118] sm:$0xff] }
 0x207   :  { %1101 = vmatprep.subr.mxu0 %v901_v39  ;;  %1044 = vmatprep.subr.mxu1 %v784_v1  ;;  %v960_v39 = vld [vmem:[#allocation5 + $0x708] sm:$0xff]  ;;  %v815_v1 = vld [vmem:[#allocation5 + $0x280] sm:$0xff] }
 0x208   :  { %1102 = vmatpush2.msra.mxu0 %v900_v41  ;;  %1045 = vmatpush2.msra.mxu1 %v783_v3  ;;  %v767_v3 = vld [vmem:[#allocation5 + $0x100] sm:$0xff] }
 0x209   :  { %1103 = vmatprep.subr.mxu0 %v898_v43  ;;  %2317 = vmatprep.subr.msk.mxu1 %vm972_vm1, %v967_v7  ;;  %v782_v43 = vld [vmem:[#allocation5 + $0x178] sm:$0xff]  ;;  %v940_v7 = vld [vmem:[#allocation5 + $0x668] sm:$0xff] }
 0x20a   :  { %1104 = vmatpush2.msra.mxu0 %v897_v45  ;;  %v827_v45 = vld [vmem:[#allocation5 + $0x2e0] sm:$0xff] }
 0x20b   :  { %1105 = vmatprep.subr.mxu0 %v895_v51  ;;  %v824_v51 = vld [vmem:[#allocation5 + $0x2c8] sm:$0xff] }
 0x20c   :  { %1106 = vmatpush2.msra.mxu0 %v894_v53  ;;  %v776_v53 = vld [vmem:[#allocation5 + $0x148] sm:$0xff] }
 0x20d   :  { %1107 = vmatprep.subr.mxu0 %v892_v57  ;;  %v821_v57 = vld [vmem:[#allocation5 + $0x2b0] sm:$0xff] }
 0x20e   :  { %1108 = vmatpush2.msra.mxu0 %v891_v60  ;;  %v948_v60 = vld [vmem:[#allocation5 + $0x6a8] sm:$0xff] }
 0x20f   :  { %1109 = vmatprep.subr.mxu0 %v889_v0  ;;  %v945_v0 = vld [vmem:[#allocation5 + $0x690] sm:$0xff] }
 0x210   :  { %1110 = vmatpush2.msra.mxu0 %v888_v2  ;;  %v943_v2 = vld [vmem:[#allocation5 + $0x680] sm:$0xff] }
 0x211   :  { %1111 = vmatprep.subr.mxu0 %v886_v4  ;;  %v942_v4 = vld [vmem:[#allocation5 + $0x678] sm:$0xff] }
 0x212   :  { %1112 = vmatpush2.msra.mxu0 %v885_v5  ;;  %v812_v5 = vld [vmem:[#allocation5 + $0x268] sm:$0xff] }
 0x213   :  { %1113 = vmatprep.subr.mxu0 %v883_v13  ;;  %v761_v13 = vld [vmem:[#allocation5 + $0xd0] sm:$0xff] }
 0x214   :  { %1114 = vmatpush2.msra.mxu0 %v882_v8  ;;  %v936_v8 = vld [vmem:[#allocation5 + $0x648] sm:$0xff] }
 0x215   :  { %1115 = vmatprep.subr.mxu0 %v880_v17  ;;  %v758_v17 = vld [vmem:[#allocation5 + $0xb8] sm:$0xff] }
 0x216   :  { %1116 = vmatpush2.msra.mxu0 %v879_v21  ;;  %v755_v21 = vld [vmem:[#allocation5 + $0xa0] sm:$0xff] }
 0x217   :  { %2335 = vmatprep.subr.mxu0 %v830_v22  ;;  %v930_v22 = vld [vmem:[#allocation5 + $0x618] sm:$0xff] }
 0x245   :  { %v2530_v58 = vpop.permute.xlu1 %2529 }
 0x246   :  { %v2532_v61 = vunpack.i.h.bf16 %v2530_v58  ;;  %v2531_v62 = vunpack.i.l.bf16 %v2530_v58  ;;  %v949_v58 = vld [vmem:[#allocation5 + $0x6b0] sm:$0xff] }
 0x248   :  { %v693_v10 = vsel %vm162_vm8, %v2531_v62, %v2532_v61 }
 0x249   :  { %v2535_v9 = vpop.permute.xlu1 %2534  ;;  %v702_v19 = vmax.f32 %v2933_v49, %v693_v10  ;;  %v939_v10 = vld [vmem:[#allocation5 + $0x660] sm:$0xff] }
 0x24a   :  { %v2537_v11 = vunpack.i.h.bf16 %v2535_v9  ;;  %v2536_v12 = vunpack.i.l.bf16 %v2535_v9  ;;  %v764_v9 = vld [vmem:[#allocation5 + $0xe8] sm:$0xff] }
 0x24c   :  { %v694_v15 = vsel %vm162_vm8, %v2532_v61, %v2536_v12  ;;  %v692_v16 = vsel %vm162_vm8, %v2537_v11, %v2531_v62  ;;  %v818_v61 = vld [vmem:[#allocation5 + $0x298] sm:$0xff]  ;;  %v809_v11 = vld [vmem:[#allocation5 + $0x250] sm:$0xff] }
 0x24d   :  { %v701_v18 = vmax.f32 %v2945_v56, %v692_v16  ;;  %v703_v20 = vmax.f32 %v2935_v50, %v694_v15  ;;  %v946_v62 = vld [vmem:[#allocation5 + $0x698] sm:$0xff] }
 0x24e   :  { %v806_v15 = vld [vmem:[#allocation5 + $0x238] sm:$0xff] }
 0x24f   :  { %711 = vrot.lane.b32.xlu0 %v701_v18, %s2670_s15  ;;  %v2538_v23 = vpack.i.bf16 %v703_v20, %v702_v19  ;;  %v934_v16 = vld [vmem:[#allocation5 + $0x638] sm:$0xff] }
 0x251   :  { %2539 = vrot.lane.b32.xlu1 %v2538_v23, %s2670_s15  ;;  %v800_v23 = vld [vmem:[#allocation5 + $0x208] sm:$0xff] }
 0x255   :  { %v691_v24 = vpop.permute.xlu0 %690 }
 0x256   :  { %v695_v25 = vsel %vm162_vm8, %v2536_v12, %v691_v24  ;;  %v2966_v26 = vmax.f32 %v2951_v14, %v691_v24  ;;  %v966_v14 = vld [vmem:[#allocation5 + $0x738] sm:$0x1f]  ;;  %v937_v12 = vld [vmem:[#allocation5 + $0x650] sm:$0xff]  ;;  %v928_v24 = vld [vmem:[#allocation5 + $0x608] sm:$0xff] }
 0x257   :  { %v704_v49 = vmax.f32 %v2940_v54, %v695_v25  ;;  %v752_v25 = vld [vmem:[#allocation5 + $0x88] sm:$0xff] }
 0x258   :  { %719 = vrot.lane.b32.xlu0 %v2966_v26, %s2670_s15 }
 0x259   :  { %717 = vrot.lane.b32.xlu1 %v704_v49, %s2670_s15 }
 0x2c1   :  { %v712_v28 = vpop.permute.xlu0 %711 }
 0x2c3   :  { %v2540_v50 = vpop.permute.xlu1 %2539 }
 0x2c4   :  { %v2542_v56 = vunpack.i.h.bf16 %v2540_v50  ;;  %v2541_v27 = vunpack.i.l.bf16 %v2540_v50  ;;  %v797_v50 = vld [vmem:[#allocation5 + $0x1f0] sm:$0xff] }
 0x2c6   :  { %v721_v29 = vsel %vm88_vm9, %v712_v28, %v2541_v27  ;;  %v722_v30 = vsel %vm88_vm9, %v2541_v27, %v2542_v56  ;;  %v926_v28 = vld [vmem:[#allocation5 + $0x5f8] sm:$0xff] }
 0x2c7   :  { %v2974_v31 = vmax.f32 %v701_v18, %v721_v29  ;;  %v731_v32 = vmax.f32 %v702_v19, %v722_v30  ;;  %v933_v18 = vld [vmem:[#allocation5 + $0x630] sm:$0xff]  ;;  %v803_v19 = vld [vmem:[#allocation5 + $0x220] sm:$0xff]  ;;  %v794_v29 = vld [vmem:[#allocation5 + $0x1d8] sm:$0xff] }
 0x2c8   :  { %v878_v30 = vld [vmem:[#allocation5 + $0x478] sm:$0xff] }
 0x2c9   :  { %1046 = vmatprep.mubr.f32.mxu1 %v731_v32 }
 0x2ca   :  { %v2976_v54 = vpop.permute.xlu0 %719  ;;  %1047 = vmatmul.mubr.f32.vlgmr.msra.gmra.mxu1 %v2974_v31 }
 0x2cb   :  { %v718_v35 = vpop.permute.xlu1 %717  ;;  %2318 = vmatpush1.msk.msra.mxu1 %vm972_vm1, %v966_v14  ;;  %1188 = vmatprep.mubr.f32.mxu1 %v2671_v6  ;;  %v2992_v27 = vmax.f32 %v2966_v26, %v2976_v54  ;;  %v923_v14 = vld [vmem:[#allocation5 + $0x5e0] sm:$0xff] }
 0x2cc   :  { %v723_v37 = vsel %vm88_vm9, %v2542_v56, %v718_v35  ;;  %v724_v38 = vsel %vm88_vm9, %v718_v35, %v2976_v54  ;;  %1130 = vmatprep.subr.mxu1 %v964_v33  ;;  %v749_v56 = vld [vmem:[#allocation5 + $0x70] sm:$0xff]  ;;  %v791_v33 = vld [vmem:[#allocation5 + $0x1c0] sm:$0xff]  ;;  %v920_v54 = vld [vmem:[#allocation5 + $0x5c8] sm:$0xff] }
 0x2cd   :  { %v2984_v40 = vmax.f32 %v703_v20, %v723_v37  ;;  %v2986_v41 = vmax.f32 %v704_v49, %v724_v38  ;;  %1131 = vmatpush1.msra.mxu1 %v963_v34  ;;  %v931_v20 = vld [vmem:[#allocation5 + $0x620] sm:$0xff]  ;;  %v788_v35 = vld [vmem:[#allocation5 + $0x1a8] sm:$0xff]  ;;  %v917_v38 = vld [vmem:[#allocation5 + $0x5b0] sm:$0xff] }
 0x2ce   :  { %1132 = vmatprep.subr.mxu1 %v961_v36  ;;  %v927_v49 = vld [vmem:[#allocation5 + $0x600] sm:$0xff]  ;;  %v872_v36 = vld [vmem:[#allocation5 + $0x448] sm:$0xff] }
 0x2cf   :  { %1117 = vmatprep.mubr.f32.mxu0 %v2986_v41  ;;  %1133 = vmatpush1.msra.mxu1 %v960_v39  ;;  %v875_v34 = vld [vmem:[#allocation5 + $0x460] sm:$0xff]  ;;  %v740_v37 = vld [vmem:[#allocation5 + $0x28] sm:$0xff]  ;;  %v785_v39 = vld [vmem:[#allocation5 + $0x190] sm:$0xff] }
 0x2d0   :  { %1118 = vmatmul.mubr.f32.vlgmr.msra.gmra.mxu0 %v2984_v40  ;;  %1134 = vmatprep.subr.mxu1 %v958_v42  ;;  %v743_v26 = vld [vmem:[#allocation5 + $0x40] sm:$0xff]  ;;  %v869_v42 = vld [vmem:[#allocation5 + $0x430] sm:$0xff] }
 0x2d1   :  { %2336 = vmatpush3.msra.mxu0 %v782_v43  ;;  %1135 = vmatpush1.msra.mxu1 %v957_v44  ;;  %v737_v43 = vld [vmem:[#allocation5 + $0x10] sm:$0xff]  ;;  %v914_v44 = vld [vmem:[#allocation5 + $0x598] sm:$0xff] }
 0x2d2   :  { %2337 = vmatprep.subr.mxu0 %v827_v45  ;;  %1259 = vmatprep.mubr.f32.mxu0 %v731_v32  ;;  %v746_v32 = vld [vmem:[#allocation5 + $0x58] sm:$0xff]  ;;  %v911_v45 = vld [vmem:[#allocation5 + $0x580] sm:$0xff] }
 0x2d3   :  { %1136 = vmatprep.subr.mxu1 %v955_v46  ;;  %2338 = vmatpush3.msra.mxu0 %v779_v47  ;;  %v968_v46 = vld [vmem:[#allocation5 + $0x748] sm:$0x1f]  ;;  %v863_v47 = vld [vmem:[#allocation5 + $0x400] sm:$0xff] }
 0x2d4   :  { %1137 = vmatpush1.msra.mxu1 %v954_v48  ;;  %2339 = vmatprep.subr.mxu0 %v824_v51  ;;  %v908_v48 = vld [vmem:[#allocation5 + $0x568] sm:$0xff]  ;;  %v965_v51 = vld [vmem:[#allocation5 + $0x730] sm:$0xff] }
 0x2d5   :  { %1138 = vmatprep.subr.mxu1 %v952_v52  ;;  %2340 = vmatpush3.msra.mxu0 %v776_v53  ;;  %v860_v52 = vld [vmem:[#allocation5 + $0x3e8] sm:$0xff]  ;;  %v905_v53 = vld [vmem:[#allocation5 + $0x550] sm:$0xff] }
 0x2d6   :  { %1139 = vmatpush1.msra.mxu1 %v951_v55  ;;  %2341 = vmatprep.subr.mxu0 %v821_v57  ;;  %v962_v55 = vld [vmem:[#allocation5 + $0x718] sm:$0xff]  ;;  %v857_v57 = vld [vmem:[#allocation5 + $0x3d0] sm:$0xff] }
 0x2d7   :  { %1140 = vmatprep.subr.mxu1 %v949_v58  ;;  %2342 = vmatpush3.msra.mxu0 %v773_v59  ;;  %v902_v58 = vld [vmem:[#allocation5 + $0x538] sm:$0xff] }
 0x2d8   :  { %1141 = vmatpush1.msra.mxu1 %v948_v60  ;;  %2343 = vmatprep.subr.mxu0 %v818_v61  ;;  %v854_v59 = vld [vmem:[#allocation5 + $0x3b8] sm:$0xff]  ;;  %v899_v60 = vld [vmem:[#allocation5 + $0x520] sm:$0xff]  ;;  %v956_v61 = vld [vmem:[#allocation5 + $0x6e8] sm:$0xff] }
 0x2d9   :  { %1142 = vmatprep.subr.mxu1 %v946_v62  ;;  %2344 = vmatpush3.msra.mxu0 %v770_v63  ;;  %v851_v62 = vld [vmem:[#allocation5 + $0x3a0] sm:$0xff]  ;;  %v896_v63 = vld [vmem:[#allocation5 + $0x508] sm:$0xff] }
 0x2da   :  { %1143 = vmatpush1.msra.mxu1 %v945_v0  ;;  %2345 = vmatprep.subr.mxu0 %v815_v1  ;;  %v953_v0 = vld [vmem:[#allocation5 + $0x6d0] sm:$0xff]  ;;  %v848_v1 = vld [vmem:[#allocation5 + $0x388] sm:$0xff] }
 0x2db   :  { %1144 = vmatprep.subr.mxu1 %v943_v2  ;;  %2346 = vmatpush3.msra.mxu0 %v767_v3  ;;  %v893_v2 = vld [vmem:[#allocation5 + $0x4f0] sm:$0xff]  ;;  %v950_v3 = vld [vmem:[#allocation5 + $0x6b8] sm:$0xff] }
 0x2dc   :  { %1145 = vmatpush1.msra.mxu1 %v942_v4  ;;  %2347 = vmatprep.subr.mxu0 %v812_v5  ;;  %v845_v4 = vld [vmem:[#allocation5 + $0x370] sm:$0xff]  ;;  %v890_v5 = vld [vmem:[#allocation5 + $0x4d8] sm:$0xff] }
 0x2dd   :  { %1146 = vmatprep.subr.mxu1 %v940_v7  ;;  %2348 = vmatpush3.msra.mxu0 %v764_v9  ;;  %v947_v7 = vld [vmem:[#allocation5 + $0x6a0] sm:$0xff]  ;;  %v842_v9 = vld [vmem:[#allocation5 + $0x358] sm:$0xff] }
 0x2de   :  { %1147 = vmatpush1.msra.mxu1 %v939_v10  ;;  %2349 = vmatprep.subr.mxu0 %v809_v11  ;;  %v887_v10 = vld [vmem:[#allocation5 + $0x4c0] sm:$0xff]  ;;  %v944_v11 = vld [vmem:[#allocation5 + $0x688] sm:$0xff] }
 0x2df   :  { %1148 = vmatprep.subr.mxu1 %v937_v12  ;;  %2350 = vmatpush3.msra.mxu0 %v761_v13  ;;  %v839_v12 = vld [vmem:[#allocation5 + $0x340] sm:$0xff]  ;;  %v884_v13 = vld [vmem:[#allocation5 + $0x4a8] sm:$0xff] }
 0x2e0   :  { %1149 = vmatpush1.msra.mxu1 %v936_v8  ;;  %2351 = vmatprep.subr.mxu0 %v806_v15  ;;  %v941_v8 = vld [vmem:[#allocation5 + $0x670] sm:$0xff]  ;;  %v836_v15 = vld [vmem:[#allocation5 + $0x328] sm:$0xff] }
 0x2e1   :  { %1150 = vmatprep.subr.mxu1 %v934_v16  ;;  %2352 = vmatpush3.msra.mxu0 %v758_v17  ;;  %v881_v16 = vld [vmem:[#allocation5 + $0x490] sm:$0xff]  ;;  %v938_v17 = vld [vmem:[#allocation5 + $0x658] sm:$0xff] }
 0x2e2   :  { %1151 = vmatpush1.msra.mxu1 %v933_v18  ;;  %2353 = vmatprep.subr.mxu0 %v803_v19  ;;  %v833_v18 = vld [vmem:[#allocation5 + $0x310] sm:$0xff]  ;;  %v935_v19 = vld [vmem:[#allocation5 + $0x640] sm:$0xff] }
 0x2e3   :  { %1152 = vmatprep.subr.mxu1 %v931_v20  ;;  %2354 = vmatpush3.msra.mxu0 %v755_v21  ;;  %v932_v20 = vld [vmem:[#allocation5 + $0x628] sm:$0xff]  ;;  %v929_v21 = vld [vmem:[#allocation5 + $0x610] sm:$0xff] }
 0x2e4   :  { %1153 = vmatpush1.msra.mxu1 %v930_v22  ;;  %2355 = vmatprep.subr.mxu0 %v800_v23 }
 0x2e5   :  { %1154 = vmatprep.subr.mxu1 %v928_v24  ;;  %2356 = vmatpush3.msra.mxu0 %v752_v25 }
 0x2e6   :  { %1155 = vmatpush1.msra.mxu1 %v927_v49  ;;  %2357 = vmatprep.subr.mxu0 %v797_v50 }
 0x2e7   :  { %2319 = vmatmul.mubr.msk.f32.vlgmr.msra.gmra.mxu1 %vm199_vm5, %v2992_v27  ;;  %2358 = vmatpush3.msra.mxu0 %v749_v56 }
 0x2e8   :  { %2370 = vmatprep.subr.mxu1 %v926_v28  ;;  %2359 = vmatprep.subr.mxu0 %v794_v29 }
 0x2e9   :  { %2371 = vmatpush3.msra.mxu1 %v878_v30  ;;  %1329 = vmatprep.mubr.f32.mxu1 %v2986_v41  ;;  %v866_v41 = vld [vmem:[#allocation5 + $0x418] sm:$0xff] }
 0x2ea   :  { %2360 = vmatpush3.msra.mxu0 %v746_v32  ;;  %2372 = vmatprep.subr.mxu1 %v923_v14 }
 0x2eb   :  { %2361 = vmatprep.subr.mxu0 %v791_v33  ;;  %2373 = vmatpush3.msra.mxu1 %v875_v34 }
 0x2ec   :  { %2362 = vmatpush3.msra.mxu0 %v743_v26  ;;  %2374 = vmatprep.subr.mxu1 %v920_v54 }
 0x2ed   :  { %2363 = vmatprep.subr.mxu0 %v788_v35  ;;  %2375 = vmatpush3.msra.mxu1 %v872_v36 }
 0x2ee   :  { %2364 = vmatpush3.msra.mxu0 %v740_v37  ;;  %2376 = vmatprep.subr.mxu1 %v917_v38  ;;  %v1531_v37 = vld [vmem:[%s3663_s5] sm:$0xff]  ;;  %v1532_v38 = vld [vmem:[%s3663_s5 + $0x8] sm:$0xff] }
 0x2ef   :  { %2365 = vmatprep.subr.mxu0 %v785_v39  ;;  %2377 = vmatpush3.msra.mxu1 %v869_v42 }
 0x2f0   :  { %2366 = vmatpush3.msra.mxu0 %v737_v43  ;;  %2378 = vmatprep.subr.mxu1 %v914_v44 }
 0x2f1   :  { %1260 = vmatmul.mubr.f32.vlgmr.msra.gmra.mxu0 %v2974_v31  ;;  %2379 = vmatpush3.msra.mxu1 %v866_v41  ;;  %v959_v31 = vld [vmem:[#allocation5 + $0x700] sm:$0xff] }
 0x2f2   :  { %2468 = vmatprep.subr.mxu0 %v2671_v6  ;;  %2380 = vmatprep.subr.mxu1 %v911_v45 }
 0x2f3   :  { %2469 = vmatpush3.msk.msra.mxu0 %vm972_vm1, %v968_v46  ;;  %2381 = vmatpush3.msra.mxu1 %v863_v47 }
 0x2f4   :  { %2470 = vmatprep.subr.mxu0 %v2671_v6  ;;  %2382 = vmatprep.subr.mxu1 %v908_v48 }
 0x2f5   :  { %2471 = vmatpush3.msra.mxu0 %v965_v51  ;;  %2383 = vmatpush3.msra.mxu1 %v860_v52 }
 0x2f6   :  { %2472 = vmatprep.subr.mxu0 %v2671_v6  ;;  %2384 = vmatprep.subr.mxu1 %v905_v53 }
 0x2f7   :  { %2473 = vmatpush3.msra.mxu0 %v962_v55  ;;  %2385 = vmatpush3.msra.mxu1 %v857_v57 }
 0x2f8   :  { %2474 = vmatprep.subr.mxu0 %v2671_v6  ;;  %2386 = vmatprep.subr.mxu1 %v902_v58 }
 0x2f9   :  { %2475 = vmatpush3.msra.mxu0 %v959_v31  ;;  %2387 = vmatpush3.msra.mxu1 %v854_v59 }
 0x2fa   :  { %2476 = vmatprep.subr.mxu0 %v2671_v6  ;;  %2388 = vmatprep.subr.mxu1 %v899_v60 }
 0x2fb   :  { %2477 = vmatpush3.msra.mxu0 %v956_v61  ;;  %2389 = vmatpush3.msra.mxu1 %v851_v62 }
 0x2fc   :  { %2478 = vmatprep.subr.mxu0 %v2671_v6  ;;  %2390 = vmatprep.subr.mxu1 %v896_v63 }
 0x2fd   :  { %2479 = vmatpush3.msra.mxu0 %v953_v0  ;;  %2391 = vmatpush3.msra.mxu1 %v848_v1 }
 0x2fe   :  { %2480 = vmatprep.subr.mxu0 %v2671_v6  ;;  %2392 = vmatprep.subr.mxu1 %v893_v2 }
 0x2ff   :  { %2481 = vmatpush3.msra.mxu0 %v950_v3  ;;  %2393 = vmatpush3.msra.mxu1 %v845_v4 }
 0x300   :  { %2482 = vmatprep.subr.mxu0 %v2671_v6  ;;  %2394 = vmatprep.subr.mxu1 %v890_v5 }
 0x301   :  { %2483 = vmatpush3.msra.mxu0 %v947_v7  ;;  %2395 = vmatpush3.msra.mxu1 %v842_v9 }
 0x302   :  { %2484 = vmatprep.subr.mxu0 %v2671_v6  ;;  %2396 = vmatprep.subr.mxu1 %v887_v10 }
 0x303   :  { %2485 = vmatpush3.msra.mxu0 %v944_v11  ;;  %2397 = vmatpush3.msra.mxu1 %v839_v12 }
 0x304   :  { %2486 = vmatprep.subr.mxu0 %v2671_v6  ;;  %2398 = vmatprep.subr.mxu1 %v884_v13 }
 0x305   :  { %2487 = vmatpush3.msra.mxu0 %v941_v8  ;;  %2399 = vmatpush3.msra.mxu1 %v836_v15 }
 0x306   :  { %2488 = vmatprep.subr.mxu0 %v2671_v6  ;;  %2400 = vmatprep.subr.mxu1 %v881_v16 }
 0x307   :  { %2489 = vmatpush3.msra.mxu0 %v938_v17  ;;  %2401 = vmatpush3.msra.mxu1 %v833_v18 }
 0x308   :  { %2490 = vmatprep.subr.mxu0 %v2671_v6  ;;  %1330 = vmatmul.mubr.f32.vlgmr.msra.gmra.mxu1 %v2984_v40 }
 0x309   :  { %2491 = vmatpush3.msra.mxu0 %v935_v19  ;;  %2496 = vmatprep.mubr.msk.f32.mxu0 %vm2672_vm0, %v2671_v6  ;;  %vm1504_vm0 = vcmask 867328  }
 0x30a   :  { %2492 = vmatprep.subr.mxu0 %v2671_v6  ;;  %1614 = vmatprep.mubr.f32.mxu1 %v2671_v6 }
 0x30b   :  { %2493 = vmatpush3.msra.mxu0 %v932_v20 }
 0x30c   :  { %2494 = vmatprep.subr.mxu0 %v2671_v6 }
 0x30d   :  { %2495 = vmatpush3.msra.mxu0 %v929_v21  ;;  %v1511_v21 = vld [vmem:[%s3662_s4] sm:$0xff] }
 0x30e   :  { %2497 = vmatmul.mubr.msk.f32.vlgmr.msra.gmra.mxu0 %vm199_vm5, %v2992_v27  ;;  %1751 = vmatprep.subr.mxu0 %v2671_v6  ;;  %vm1440_vm5 = vcmask 965632  }
 0x38a   :  { %v1048_v40 = vpop.f32.mrf.mxu1 }
 0x38c   :  { %v1050_v23 = vpop.f32.mrf.mxu1 }
 0x390   :  { %v1119_v22 = vpop.f32.mrf.mxu0 }
 0x391   :  { %v1120_v24 = vadd.f32 %v1119_v22, %v1048_v40  ;;  %v1512_v40 = vld [vmem:[%s3662_s4 + $0x8] sm:$0xff]  ;;  %s2682_s4 = smov 16  }
 0x392   :  { %v1121_v50 = vpop.f32.mrf.mxu0 }
 0x393   :  { %v1122_v27 = vadd.f32 %v1121_v50, %v1050_v23 }
 0x3a7   :  { %v1190_v25 = vpop.f32.mrf.mxu1 }
 0x3a8   :  { %v3020_v49 = vadd.f32 %v1190_v25, %v1120_v24 }
 0x3a9   :  { %v1192_v56 = vpop.f32.mrf.mxu1 }
 0x3aa   :  { %1485 = vrot.lane.b32.xlu0 %v3020_v49, %s2674_s1  ;;  %1498 = vrot.lane.b32.xlu1 %v3020_v49, %s2675_s22  ;;  %v3033_v28 = vadd.f32 %v1192_v56, %v1122_v27 }
 0x3ae   :  { %1460 = vrot.lane.b32.xlu0 %v3020_v49, %s2676_s23  ;;  %1473 = vrot.lane.b32.xlu1 %v3020_v49, %s2667_s12 }
 0x3b1   :  { %v2367_v29 = vpop.f32.mrf.mxu0 }
 0x3b2   :  { %1434 = vrot.lane.b32.xlu0 %v3020_v49, %s2677_s24  ;;  %1447 = vrot.lane.b32.xlu1 %v3020_v49, %s2678_s25 }
 0x3b3   :  { %v2368_v30 = vpop.f32.mrf.mxu0 }
 0x3b4   :  { %v2369_v33 = vadd.f32 %v2368_v30, %v2367_v29 }
 0x3b6   :  { %1422 = vrot.lane.b32.xlu1 %v3020_v49, %s2668_s13  ;;  %1487 = vrot.lane.b32.xlu0 %v3033_v28, %s2674_s1 }
 0x3ba   :  { %1462 = vrot.lane.b32.xlu0 %v3033_v28, %s2676_s23  ;;  %1500 = vrot.lane.b32.xlu1 %v3033_v28, %s2675_s22 }
 0x3be   :  { %1436 = vrot.lane.b32.xlu0 %v3033_v28, %s2677_s24  ;;  %1475 = vrot.lane.b32.xlu1 %v3033_v28, %s2667_s12 }
 0x3c2   :  { %1412 = vrot.lane.b32.xlu0 %v3033_v28, %s2670_s15  ;;  %1449 = vrot.lane.b32.xlu1 %v3033_v28, %s2678_s25 }
 0x3c6   :  { %1424 = vrot.lane.b32.xlu1 %v3033_v28, %s2668_s13 }
 0x3c8   :  { %v2402_v32 = vpop.f32.mrf.mxu1 }
 0x3ca   :  { %v2403_v14 = vpop.f32.mrf.mxu1 }
 0x3cb   :  { %v2404_v34 = vadd.f32 %v2403_v14, %v2402_v32 }
 0x3cd   :  { %v1332_v26 = vadd.f32 %v2404_v34, %v2369_v33 }
 0x3ce   :  { %v1401_v54 = vpop.f32.mrf.mxu0 }
 0x3cf   :  { %v1402_v35 = vadd.f32 %v1401_v54, %v1332_v26 }
 0x3d0   :  { %v2498_v36 = vpop.f32.mrf.mxu0 }
 0x3d1   :  { %1502 = vrot.lane.b32.xlu0 %v1402_v35, %s2675_s22  ;;  %1489 = vrot.lane.b32.xlu1 %v1402_v35, %s2674_s1 }
 0x3d5   :  { %1477 = vrot.lane.b32.xlu0 %v1402_v35, %s2667_s12  ;;  %1464 = vrot.lane.b32.xlu1 %v1402_v35, %s2676_s23  ;;  %s2686_s12 = smov 80  }
 0x3d9   :  { %1451 = vrot.lane.b32.xlu0 %v1402_v35, %s2678_s25  ;;  %1438 = vrot.lane.b32.xlu1 %v1402_v35, %s2677_s24 }
 0x3dd   :  { %1426 = vrot.lane.b32.xlu0 %v1402_v35, %s2668_s13  ;;  %1414 = vrot.lane.b32.xlu1 %v1402_v35, %s2670_s15 }
 0x3e1   :  { %1410 = vrot.lane.b32.xlu0 %v3020_v49, %s2670_s15  ;;  %1535 = vperm.xlu1 %2543, %v1531_v37  }
 0x3e5   :  { %1540 = vperm.xlu0 %2527, %v1532_v38  }
 0x41c   :  { %v1486_v39 = vpop.permute.xlu0 %1485  ;;  %v1499_v42 = vpop.permute.xlu1 %1498 }
 0x420   :  { %v1474_v43 = vpop.permute.xlu1 %1473  ;;  %v1461_v44 = vpop.permute.xlu0 %1460 }
 0x424   :  { %v1448_v41 = vpop.permute.xlu1 %1447  ;;  %v1435_v45 = vpop.permute.xlu0 %1434 }
 0x428   :  { %v1423_v46 = vpop.permute.xlu1 %1422  ;;  %v1488_v47 = vpop.permute.xlu0 %1487 }
 0x429   :  { %v1492_v63 = vsel %vm1491_vm2, %v1486_v39, %v1488_v47 }
 0x42c   :  { %v1501_v48 = vpop.permute.xlu1 %1500  ;;  %v1463_v51 = vpop.permute.xlu0 %1462 }
 0x42d   :  { %v1505_v61 = vsel %vm1504_vm0, %v1499_v42, %v1501_v48  ;;  %v1467_v5 = vsel %vm1466_vm3, %v1461_v44, %v1463_v51 }
 0x430   :  { %v1476_v52 = vpop.permute.xlu1 %1475  ;;  %v1437_v53 = vpop.permute.xlu0 %1436 }
 0x431   :  { %v1479_v3 = vsel %vm236_vm6, %v1474_v43, %v1476_v52  ;;  %v1441_v13 = vsel %vm1440_vm5, %v1435_v45, %v1437_v53 }
 0x434   :  { %v1450_v55 = vpop.permute.xlu1 %1449  ;;  %v1413_v57 = vpop.permute.xlu0 %1412 }
 0x435   :  { %v1454_v11 = vsel %vm1453_vm4, %v1448_v41, %v1450_v55 }
 0x438   :  { %v1425_v58 = vpop.permute.xlu1 %1424 }
 0x439   :  { %v1428_v17 = vsel %vm125_vm7, %v1423_v46, %v1425_v58 }
 0x443   :  { %v1503_v31 = vpop.permute.xlu0 %1502  ;;  %v1490_v59 = vpop.permute.xlu1 %1489 }
 0x444   :  { %v1506_v60 = vsel %vm1504_vm0, %v1501_v48, %v1503_v31  ;;  %v1493_v62 = vsel %vm1491_vm2, %v1488_v47, %v1490_v59  ;;  %vm1880_vm0 = vcmask 910080   ;;  %vm1887_vm2 = vcmask 1041280  }
 0x445   :  { %1564 = vmatprep.subr.mxu1 %v1506_v60 }
 0x446   :  { %1565 = vmatpush1.msra.mxu1 %v1505_v61  ;;  %v1726_v61 = vld [vmem:[%s3664_s6 + $0x78] sm:$0xff] }
 0x447   :  { %v1478_v0 = vpop.permute.xlu0 %1477  ;;  %1566 = vmatprep.subr.mxu1 %v1493_v62  ;;  %v1465_v1 = vpop.permute.xlu1 %1464  ;;  %v1725_v62 = vld [vmem:[%s3664_s6 + $0x70] sm:$0xff]  ;;  %1752 = vmatpush1.msra.mxu0 %v1726_v61 }
 0x448   :  { %1567 = vmatpush1.msra.mxu1 %v1492_v63  ;;  %v1480_v2 = vsel %vm236_vm6, %v1476_v52, %v1478_v0  ;;  %v1468_v4 = vsel %vm1466_vm3, %v1463_v51, %v1465_v1  ;;  %vm1543_vm6 = vcmask 588800   ;;  %1753 = vmatprep.subr.mxu0 %v2671_v6  ;;  %v1724_v1 = vld [vmem:[%s3664_s6 + $0x68] sm:$0xff]  ;;  %v2035_v61 = vld [vmem:[%s3665_s7 + $0xf0] sm:$0xff] }
 0x449   :  { %1568 = vmatprep.subr.mxu1 %v1480_v2  ;;  %1754 = vmatpush1.msra.mxu0 %v1725_v62  ;;  %v2034_v62 = vld [vmem:[%s3665_s7 + $0xe8] sm:$0xff] }
 0x44a   :  { %1569 = vmatpush1.msra.mxu1 %v1479_v3  ;;  %1755 = vmatprep.subr.mxu0 %v2671_v6 }
 0x44b   :  { %v1452_v7 = vpop.permute.xlu0 %1451  ;;  %1570 = vmatprep.subr.mxu1 %v1468_v4  ;;  %v1439_v9 = vpop.permute.xlu1 %1438  ;;  %v1723_v4 = vld [vmem:[%s3664_s6 + $0x60] sm:$0xff]  ;;  %1756 = vmatpush1.msra.mxu0 %v1724_v1 }
 0x44c   :  { %1571 = vmatpush1.msra.mxu1 %v1467_v5  ;;  %v1455_v10 = vsel %vm1453_vm4, %v1450_v55, %v1452_v7  ;;  %v1442_v12 = vsel %vm1440_vm5, %v1437_v53, %v1439_v9  ;;  %1757 = vmatprep.subr.mxu0 %v2671_v6  ;;  %v1722_v7 = vld [vmem:[%s3664_s6 + $0x58] sm:$0xff] }
 0x44d   :  { %1572 = vmatprep.subr.mxu1 %v1455_v10  ;;  %1758 = vmatpush1.msra.mxu0 %v1723_v4  ;;  %v2029_v4 = vld [vmem:[%s3665_s7 + $0xc0] sm:$0xff] }
 0x44e   :  { %1573 = vmatpush1.msra.mxu1 %v1454_v11  ;;  %1759 = vmatprep.subr.mxu0 %v2671_v6  ;;  %v1721_v11 = vld [vmem:[%s3664_s6 + $0x50] sm:$0xff] }
 0x44f   :  { %v1427_v8 = vpop.permute.xlu0 %1426  ;;  %1574 = vmatprep.subr.mxu1 %v1442_v12  ;;  %v1415_v15 = vpop.permute.xlu1 %1414  ;;  %1760 = vmatpush1.msra.mxu0 %v1722_v7  ;;  %v1720_v12 = vld [vmem:[%s3664_s6 + $0x48] sm:$0xff] }
 0x450   :  { %1575 = vmatpush1.msra.mxu1 %v1441_v13  ;;  %v1429_v16 = vsel %vm125_vm7, %v1425_v58, %v1427_v8  ;;  %v1417_v18 = vsel %vm88_vm9, %v1413_v57, %v1415_v15  ;;  %1761 = vmatprep.subr.mxu0 %v2671_v6  ;;  %v1719_v13 = vld [vmem:[%s3664_s6 + $0x40] sm:$0xff]  ;;  %v1718_v8 = vld [vmem:[%s3664_s6 + $0x38] sm:$0xff]  ;;  %v1717_v15 = vld [vmem:[%s3664_s6 + $0x30] sm:$0xff] }
 0x451   :  { %1576 = vmatprep.subr.mxu1 %v1429_v16  ;;  %1762 = vmatpush1.msra.mxu0 %v1721_v11  ;;  %v1716_v16 = vld [vmem:[%s3664_s6 + $0x28] sm:$0xff]  ;;  %v2027_v11 = vld [vmem:[%s3665_s7 + $0xb0] sm:$0xff] }
 0x452   :  { %1577 = vmatpush1.msra.mxu1 %v1428_v17  ;;  %1763 = vmatprep.subr.mxu0 %v2671_v6  ;;  %v1715_v17 = vld [vmem:[%s3664_s6 + $0x20] sm:$0xff] }
 0x453   :  { %v1411_v19 = vpop.permute.xlu0 %1410  ;;  %1578 = vmatprep.subr.mxu1 %v1417_v18  ;;  %1764 = vmatpush1.msra.mxu0 %v1720_v12  ;;  %v1714_v18 = vld [vmem:[%s3664_s6 + $0x18] sm:$0xff]  ;;  %v2026_v12 = vld [vmem:[%s3665_s7 + $0xa8] sm:$0xff] }
 0x454   :  { %v1416_v20 = vsel %vm88_vm9, %v1411_v19, %v1413_v57  ;;  %1765 = vmatprep.subr.mxu0 %v2671_v6  ;;  %v1713_v19 = vld [vmem:[%s3664_s6 + $0x10] sm:$0xff] }
 0x455   :  { %1579 = vmatpush1.msra.mxu1 %v1416_v20  ;;  %1766 = vmatpush1.msra.mxu0 %v1719_v13  ;;  %v1712_v20 = vld [vmem:[%s3664_s6 + $0x8] sm:$0xff]  ;;  %v2025_v13 = vld [vmem:[%s3665_s7 + $0xa0] sm:$0xff] }
 0x456   :  { %1580 = vmatprep.subr.mxu1 %v3033_v28  ;;  %1767 = vmatprep.subr.mxu0 %v2671_v6 }
 0x457   :  { %1581 = vmatpush1.msra.mxu1 %v3020_v49  ;;  %1768 = vmatpush1.msra.mxu0 %v1718_v8  ;;  %v2024_v8 = vld [vmem:[%s3665_s7 + $0x98] sm:$0xff] }
 0x458   :  { %2322 = vmatmul.mubr.msk.f32.vlgmr.msra.gmra.mxu1 %vm1543_vm6, %v1511_v21  ;;  %1769 = vmatprep.subr.mxu0 %v2671_v6  ;;  %v1711_v21 = vld [vmem:[%s3664_s6] sm:$0xff] }
 0x459   :  { %1620 = vmatprep.mubr.f32.mxu1 %v2671_v6  ;;  %1770 = vmatpush1.msra.mxu0 %v1717_v15 }
 0x45a   :  { %1771 = vmatprep.subr.mxu0 %v2671_v6 }
 0x45b   :  { %1772 = vmatpush1.msra.mxu0 %v1716_v16 }
 0x45c   :  { %2323 = vmatmul.mubr.msk.f32.gmra.mxu1 %vm1543_vm6, %v1512_v40  ;;  %v1536_v22 = vpop.permute.xlu1 %1535  ;;  %1773 = vmatprep.subr.mxu0 %v2671_v6  ;;  %v1741_v40 = vld [vmem:[%s3664_s6 + $0xf0] sm:$0x1f] }
 0x45d   :  { %1774 = vmatpush1.msra.mxu0 %v1715_v17 }
 0x45e   :  { %1775 = vmatprep.subr.mxu0 %v2671_v6 }
 0x45f   :  { %1776 = vmatpush1.msra.mxu0 %v1714_v18  ;;  %v2023_v18 = vld [vmem:[%s3665_s7 + $0x90] sm:$0xff] }
 0x460   :  { %v1541_v27 = vpop.permute.xlu0 %1540  ;;  %1777 = vmatprep.subr.mxu0 %v2671_v6 }
 0x461   :  { %1778 = vmatpush1.msra.mxu0 %v1713_v19  ;;  %v2022_v19 = vld [vmem:[%s3665_s7 + $0x88] sm:$0xff] }
 0x462   :  { %1779 = vmatprep.subr.mxu0 %v2671_v6 }
 0x463   :  { %1780 = vmatpush1.msra.mxu0 %v1712_v20  ;;  %v2021_v20 = vld [vmem:[%s3665_s7 + $0x80] sm:$0xff] }
 0x464   :  { %1781 = vmatprep.subr.mxu0 %v2671_v6 }
 0x465   :  { %1782 = vmatpush1.msra.mxu0 %v1711_v21 }
 0x466   :  { %1785 = vmatprep.subr.mxu0 %v2671_v6 }
 0x467   :  { %2324 = vmatpush2.msk.msra.mxu0 %vm972_vm1, %v1741_v40  ;;  %v2020_v40 = vld [vmem:[%s3665_s7 + $0x78] sm:$0xff]  ;;  %vm1874_vm1 = vcmask 778880  }
 0x468   :  { %1787 = vmatprep.subr.mxu0 %v2671_v6 }
 0x518   :  { %v1616_v23 = vpop.f32.mrf.mxu1 }
 0x519   :  { %v1617_v24 = vadd.f32 %v1616_v23, %v1536_v22  ;;  %v1739_v23 = vld [vmem:[%s3664_s6 + $0xe0] sm:$0xff] }
 0x51a   :  { %v1618_v25 = vpop.f32.mrf.mxu1 }
 0x51b   :  { %v1631_v50 = vmin.f32 %v1617_v24, 20.0  ;;  %v1619_v56 = vadd.f32 %v1618_v25, %v1536_v22  ;;  %vm1627_vm7 = vcmp.gt.f32.partialorder %v1617_v24, 20.0  ;;  %v1740_v22 = vld [vmem:[%s3664_s6 + $0xe8] sm:$0xff]  ;;  %v1737_v25 = vld [vmem:[%s3664_s6 + $0xd0] sm:$0xff] }
 0x51c   :  { %v1622_v29 = vpop.f32.mrf.mxu1  ;;  %1788 = vmatpush2.msra.mxu0 %v1740_v22 }
 0x51d   :  { %v1635_v30 = vmul.f32 1.442695, %v1631_v50  ;;  %v1632_v28 = vmin.f32 %v1619_v56, 20.0  ;;  %v1623_v32 = vadd.f32 %v1622_v29, %v1541_v27  ;;  %vm1628_vm8 = vcmp.gt.f32.partialorder %v1619_v56, 20.0  ;;  %1789 = vmatprep.subr.mxu0 %v2671_v6  ;;  %v1736_v50 = vld [vmem:[%s3664_s6 + $0xc8] sm:$0xff]  ;;  %v1733_v29 = vld [vmem:[%s3664_s6 + $0xb0] sm:$0xff] }
 0x51e   :  { %v1624_v49 = vpop.f32.mrf.mxu1  ;;  %1790 = vmatpush2.msra.mxu0 %v1739_v23 }
 0x51f   :  { %2580 = vpow2.f32 %v1635_v30  ;;  %v1637_v14 = vmul.f32 1.442695, %v1632_v28  ;;  %v1633_v33 = vmin.f32 %v1623_v32, 20.0  ;;  %v1625_v34 = vadd.f32 %v1624_v49, %v1541_v27  ;;  %1791 = vmatprep.subr.mxu0 %v2671_v6  ;;  %v1734_v27 = vld [vmem:[%s3664_s6 + $0xb8] sm:$0xff]  ;;  %v1732_v30 = vld [vmem:[%s3664_s6 + $0xa8] sm:$0xff]  ;;  %v1731_v28 = vld [vmem:[%s3664_s6 + $0xa0] sm:$0xff] }
 0x520   :  { %vm1629_vm10 = vcmp.gt.f32.partialorder %v1623_v32, 20.0  ;;  %v1729_v49 = vld [vmem:[%s3664_s6 + $0x90] sm:$0xff] }
 0x521   :  { %2582 = vpow2.f32 %v1637_v14  ;;  %v1639_v26 = vmul.f32 1.442695, %v1633_v33  ;;  %v1634_v54 = vmin.f32 %v1625_v34, 20.0  ;;  %vm1630_vm11 = vcmp.gt.f32.partialorder %v1625_v34, 20.0  ;;  %v1728_v14 = vld [vmem:[%s3664_s6 + $0x88] sm:$0xff]  ;;  %v1727_v33 = vld [vmem:[%s3664_s6 + $0x80] sm:$0xff] }
 0x523   :  { %2584 = vpow2.f32 %v1639_v26  ;;  %v1641_v35 = vmul.f32 1.442695, %v1634_v54 }
 0x525   :  { %2586 = vpow2.f32 %v1641_v35 }
 0x52c   :  { %v2581_v36 = vpop.eup %2580 }
 0x52d   :  { %v1643_v37 = vadd.f32 1.0, %v2581_v36 }
 0x52e   :  { %v2583_v38 = vpop.eup %2582 }
 0x52f   :  { %2588 = vlog2.f32 %v1643_v37  ;;  %v1644_v39 = vadd.f32 1.0, %v2583_v38 }
 0x530   :  { %v2585_v42 = vpop.eup %2584 }
 0x531   :  { %2590 = vlog2.f32 %v1644_v39  ;;  %v1645_v43 = vadd.f32 1.0, %v2585_v42 }
 0x532   :  { %v2587_v44 = vpop.eup %2586 }
 0x533   :  { %2592 = vlog2.f32 %v1645_v43  ;;  %v1646_v41 = vadd.f32 1.0, %v2587_v44 }
 0x535   :  { %2594 = vlog2.f32 %v1646_v41 }
 0x53c   :  { %v2589_v45 = vpop.eup %2588 }
 0x53d   :  { %v1648_v46 = vmul.f32 0.6931472, %v2589_v45 }
 0x53e   :  { %v2591_v47 = vpop.eup %2590 }
 0x53f   :  { %v1655_v48 = vsel %vm1627_vm7, %v1617_v24, %v1648_v46  ;;  %v1650_v51 = vmul.f32 0.6931472, %v2591_v47 }
 0x540   :  { %v2593_v52 = vpop.eup %2592  ;;  %2596 = vtanh.f32 %v1655_v48 }
 0x541   :  { %v1656_v53 = vsel %vm1628_vm8, %v1619_v56, %v1650_v51  ;;  %v1652_v55 = vmul.f32 0.6931472, %v2593_v52 }
 0x542   :  { %2598 = vtanh.f32 %v1656_v53  ;;  %v2595_v57 = vpop.eup %2594 }
 0x543   :  { %v1657_v58 = vsel %vm1629_vm10, %v1623_v32, %v1652_v55  ;;  %v1654_v31 = vmul.f32 0.6931472, %v2595_v57  ;;  %v2679_v55 = vmov 1983009808  }
 0x544   :  { %2600 = vtanh.f32 %v1657_v58  ;;  %v1830_v57 = vunpack.c.l.s4 %v2679_v55  ;;  %v1832_v58 = vlaneseq  ;;  %v2061_v55 = vld [vmem:[%s3665_s7 + $0x1c0] sm:$0xff] }
 0x545   :  { %v1658_v59 = vsel %vm1630_vm11, %v1625_v34, %v1654_v31  ;;  %v2036_v31 = vld [vmem:[%s3665_s7 + $0xf8] sm:$0xff] }
 0x546   :  { %2602 = vtanh.f32 %v1658_v59  ;;  %2092 = vmatprep.subr.mxu1 %v2036_v31  ;;  %v1831_v59 = vunpack.c.0.s8 %v1830_v57  ;;  %v2060_v57 = vld [vmem:[%s3665_s7 + $0x1b8] sm:$0xff] }
 0x547   :  { %2093 = vmatpush1.msra.mxu1 %v2035_v61  ;;  %v2058_v61 = vld [vmem:[%s3665_s7 + $0x1a8] sm:$0xff] }
 0x548   :  { %2094 = vmatprep.subr.mxu1 %v2034_v62  ;;  %v2057_v62 = vld [vmem:[%s3665_s7 + $0x1a0] sm:$0xff] }
 0x54d   :  { %v2597_v60 = vpop.eup %2596 }
 0x54e   :  { %v3092_v63 = vmul.f32 %v2597_v60, %v1617_v24  ;;  %v1738_v24 = vld [vmem:[%s3664_s6 + $0xd8] sm:$0xff]  ;;  %v3243_v60 = vshrl.u32 %v1832_v58, 7 }
 0x54f   :  { %v2599_v0 = vpop.eup %2598  ;;  %1792 = vmatpush2.msra.mxu0 %v1738_v24  ;;  %v2019_v24 = vld [vmem:[%s3665_s7 + $0x70] sm:$0xff] }
 0x550   :  { %1671 = vrot.lane.b32.xlu1 %v3092_v63, %s2677_s24  ;;  %v3100_v2 = vmul.f32 %v2599_v0, %v1619_v56  ;;  %1793 = vmatprep.subr.mxu0 %v2671_v6  ;;  %v1735_v56 = vld [vmem:[%s3664_s6 + $0xc0] sm:$0xff]  ;;  %v2032_v0 = vld [vmem:[%s3665_s7 + $0xd8] sm:$0xff]  ;;  %v3258_v1 = vsub.s32 %v1831_v59, %v3243_v60  ;;  %v2059_v59 = vld [vmem:[%s3665_s7 + $0x1b0] sm:$0xff] }
 0x551   :  { %v2601_v3 = vpop.eup %2600  ;;  %1794 = vmatpush2.msra.mxu0 %v1737_v25  ;;  %v2018_v25 = vld [vmem:[%s3665_s7 + $0x68] sm:$0xff] }
 0x552   :  { %1673 = vrot.lane.b32.xlu0 %v3100_v2, %s2677_s24  ;;  %v3108_v5 = vmul.f32 %v2601_v3, %v1623_v32  ;;  %1795 = vmatprep.subr.mxu0 %v2671_v6  ;;  %v1730_v32 = vld [vmem:[%s3664_s6 + $0x98] sm:$0xff]  ;;  %v2030_v3 = vld [vmem:[%s3665_s7 + $0xc8] sm:$0xff]  ;;  %s2685_s6 = smov 96  }
 0x553   :  { %v2603_v9 = vpop.eup %2602  ;;  %1796 = vmatpush2.msra.mxu0 %v1736_v50  ;;  %v2017_v50 = vld [vmem:[%s3665_s7 + $0x60] sm:$0xff] }
 0x554   :  { %1675 = vrot.lane.b32.xlu1 %v3108_v5, %s2677_s24  ;;  %v3116_v10 = vmul.f32 %v2603_v9, %v1625_v34  ;;  %1797 = vmatprep.subr.mxu0 %v2671_v6 }
 0x555   :  { %1798 = vmatpush2.msra.mxu0 %v1735_v56  ;;  %v2016_v56 = vld [vmem:[%s3665_s7 + $0x58] sm:$0xff] }
 0x556   :  { %1677 = vrot.lane.b32.xlu0 %v3116_v10, %s2677_s24  ;;  %1799 = vmatprep.subr.mxu0 %v2671_v6  ;;  %s2636_s24 = scalar_lea.vmem %s2301_s28, 32 }
 0x557   :  { %1800 = vmatpush2.msra.mxu0 %v1734_v27  ;;  %p2637_p5 = scmp.ne.s32.totalorder %s2301_s28, %s2636_s24  ;;  %p2642_p7 = scmp.lt.s32.totalorder %s2636_s24, %s2636_s24 }
 0x558   :  { %1801 = vmatprep.subr.mxu0 %v2671_v6 }
 0x559   :  { %1802 = vmatpush2.msra.mxu0 %v1733_v29  ;;  %p2643_p8 = por %p2642_p7, %p2641_p6 }
 0x55a   :  { %1803 = vmatprep.subr.mxu0 %v2671_v6 }
 0x55b   :  { %1804 = vmatpush2.msra.mxu0 %v1732_v30  ;;  %v2015_v30 = vld [vmem:[%s3665_s7 + $0x50] sm:$0xff]  ;;  %p2644_p9 = pnand %p2643_p8, %p2637_p5 }
 0x55c   :  { %1805 = vmatprep.subr.mxu0 %v2671_v6 }
 0x55d   :  { %1806 = vmatpush2.msra.mxu0 %v1731_v28  ;;  %v2014_v28 = vld [vmem:[%s3665_s7 + $0x48] sm:$0xff] }
 0x55e   :  { %1807 = vmatprep.subr.mxu0 %v2671_v6 }
 0x55f   :  { %1808 = vmatpush2.msra.mxu0 %v1730_v32  ;;  %v2013_v32 = vld [vmem:[%s3665_s7 + $0x40] sm:$0xff] }
 0x560   :  { %1809 = vmatprep.subr.mxu0 %v2671_v6 }
 0x561   :  { %1810 = vmatpush2.msra.mxu0 %v1729_v49  ;;  %v2012_v49 = vld [vmem:[%s3665_s7 + $0x38] sm:$0xff] }
 0x562   :  { %1811 = vmatprep.subr.mxu0 %v2671_v6 }
 0x563   :  { %1812 = vmatpush2.msra.mxu0 %v1728_v14 }
 0x564   :  { %1813 = vmatprep.subr.mxu0 %v2671_v6 }
 0x565   :  { %1814 = vmatpush2.msra.mxu0 %v1727_v33 }
 0x5c2   :  { %v1672_v34 = vpop.permute.xlu1 %1671 }
 0x5c4   :  { %v1674_v26 = vpop.permute.xlu0 %1673 }
 0x5c5   :  { %v1679_v54 = vsel %vm1440_vm5, %v1672_v34, %v1674_v26  ;;  %v1686_v35 = vmax.f32 %v3100_v2, %v1674_v26  ;;  %v2031_v2 = vld [vmem:[%s3665_s7 + $0xd0] sm:$0xff]  ;;  %v2010_v26 = vld [vmem:[%s3665_s7 + $0x28] sm:$0xff] }
 0x5c6   :  { %v1685_v36 = vmax.f32 %v3092_v63, %v1679_v54  ;;  %v1676_v37 = vpop.permute.xlu1 %1675  ;;  %v2033_v63 = vld [vmem:[%s3665_s7 + $0xe0] sm:$0xff]  ;;  %v2011_v34 = vld [vmem:[%s3665_s7 + $0x30] sm:$0xff] }
 0x5c7   :  { %1695 = vrot.lane.b32.xlu0 %v1686_v35, %s2670_s15  ;;  %2095 = vmatpush1.msra.mxu1 %v2033_v63  ;;  %v2009_v54 = vld [vmem:[%s3665_s7 + $0x20] sm:$0xff]  ;;  %v2056_v63 = vld [vmem:[%s3665_s7 + $0x198] sm:$0xff] }
 0x5c8   :  { %1693 = vrot.lane.b32.xlu1 %v1685_v36, %s2670_s15  ;;  %v1678_v38 = vpop.permute.xlu0 %1677  ;;  %2096 = vmatprep.subr.mxu1 %v2032_v0 }
 0x5c9   :  { %v1680_v39 = vsel %vm1440_vm5, %v1676_v37, %v1678_v38  ;;  %v1688_v42 = vmax.f32 %v3116_v10, %v1678_v38  ;;  %2097 = vmatpush1.msra.mxu1 %v2031_v2  ;;  %v2007_v38 = vld [vmem:[%s3665_s7 + $0x10] sm:$0xff]  ;;  %vm2292_vm5 = vcmask 74752  }
 0x5ca   :  { %v1687_v6 = vmax.f32 %v3108_v5, %v1680_v39  ;;  %v2028_v5 = vld [vmem:[%s3665_s7 + $0xb8] sm:$0xff]  ;;  %2098 = vmatprep.subr.mxu1 %v2030_v3  ;;  %v2006_v39 = vld [vmem:[%s3665_s7 + $0x8] sm:$0xff]  ;;  %v2055_v2 = vld [vmem:[%s3665_s7 + $0x190] sm:$0xff] }
 0x5cb   :  { %1699 = vrot.lane.b32.xlu0 %v1688_v42, %s2670_s15  ;;  %2099 = vmatpush1.msra.mxu1 %v2029_v4  ;;  %v2054_v3 = vld [vmem:[%s3665_s7 + $0x188] sm:$0xff]  ;;  %v2053_v4 = vld [vmem:[%s3665_s7 + $0x180] sm:$0xff] }
 0x5cc   :  { %1697 = vrot.lane.b32.xlu1 %v1687_v6, %s2670_s15  ;;  %2100 = vmatprep.subr.mxu1 %v2028_v5  ;;  %v2052_v5 = vld [vmem:[%s3665_s7 + $0x178] sm:$0xff] }
 0x5cd   :  { %2101 = vmatpush1.msra.mxu1 %v2027_v11  ;;  %v2050_v11 = vld [vmem:[%s3665_s7 + $0x168] sm:$0xff] }
 0x5ce   :  { %2102 = vmatprep.subr.mxu1 %v2026_v12  ;;  %v2049_v12 = vld [vmem:[%s3665_s7 + $0x160] sm:$0xff] }
 0x5cf   :  { %2103 = vmatpush1.msra.mxu1 %v2025_v13  ;;  %v2048_v13 = vld [vmem:[%s3665_s7 + $0x158] sm:$0xff] }
 0x5d0   :  { %2104 = vmatprep.subr.mxu1 %v2024_v8 }
 0x5d1   :  { %2105 = vmatpush1.msra.mxu1 %v2023_v18  ;;  %v2045_v18 = vld [vmem:[%s3665_s7 + $0x140] sm:$0xff] }
 0x5d2   :  { %2106 = vmatprep.subr.mxu1 %v2022_v19  ;;  %v2044_v19 = vld [vmem:[%s3665_s7 + $0x138] sm:$0xff] }
 0x5d3   :  { %2107 = vmatpush1.msra.mxu1 %v2021_v20  ;;  %v2043_v20 = vld [vmem:[%s3665_s7 + $0x130] sm:$0xff] }
 0x5d4   :  { %2108 = vmatprep.subr.mxu1 %v2020_v40  ;;  %v2042_v40 = vld [vmem:[%s3665_s7 + $0x128] sm:$0xff] }
 0x5d5   :  { %2109 = vmatpush1.msra.mxu1 %v2019_v24  ;;  %v2040_v24 = vld [vmem:[%s3665_s7 + $0x118] sm:$0xff] }
 0x5d6   :  { %2110 = vmatprep.subr.mxu1 %v2018_v25  ;;  %v2039_v25 = vld [vmem:[%s3665_s7 + $0x110] sm:$0xff] }
 0x5d7   :  { %2111 = vmatpush1.msra.mxu1 %v2017_v50  ;;  %v2038_v50 = vld [vmem:[%s3665_s7 + $0x108] sm:$0xff] }
 0x5d8   :  { %2112 = vmatprep.subr.mxu1 %v2016_v56 }
 0x5d9   :  { %2113 = vmatpush1.msra.mxu1 %v2015_v30 }
 0x5da   :  { %2114 = vmatprep.subr.mxu1 %v2014_v28 }
 0x5db   :  { %2115 = vmatpush1.msra.mxu1 %v2013_v32 }
 0x5dc   :  { %2116 = vmatprep.subr.mxu1 %v2012_v49 }
 0x5dd   :  { %2117 = vmatpush1.msra.mxu1 %v2011_v34 }
 0x5de   :  { %2118 = vmatprep.subr.mxu1 %v2010_v26 }
 0x5df   :  { %2119 = vmatpush1.msra.mxu1 %v2009_v54 }
 0x639   :  { %v1696_v43 = vpop.permute.xlu0 %1695 }
 0x63a   :  { %v1708_v44 = vmax.f32 %v1686_v35, %v1696_v43  ;;  %v1694_v41 = vpop.permute.xlu1 %1693  ;;  %v2008_v35 = vld [vmem:[%s3665_s7 + $0x18] sm:$0xff] }
 0x63b   :  { %v1701_v45 = vsel %vm88_vm9, %v1694_v41, %v1696_v43  ;;  %2120 = vmatprep.subr.mxu1 %v2008_v35  ;;  %v2067_v41 = vld [vmem:[%s3665_s7 + $0x1f0] sm:$0xff] }
 0x63c   :  { %v1707_v46 = vmax.f32 %v1685_v36, %v1701_v45  ;;  %2325 = vmatprep.mubr.msk.f32.mxu0 %vm1453_vm4, %v1708_v44  ;;  %2121 = vmatpush1.msra.mxu1 %v2007_v38  ;;  %v2066_v45 = vld [vmem:[%s3665_s7 + $0x1e8] sm:$0xff] }
 0x63d   :  { %v1700_v47 = vpop.permute.xlu0 %1699  ;;  %2122 = vmatprep.subr.mxu1 %v2006_v39 }
 0x63e   :  { %1816 = vmatmul.mubr.f32.vlgmr.msra.gmra.mxu0 %v1707_v46  ;;  %v1710_v48 = vmax.f32 %v1688_v42, %v1700_v47  ;;  %v1698_v51 = vpop.permute.xlu1 %1697  ;;  %v2005_v42 = vld [vmem:[%s3665_s7] sm:$0xff] }
 0x63f   :  { %v1702_v52 = vsel %vm88_vm9, %v1698_v51, %v1700_v47  ;;  %vm1826_vm9 = vcmask 122880   ;;  %2123 = vmatpush1.msra.mxu1 %v2005_v42  ;;  %v2065_v46 = vld [vmem:[%s3665_s7 + $0x1e0] sm:$0xff]  ;;  %v2064_v47 = vld [vmem:[%s3665_s7 + $0x1d8] sm:$0xff] }
 0x640   :  { %v1709_v53 = vmax.f32 %v1687_v6, %v1702_v52  ;;  %2326 = vmatprep.mubr.msk.f32.mxu0 %vm1453_vm4, %v1710_v48  ;;  %v2068_v6 = vld [vmem:[%s3665_s7 + $0x1f8] sm:$0xff]  ;;  %v2063_v52 = vld [vmem:[%s3665_s7 + $0x1d0] sm:$0xff] }
 0x641   :  { %2124 = vmatprep.subr.mxu1 %v2068_v6 }
 0x642   :  { %1821 = vmatmul.mubr.f32.gmra.mxu0 %v1709_v53  ;;  %2125 = vmatpush2.msra.mxu1 %v2067_v41  ;;  %v2062_v53 = vld [vmem:[%s3665_s7 + $0x1c8] sm:$0xff] }
 0x643   :  { %2126 = vmatprep.subr.mxu1 %v2066_v45 }
 0x644   :  { %2127 = vmatpush2.msra.mxu1 %v2065_v46 }
 0x645   :  { %2128 = vmatprep.subr.mxu1 %v2064_v47 }
 0x646   :  { %2129 = vmatpush2.msra.mxu1 %v2063_v52 }
 0x647   :  { %2130 = vmatprep.subr.mxu1 %v2062_v53 }
 0x648   :  { %2131 = vmatpush2.msra.mxu1 %v2061_v55 }
 0x649   :  { %2132 = vmatprep.subr.mxu1 %v2060_v57 }
 0x64a   :  { %2133 = vmatpush2.msra.mxu1 %v2059_v59  ;;  %v2198_v59 = vld [vmem:[%s3667_s9 + $0x78] sm:$0xff] }
 0x64b   :  { %2134 = vmatprep.subr.mxu1 %v2058_v61  ;;  %v2213_v61 = vld [vmem:[%s3667_s9 + $0xf0] sm:$0xff] }
 0x64c   :  { %2135 = vmatpush2.msra.mxu1 %v2057_v62  ;;  %v2197_v62 = vld [vmem:[%s3667_s9 + $0x70] sm:$0xff] }
 0x64d   :  { %2136 = vmatprep.subr.mxu1 %v2056_v63  ;;  %v2212_v63 = vld [vmem:[%s3667_s9 + $0xe8] sm:$0xff] }
 0x64e   :  { %2137 = vmatpush2.msra.mxu1 %v2055_v2  ;;  %v2195_v2 = vld [vmem:[%s3667_s9 + $0x60] sm:$0xff] }
 0x64f   :  { %2138 = vmatprep.subr.mxu1 %v2054_v3  ;;  %v2210_v3 = vld [vmem:[%s3667_s9 + $0xd8] sm:$0xff] }
 0x650   :  { %2139 = vmatpush2.msra.mxu1 %v2053_v4  ;;  %v2194_v4 = vld [vmem:[%s3667_s9 + $0x58] sm:$0xff] }
 0x651   :  { %2140 = vmatprep.subr.mxu1 %v2052_v5  ;;  %v2209_v5 = vld [vmem:[%s3667_s9 + $0xd0] sm:$0xff] }
 0x6fe   :  { %v1817_v7 = vpop.f32.mrf.mxu0 }
 0x6ff   :  { %1827 = vst.msk [vmem:[#allocation4] sm:$0x1] %vm1826_vm9, %v1817_v7  ;;  %v3274_v9 = vrot.slane %v1817_v7, %v3258_v1  ;;  %v1856_v22 = vcombine.high %v1817_v7, %v1817_v7 }
 0x700   :  { %v1819_v10 = vpop.f32.mrf.mxu0 }
 0x701   :  { %1944 = vrot.lane.b32.xlu1 %v3274_v9, %s2680_s20  ;;  %v3292_v16 = vcombine.high %v3274_v9, %v3274_v9  ;;  %v3335_v27 = vrot.slane %v1856_v22, %v3258_v1  ;;  %v1836_v14 = vrot.slane %v3274_v9, 7  ;;  %v2051_v10 = vld [vmem:[%s3665_s7 + $0x170] sm:$0xff] }
 0x702   :  { %v1822_v15 = vpop.f32.mrf.mxu0  ;;  %2141 = vmatpush2.msra.mxu1 %v2051_v10  ;;  %v2192_v10 = vld [vmem:[%s3667_s9 + $0x48] sm:$0xff] }
 0x703   :  { %1889 = vst.msk [vmem:[#allocation4 + $0x2] sm:$0x1] %vm1826_vm9, %v1822_v15  ;;  %v3296_v17 = vrot.slane %v1822_v15, %v3258_v1  ;;  %v1915_v29 = vcombine.high %v1822_v15, %v1822_v15  ;;  %v3373_v36 = vrot.slane %v1836_v14, 2  ;;  %v3394_v43 = vcombine.high %v3335_v27, %v3335_v27  ;;  %2142 = vmatprep.subr.mxu1 %v2050_v11  ;;  %v2207_v11 = vld [vmem:[%s3667_s9 + $0xc0] sm:$0xff] }
 0x704   :  { %v1824_v21 = vpop.f32.mrf.mxu0  ;;  %v1849_v48 = vrot.slane %v3292_v16, 7  ;;  %v1869_v0 = vrot.slane %v3335_v27, 7  ;;  %2143 = vmatpush2.msra.mxu1 %v2049_v12  ;;  %v2191_v12 = vld [vmem:[%s3667_s9 + $0x40] sm:$0xff] }
 0x705   :  { %1844 = vrot.lane.b32.xlu1 %v3292_v16, %s2681_s3  ;;  %1974 = vrot.lane.b32.xlu0 %v3296_v17, %s2680_s20  ;;  %v3316_v23 = vcombine.high %v3296_v17, %v3296_v17  ;;  %v3355_v33 = vrot.slane %v1915_v29, %v3258_v1  ;;  %v1898_v37 = vrot.slane %v3296_v17, 7  ;;  %v1882_v8 = vrot.slane %v3394_v43, 7  ;;  %v2046_v17 = vld [vmem:[%s3665_s7 + $0x148] sm:$0xff] }
 0x706   :  { %v1850_v58 = vrot.slane %v1849_v48, 2  ;;  %v1870_v7 = vrot.slane %v1869_v0, 2  ;;  %2144 = vmatprep.subr.mxu1 %v2048_v13  ;;  %v2196_v0 = vld [vmem:[%s3667_s9 + $0x68] sm:$0xff]  ;;  %v2206_v13 = vld [vmem:[%s3667_s9 + $0xb8] sm:$0xff] }
 0x707   :  { %v3396_v44 = vrot.slane %v1898_v37, 2  ;;  %v3417_v51 = vcombine.high %v3355_v33, %v3355_v33  ;;  %v1909_v31 = vrot.slane %v3316_v23, 7  ;;  %v1927_v9 = vrot.slane %v3355_v33, 7 }
 0x708   :  { %v1883_v21 = vrot.slane %v1882_v8, 2  ;;  %v2190_v8 = vld [vmem:[%s3667_s9 + $0x38] sm:$0xff] }
 0x709   :  { %1950 = vrot.lane.b32.xlu1 %v3292_v16, %s2682_s4  ;;  %1905 = vrot.lane.b32.xlu0 %v3316_v23, %s2681_s3  ;;  %v1910_v1 = vrot.slane %v1909_v31, 2  ;;  %v1928_v15 = vrot.slane %v1927_v9, 2  ;;  %v2047_v16 = vld [vmem:[%s3665_s7 + $0x150] sm:$0xff]  ;;  %v1938_v22 = vrot.slane %v3417_v51, 7  ;;  %v2214_v31 = vld [vmem:[%s3667_s9 + $0xf8] sm:$0xff] }
 0x70a   :  { %2145 = vmatpush2.msra.mxu1 %v2047_v16  ;;  %2420 = vmatprep.subr.mxu0 %v2214_v31  ;;  %v2208_v9 = vld [vmem:[%s3667_s9 + $0xc8] sm:$0xff]  ;;  %v2189_v16 = vld [vmem:[%s3667_s9 + $0x30] sm:$0xff] }
 0x70b   :  { %2146 = vmatprep.subr.mxu1 %v2046_v17  ;;  %v1939_v56 = vrot.slane %v1938_v22, 2  ;;  %2421 = vmatpush3.msra.mxu0 %v2198_v59  ;;  %v2204_v17 = vld [vmem:[%s3667_s9 + $0xa8] sm:$0xff]  ;;  %v2201_v22 = vld [vmem:[%s3667_s9 + $0x90] sm:$0xff] }
 0x70c   :  { %2147 = vmatpush2.msra.mxu1 %v2045_v18  ;;  %2422 = vmatprep.subr.mxu0 %v2213_v61  ;;  %v2188_v18 = vld [vmem:[%s3667_s9 + $0x28] sm:$0xff] }
 0x70d   :  { %1864 = vrot.lane.b32.xlu1 %v3335_v27, %s2683_s21  ;;  %1980 = vrot.lane.b32.xlu0 %v3316_v23, %s2682_s4  ;;  %v2041_v23 = vld [vmem:[%s3665_s7 + $0x120] sm:$0xff] }
 0x70e   :  { %2148 = vmatprep.subr.mxu1 %v2044_v19  ;;  %2423 = vmatpush3.msra.mxu0 %v2197_v62  ;;  %v2203_v19 = vld [vmem:[%s3667_s9 + $0xa0] sm:$0xff] }
 0x70f   :  { %2149 = vmatpush2.msra.mxu1 %v2043_v20  ;;  %2424 = vmatprep.subr.mxu0 %v2212_v63  ;;  %v2187_v20 = vld [vmem:[%s3667_s9 + $0x20] sm:$0xff] }
 0x710   :  { %2150 = vmatprep.subr.mxu1 %v2042_v40  ;;  %2425 = vmatpush3.msra.mxu0 %v2196_v0  ;;  %v2186_v40 = vld [vmem:[%s3667_s9 + $0x18] sm:$0xff] }
 0x711   :  { %1958 = vrot.lane.b32.xlu1 %v3335_v27, %s2684_s30  ;;  %1923 = vrot.lane.b32.xlu0 %v3355_v33, %s2683_s21  ;;  %v2037_v27 = vld [vmem:[%s3665_s7 + $0x100] sm:$0xff] }
 0x712   :  { %2151 = vmatpush2.msra.mxu1 %v2041_v23  ;;  %v2185_v23 = vld [vmem:[%s3667_s9 + $0x10] sm:$0xff] }
 0x713   :  { %2152 = vmatprep.subr.mxu1 %v2040_v24  ;;  %v2200_v24 = vld [vmem:[%s3667_s9 + $0x88] sm:$0xff] }
 0x714   :  { %2153 = vmatpush2.msra.mxu1 %v2039_v25  ;;  %v2184_v25 = vld [vmem:[%s3667_s9 + $0x8] sm:$0xff] }
 0x715   :  { %1838 = vrot.lane.b32.xlu1 %v3373_v36, %s2682_s4  ;;  %1988 = vrot.lane.b32.xlu0 %v3355_v33, %s2684_s30 }
 0x716   :  { %2154 = vmatprep.subr.mxu1 %v2038_v50  ;;  %v2199_v50 = vld [vmem:[%s3667_s9 + $0x80] sm:$0xff] }
 0x717   :  { %2155 = vmatpush2.msra.mxu1 %v2037_v27  ;;  %v2073_v27 = vsub.s32 0, %v3243_v60 }
 0x719   :  { %1877 = vrot.lane.b32.xlu1 %v3394_v43, %s2685_s6  ;;  %1900 = vrot.lane.b32.xlu0 %v3396_v44, %s2682_s4 }
 0x71d   :  { %1966 = vrot.lane.b32.xlu1 %v3394_v43, %s2686_s12  ;;  %1934 = vrot.lane.b32.xlu0 %v3417_v51, %s2685_s6 }
 0x721   :  { %1851 = vrot.lane.b32.xlu1 %v1850_v58, %s2684_s30  ;;  %1996 = vrot.lane.b32.xlu0 %v3417_v51, %s2686_s12 }
 0x725   :  { %1954 = vrot.lane.b32.xlu1 %v1850_v58, %s2681_s3  ;;  %1911 = vrot.lane.b32.xlu0 %v1910_v1, %s2684_s30 }
 0x729   :  { %1871 = vrot.lane.b32.xlu1 %v1870_v7, %s2686_s12  ;;  %1984 = vrot.lane.b32.xlu0 %v1910_v1, %s2681_s3  ;;  %v2211_v1 = vld [vmem:[%s3667_s9 + $0xe0] sm:$0xff] }
 0x72a   :  { %2426 = vmatprep.subr.mxu0 %v2211_v1 }
 0x72b   :  { %2427 = vmatpush3.msra.mxu0 %v2195_v2 }
 0x72c   :  { %2428 = vmatprep.subr.mxu0 %v2210_v3 }
 0x72d   :  { %1962 = vrot.lane.b32.xlu1 %v1870_v7, %s2683_s21  ;;  %1929 = vrot.lane.b32.xlu0 %v1928_v15, %s2686_s12  ;;  %v2193_v7 = vld [vmem:[%s3667_s9 + $0x50] sm:$0xff] }
 0x72e   :  { %2429 = vmatpush3.msra.mxu0 %v2194_v4 }
 0x72f   :  { %2430 = vmatprep.subr.mxu0 %v2209_v5 }
 0x730   :  { %2431 = vmatpush3.msra.mxu0 %v2193_v7 }
 0x731   :  { %1884 = vrot.lane.b32.xlu1 %v1883_v21, %s2680_s20  ;;  %1992 = vrot.lane.b32.xlu0 %v1928_v15, %s2683_s21  ;;  %v2205_v15 = vld [vmem:[%s3667_s9 + $0xb0] sm:$0xff] }
 0x732   :  { %2432 = vmatprep.subr.mxu0 %v2208_v9 }
 0x733   :  { %2433 = vmatpush3.msra.mxu0 %v2192_v10 }
 0x734   :  { %2434 = vmatprep.subr.mxu0 %v2207_v11 }
 0x735   :  { %1970 = vrot.lane.b32.xlu1 %v1883_v21, %s2685_s6  ;;  %1940 = vrot.lane.b32.xlu0 %v1939_v56, %s2680_s20  ;;  %v2202_v21 = vld [vmem:[%s3667_s9 + $0x98] sm:$0xff] }
 0x736   :  { %2435 = vmatpush3.msra.mxu0 %v2191_v12 }
 0x737   :  { %2436 = vmatprep.subr.mxu0 %v2206_v13 }
 0x738   :  { %2437 = vmatpush3.msra.mxu0 %v2190_v8 }
 0x739   :  { %2000 = vrot.lane.b32.xlu0 %v1939_v56, %s2685_s6  ;;  %2438 = vmatprep.subr.mxu0 %v2205_v15  ;;  %v2183_v56 = vld [vmem:[%s3667_s9] sm:$0xff] }
 0x73a   :  { %2439 = vmatpush3.msra.mxu0 %v2189_v16 }
 0x73b   :  { %2440 = vmatprep.subr.mxu0 %v2204_v17 }
 0x73c   :  { %2441 = vmatpush3.msra.mxu0 %v2188_v18 }
 0x73d   :  { %2442 = vmatprep.subr.mxu0 %v2203_v19 }
 0x73e   :  { %2443 = vmatpush3.msra.mxu0 %v2187_v20 }
 0x73f   :  { %2444 = vmatprep.subr.mxu0 %v2202_v21 }
 0x740   :  { %2445 = vmatpush3.msra.mxu0 %v2186_v40 }
 0x741   :  { %2446 = vmatprep.subr.mxu0 %v2201_v22 }
 0x742   :  { %2447 = vmatpush3.msra.mxu0 %v2185_v23 }
 0x743   :  { %2448 = vmatprep.subr.mxu0 %v2200_v24 }
 0x744   :  { %2449 = vmatpush3.msra.mxu0 %v2184_v25 }
 0x745   :  { %2450 = vmatprep.subr.mxu0 %v2199_v50 }
 0x746   :  { %2451 = vmatpush3.msra.mxu0 %v2183_v56 }
 0x773   :  { %v1945_v29 = vpop.permute.xlu1 %1944 }
 0x774   :  { %1947 = vst.msk [vmem:[#allocation4 + $0x1] sm:$0x1] %vm1826_vm9, %v1945_v29  ;;  %v2069_v29 = vld [vmem:[%s3666_s8] sm:$0x3] }
 0x775   :  { %1949 = vst.msk [vmem:[#allocation4 + $0x1] sm:$0x1] %vm1841_vm12, %v3373_v36 }
 0x777   :  { %v1845_v30 = vpop.permute.xlu1 %1844  ;;  %v1975_v28 = vpop.permute.xlu0 %1974 }
 0x778   :  { %1977 = vst.msk [vmem:[#allocation4 + $0x3] sm:$0x1] %vm1826_vm9, %v1975_v28  ;;  %v2074_v28 = vrot.slane %v2069_v29, %v2073_v27 }
 0x779   :  { %1979 = vst.msk [vmem:[#allocation4 + $0x3] sm:$0x1] %vm1841_vm12, %v3396_v44 }
 0x77b   :  { %v1951_v32 = vpop.permute.xlu1 %1950  ;;  %v1906_v49 = vpop.permute.xlu0 %1905 }
 0x77c   :  { %1953 = vst.msk [vmem:[#allocation4 + $0x1] sm:$0x1] %vm1847_vm13, %v1951_v32 }
 0x77f   :  { %v1865_v14 = vpop.permute.xlu1 %1864  ;;  %v1981_v33 = vpop.permute.xlu0 %1980 }
 0x780   :  { %1983 = vst.msk [vmem:[#allocation4 + $0x3] sm:$0x1] %vm1847_vm13, %v1981_v33 }
 0x783   :  { %v1959_v34 = vpop.permute.xlu1 %1958  ;;  %v1924_v26 = vpop.permute.xlu0 %1923 }
 0x787   :  { %v1839_v54 = vpop.permute.xlu1 %1838  ;;  %v1989_v35 = vpop.permute.xlu0 %1988 }
 0x788   :  { %1842 = vst.msk [vmem:[#allocation4] sm:$0x1] %vm1841_vm12, %v1839_v54 }
 0x789   :  { %1848 = vst.msk [vmem:[#allocation4] sm:$0x1] %vm1847_vm13, %v1845_v30  ;;  %v2077_v30 = vsub.s32 1, %v3243_v60 }
 0x78b   :  { %v1878_v36 = vpop.permute.xlu1 %1877  ;;  %v1901_v37 = vpop.permute.xlu0 %1900  ;;  %v2078_v32 = vrot.slane %v2069_v29, %v2077_v30 }
 0x78c   :  { %1903 = vst.msk [vmem:[#allocation4 + $0x2] sm:$0x1] %vm1841_vm12, %v1901_v37 }
 0x78d   :  { %1908 = vst.msk [vmem:[#allocation4 + $0x2] sm:$0x1] %vm1847_vm13, %v1906_v49 }
 0x78f   :  { %v1967_v38 = vpop.permute.xlu1 %1966  ;;  %v1935_v39 = vpop.permute.xlu0 %1934 }
 0x793   :  { %v1852_v42 = vpop.permute.xlu1 %1851  ;;  %v1997_v6 = vpop.permute.xlu0 %1996 }
 0x794   :  { %1855 = vst.msk [vmem:[#allocation4] sm:$0x1] %vm1854_vm14, %v1852_v42 }
 0x795   :  { %1868 = vst.msk [vmem:[#allocation4] sm:$0x1] %vm1867_vm15, %v1865_v14 }
 0x797   :  { %v1955_v43 = vpop.permute.xlu1 %1954  ;;  %v1912_v44 = vpop.permute.xlu0 %1911 }
 0x798   :  { %1957 = vst.msk [vmem:[#allocation4 + $0x1] sm:$0x1] %vm1854_vm14, %v1955_v43  ;;  %1914 = vst.msk [vmem:[#allocation4 + $0x2] sm:$0x1] %vm1854_vm14, %v1912_v44 }
 0x799   :  { %1961 = vst.msk [vmem:[#allocation4 + $0x1] sm:$0x1] %vm1867_vm15, %v1959_v34  ;;  %1926 = vst.msk [vmem:[#allocation4 + $0x2] sm:$0x1] %vm1867_vm15, %v1924_v26 }
 0x79b   :  { %v1872_v41 = vpop.permute.xlu1 %1871  ;;  %v1985_v45 = vpop.permute.xlu0 %1984 }
 0x79c   :  { %1875 = vst.msk [vmem:[#allocation4] sm:$0x1] %vm1874_vm1, %v1872_v41 }
 0x79d   :  { %1987 = vst.msk [vmem:[#allocation4 + $0x3] sm:$0x1] %vm1854_vm14, %v1985_v45 }
 0x79e   :  { %1881 = vst.msk [vmem:[#allocation4] sm:$0x1] %vm1880_vm0, %v1878_v36 }
 0x79f   :  { %1991 = vst.msk [vmem:[#allocation4 + $0x3] sm:$0x1] %vm1867_vm15, %v1989_v35  ;;  %v1963_v46 = vpop.permute.xlu1 %1962  ;;  %v1930_v47 = vpop.permute.xlu0 %1929 }
 0x7a0   :  { %1965 = vst.msk [vmem:[#allocation4 + $0x1] sm:$0x1] %vm1874_vm1, %v1963_v46  ;;  %1932 = vst.msk [vmem:[#allocation4 + $0x2] sm:$0x1] %vm1874_vm1, %v1930_v47 }
 0x7a1   :  { %1969 = vst.msk [vmem:[#allocation4 + $0x1] sm:$0x1] %vm1880_vm0, %v1967_v38  ;;  %1937 = vst.msk [vmem:[#allocation4 + $0x2] sm:$0x1] %vm1880_vm0, %v1935_v39 }
 0x7a3   :  { %v1885_v48 = vpop.permute.xlu1 %1884  ;;  %v1993_v51 = vpop.permute.xlu0 %1992 }
 0x7a4   :  { %1888 = vst.msk [vmem:[#allocation4] sm:$0x1] %vm1887_vm2, %v1885_v48 }
 0x7a5   :  { %1995 = vst.msk [vmem:[#allocation4 + $0x3] sm:$0x1] %vm1874_vm1, %v1993_v51 }
 0x7a6   :  { %1999 = vst.msk [vmem:[#allocation4 + $0x3] sm:$0x1] %vm1880_vm0, %v1997_v6 }
 0x7a7   :  { %v1971_v52 = vpop.permute.xlu1 %1970  ;;  %v1941_v53 = vpop.permute.xlu0 %1940 }
 0x7a8   :  { %1973 = vst.msk [vmem:[#allocation4 + $0x1] sm:$0x1] %vm1887_vm2, %v1971_v52  ;;  %1943 = vst.msk [vmem:[#allocation4 + $0x2] sm:$0x1] %vm1887_vm2, %v1941_v53  ;;  %v2328_v53 = vld [vmem:[%s3668_s10] ss:$0 sm:$0xff] }
 0x7ab   :  { %v2001_v55 = vpop.permute.xlu0 %2000 }
 0x7ac   :  { %2003 = vst.msk [vmem:[#allocation4 + $0x3] sm:$0x1] %vm1887_vm2, %v2001_v55 }
 0x7b3   :  { %v2327_v57 = vld.sshfl [vmem:[#allocation4] sm:$0x33 pattern:$0x76325410] }
 0x7b4   :  { %v2089_v58 = vcombine.high %v2327_v57, %v2327_v57 }
 0x7b6   :  { %2156 = vmatprep.mubr.f32.mxu1 %v2089_v58 }
 0x7b7   :  { %2157 = vmatmul.mubr.f32.vlgmr.msra.gmra.mxu1 %v2327_v57 }
 0x877   :  { %v2158_v49 = vpop.f32.mrf.mxu1 }
 0x878   :  { %v2159_v14 = vadd.f32 %v2158_v49, %v2074_v28 }
 0x879   :  { %v2160_v33 = vpop.f32.mrf.mxu1 }
 0x87a   :  { %v2165_v34 = vmin.f32 %v2159_v14, 20.0  ;;  %v2161_v26 = vadd.f32 %v2160_v33, %v2078_v32  ;;  %vm2163_vm3 = vcmp.gt.f32.partialorder %v2159_v14, 20.0 }
 0x87c   :  { %v2167_v54 = vmul.f32 1.442695, %v2165_v34  ;;  %v2166_v35 = vmin.f32 %v2161_v26, 20.0  ;;  %vm2164_vm4 = vcmp.gt.f32.partialorder %v2161_v26, 20.0 }
 0x87e   :  { %2604 = vpow2.f32 %v2167_v54  ;;  %v2169_v36 = vmul.f32 1.442695, %v2166_v35 }
 0x880   :  { %2606 = vpow2.f32 %v2169_v36 }
 0x88b   :  { %v2605_v37 = vpop.eup %2604 }
 0x88c   :  { %v2171_v38 = vadd.f32 1.0, %v2605_v37 }
 0x88d   :  { %v2607_v39 = vpop.eup %2606 }
 0x88e   :  { %2608 = vlog2.f32 %v2171_v38  ;;  %v2172_v42 = vadd.f32 1.0, %v2607_v39 }
 0x890   :  { %2610 = vlog2.f32 %v2172_v42 }
 0x89b   :  { %v2609_v6 = vpop.eup %2608 }
 0x89c   :  { %v2174_v60 = vmul.f32 0.6931472, %v2609_v6 }
 0x89d   :  { %v2611_v43 = vpop.eup %2610 }
 0x89e   :  { %v2177_v44 = vsel %vm2163_vm3, %v2159_v14, %v2174_v60  ;;  %v2176_v41 = vmul.f32 0.6931472, %v2611_v43 }
 0x89f   :  { %2612 = vtanh.f32 %v2177_v44 }
 0x8a0   :  { %v2178_v45 = vsel %vm2164_vm4, %v2161_v26, %v2176_v41 }
 0x8a1   :  { %2614 = vtanh.f32 %v2178_v45 }
 0x8ac   :  { %v2613_v46 = vpop.eup %2612 }
 0x8ad   :  { %v2181_v51 = vmul.f32 %v2613_v46, %v2159_v14 }
 0x8ae   :  { %v2615_v47 = vpop.eup %2614 }
 0x8af   :  { %v2182_v48 = vmul.f32 %v2615_v47, %v2161_v26 }
 0x8b1   :  { %2286 = vmatprep.mubr.f32.mxu0 %v2182_v48 }
 0x8b2   :  { %2287 = vmatmul.mubr.f32.vlgmr.msra.gmra.mxu0 %v2181_v51 }
 0x972   :  { %v2452_v52 = vpop.f32.mrf.mxu0 }
 0x974   :  { %v2453_v55 = vpop.f32.mrf.mxu0 }
 0x975   :  { %v2454_v57 = vadd.f32 %v2453_v55, %v2452_v52 }
 0x977   :  { %v2289_v58 = vadd.f32 %v2454_v57, %v2328_v53 }
 0x979   :  { %2293 = vst.msk [vmem:[#allocation8] sm:$0x3] %vm2292_vm5, %v2289_v58 }
 0x97a   :  { %2647 = shalt.err (!%p2644_p9)
}
 0x97b   :  { %2303 = dma.vmem_to_hbm [thread:$0]  %s2301_s28, 32, %s3669_s11, [#allocation7]  }
 0x97c   :  { %2658 = dma.done.wait [#allocation7], 32  }
 0x97d   :  { %2659 = vsyncadd [#allocation7], 4294967264 }
 0x97e   :  { %2307 = vsyncpa [#allocation6], 1 }
 0x97f   :  { %2308 = vsyncpa [#allocation7], 1 }

</bundles_post_ra>
